<compile_context>
chip_gen: v7x
topology: tpu7x:2x2x1
jax: 0.10.0
libtpu: 0.0.40
codegen_flags: <defaults>
</compile_context>

<pallas_src>
import functools

import jax
import jax.numpy as jnp
from jax.experimental import pallas as pl
from jax.experimental.pallas import tpu as pltpu

_LANE = 128
_MAX_BT = 1024          # cap on the batch (lane) tile per grid step


def _round_up(x, m):
    return ((x + m - 1) // m) * m


def _vmem_capacity_bytes():
    """Per-core VMEM capacity; conservative fallback = v7x (64 MiB)."""
    try:
        return int(pltpu.get_tpu_info().vmem_capacity_bytes)
    except Exception:
        return 64 * 1024 * 1024


def _plan_batch_tiles(batch, k, n, e, vmem_budget_bytes, max_bt=_MAX_BT):
    """Pick (bt, n_tiles): bt % 128 == 0, working set fits the VMEM budget, and the
    grid keeps >= 2 steps (both v7x TensorCores busy) whenever the batch allows."""
    # f32 bytes resident per batch sample: double-buffered x/out tiles, P/Q stacks,
    # per-row |P+Q| slab plus elementwise temporaries, attn@v products, small rows.
    per_sample = 4 * (4 * k * n + 2 * k * e + 3 * k * e + 2 * k * n + 4 * k)
    cap = max(_LANE, (vmem_budget_bytes // max(per_sample, 1)) // _LANE * _LANE)
    cap = min(cap, max_bt)
    b_lane = _round_up(max(batch, 1), _LANE)
    n_tiles = max(1, -(-b_lane // cap))
    if n_tiles == 1 and b_lane >= 2 * _LANE:
        n_tiles = 2                       # keep both v7x TensorCores busy
    bt = _round_up(-(-b_lane // n_tiles), _LANE)
    return bt, n_tiles


def _feature_attention_kernel(x_ref, wbig_ref, blin_ref, ablk_ref, bias_ref, out_ref,
                              *, alpha, k_nodes, e_dim):
    K = k_nodes
    E = e_dim
    N = x_ref.shape[1]
    Bt = x_ref.shape[2]

    c1 = (1.0 + alpha) * 0.5
    c2 = (1.0 - alpha) * 0.5

    v = x_ref[...]                                        # (K, N, Bt), batch on lanes

    # Linear transform of all K nodes in ONE MXU matmul (block-diagonal W1|W2):
    #   pq[i*2E + e, b] = sum_t W12[e, t] * v[i, t, b]
    pq = jnp.dot(wbig_ref[...], v.reshape(K * N, Bt),
                 preferred_element_type=jnp.float32)      # (K*2E, Bt)
    pq = pq.reshape(K, 2 * E, Bt)
    p = pq[:, :E, :] + blin_ref[...][None, :, :]          # (K, E, Bt): P_i = v_i @ W1^T + b
    q = pq[:, E:, :]                                      # (K, E, Bt): Q_j = v_j @ W2^T

    # Rank-1 projections P_i . a and Q_j . a on the MXU (block-diagonal a).
    ablk = ablk_ref[...]                                  # (K, K*E)
    pa = jnp.dot(ablk, p.reshape(K * E, Bt), preferred_element_type=jnp.float32)  # (K, Bt)
    qa = jnp.dot(ablk, q.reshape(K * E, Bt), preferred_element_type=jnp.float32)  # (K, Bt)

    bias = bias_ref[...]                                  # (K, K, 1)

    # TODO(synk): for large K/E configs, tile over attention columns j with an
    # online-softmax accumulator instead of holding all of Q and the (K, E, Bt) slab.
    for i in range(K):
        # e_ij = leakyrelu(P_i + Q_j) . a + bias_ij
        #      = c1*(P_i.a + Q_j.a) + c2*|P_i + Q_j|.a + bias_ij
        zi = jnp.abs(p[i:i + 1] + q)                      # (K, E, Bt): add + abs only
        abs_a = jnp.dot(ablk, zi.reshape(K * E, Bt),
                        preferred_element_type=jnp.float32)           # (K, Bt)
        e_i = c1 * (pa[i:i + 1] + qa) + c2 * abs_a + bias[i]          # (K, Bt)

        # Softmax over j (sublane axis). Dropout is identity in eval mode (train=False).
        e_i = e_i - jnp.max(e_i, axis=0, keepdims=True)
        w_i = jnp.exp(e_i)
        attn_i = w_i * pl.reciprocal(jnp.sum(w_i, axis=0, keepdims=True), approx=True)

        # h_i[t, b] = sum_j attn_i[j, b] * v[j, t, b]  (lane-parallel VPU FMAs)
        h_i = jnp.sum(attn_i[:, None, :] * v, axis=0)                 # (N, Bt)
        out_ref[i] = jax.nn.sigmoid(h_i).astype(out_ref.dtype)


def feature_attention_layer(x, lin_w, lin_b, a, bias, *, alpha):
    """x: (B, N, K) float32. Returns (B, N, K), matching the PyTorch forward (eval mode)."""
    B, N, K = x.shape
    E = lin_w.shape[0]                 # embed_dim (already doubled for GATv2), default 2*N
    assert lin_w.shape == (E, 2 * N)
    assert a.shape == (E, 1)
    assert bias.shape == (K, K)

    vmem_cap = _vmem_capacity_bytes()
    bt, n_tiles = _plan_batch_tiles(B, K, N, E, int(0.35 * vmem_cap))
    b_pad = bt * n_tiles

    # Batch-on-lanes layout: one wrapper HBM transpose; pad batch up to the lane tiling.
    x_t = jnp.transpose(x.astype(jnp.float32), (2, 1, 0))            # (K, N, B)
    if b_pad != B:
        x_t = jnp.pad(x_t, ((0, 0), (0, 0), (0, b_pad - B)))

    # Fused W1|W2, replicated block-diagonally so one matmul transforms all K nodes.
    w12 = jnp.concatenate([lin_w[:, :N], lin_w[:, N:]], axis=0).astype(jnp.float32)   # (2E, N)
    eye_k = jnp.eye(K, dtype=jnp.float32)
    w_big = jnp.kron(eye_k, w12)                                      # (K*2E, K*N)
    a_blk = jnp.kron(eye_k, a.reshape(1, E).astype(jnp.float32))      # (K, K*E)
    blin = lin_b.reshape(E, 1).astype(jnp.float32)
    bias_b = bias.astype(jnp.float32)[:, :, None]                     # (K, K, 1)

    kernel = functools.partial(_feature_attention_kernel,
                               alpha=alpha, k_nodes=K, e_dim=E)

    # Note: if xprof still shows exposed input DMA at large Bt, the x in_spec can take
    # pipeline_mode=pl.Buffered(3) for deeper pipelining.
    out_t = pl.pallas_call(
        kernel,
        out_shape=jax.ShapeDtypeStruct((K, N, b_pad), jnp.float32),
        grid_spec=pltpu.PrefetchScalarGridSpec(
            num_scalar_prefetch=0,
            grid=(n_tiles,),
            in_specs=[
                pl.BlockSpec((K, N, bt), lambda b: (0, 0, b)),         # x, batch tile on lanes
                pl.BlockSpec((K * 2 * E, K * N), lambda b: (0, 0)),    # block-diag W1|W2
                pl.BlockSpec((E, 1), lambda b: (0, 0)),                # lin bias
                pl.BlockSpec((K, K * E), lambda b: (0, 0)),            # block-diag a
                pl.BlockSpec((K, K, 1), lambda b: (0, 0, 0)),          # attention bias
            ],
            out_specs=pl.BlockSpec((K, N, bt), lambda b: (0, 0, b)),
        ),
        compiler_params=pltpu.CompilerParams(
            dimension_semantics=("parallel",),
            vmem_limit_bytes=int(0.7 * vmem_cap),
        ),
    )(x_t, w_big, blin, a_blk, bias_b)

    return jnp.transpose(out_t[:, :, :B], (2, 1, 0))                  # (B, N, K)


def _reference(x, lin_w, lin_b, a, bias, *, alpha):
    """Pure-JAX replica of the PyTorch forward (GATv2, eval mode)."""
    B, N, K = x.shape
    v = jnp.transpose(x, (0, 2, 1))                                   # (B, K, N)
    rep = jnp.repeat(v, K, axis=1)                                    # (B, K*K, N)
    alt = jnp.tile(v, (1, K, 1))                                      # (B, K*K, N)
    a_input = jnp.concatenate([rep, alt], axis=2).reshape(B, K, K, 2 * N)
    z = a_input @ lin_w.T + lin_b                                     # (B, K, K, E)
    z = jnp.where(z >= 0, z, alpha * z)
    e = jnp.squeeze(z @ a, axis=3) + bias                             # (B, K, K)
    attn = jax.nn.softmax(e, axis=2)
    h = jax.nn.sigmoid(attn @ v)                                      # (B, K, N)
    return jnp.transpose(h, (0, 2, 1))


if __name__ == "__main__":
    # Small shapes consistent with the module: batch=2, window_size=16, n_features=8.
    B, N, K = 2, 16, 8
    ALPHA = 0.2
    E = 2 * N           # embed_dim defaults to window_size, doubled by GATv2

    key = jax.random.PRNGKey(0)
    kx, kw, kb, ka, kbias = jax.random.split(key, 5)

    x = jax.random.normal(kx, (B, N, K), dtype=jnp.float32)

    # Deterministic parameter init mirroring the module's shapes.
    xav_w = (6.0 / (2 * N + E)) ** 0.5
    lin_w = jax.random.uniform(kw, (E, 2 * N), jnp.float32, -xav_w, xav_w)
    lin_b = jax.random.uniform(kb, (E,), jnp.float32, -0.1, 0.1)
    xav_a = 1.414 * (6.0 / (E + 1)) ** 0.5
    a = jax.random.uniform(ka, (E, 1), jnp.float32, -xav_a, xav_a)
    # Module inits bias to zeros; use non-zero values here to exercise the bias path.
    bias = 0.1 * jax.random.normal(kbias, (K, K), dtype=jnp.float32)

    out = feature_attention_layer(x, lin_w, lin_b, a, bias, alpha=ALPHA)
    out = jax.block_until_ready(out)

    ref = _reference(x, lin_w, lin_b, a, bias, alpha=ALPHA)
    assert out.shape == (B, N, K)
    # Tolerance accounts for the EUP approximate reciprocal in the softmax normalization.
    assert jnp.allclose(out, ref, atol=5e-3, rtol=5e-3), "mismatch vs reference"

    print("KERNEL_OK")
</pallas_src>

<mosaic_0001>
module attributes {stable_mosaic.version = 11 : i64} {
  func.func @_feature_attention_kernel(%arg0: i32, %arg1: memref<8x16x128xf32, #tpu.memory_space<vmem>>, %arg2: memref<512x128xf32, #tpu.memory_space<vmem>>, %arg3: memref<32x1xf32, #tpu.memory_space<vmem>>, %arg4: memref<8x256xf32, #tpu.memory_space<vmem>>, %arg5: memref<8x8x1xf32, #tpu.memory_space<vmem>>, %arg6: memref<8x16x128xf32, #tpu.memory_space<vmem>>) attributes {dimension_semantics = [#tpu.dimension_semantics<parallel>], iteration_bounds = array<i64: 1>, scalar_prefetch = 0 : i64, scratch_operands = 0 : i64, tpu.core_type = #tpu.core_type<tc>, window_params = [{transform_indices = @transform_0, window_bounds = array<i64: 8, 16, 128>}, {pipeline_mode = #tpu.pipeline_mode<synchronous>, transform_indices = @transform_1, window_bounds = array<i64: 512, 128>}, {pipeline_mode = #tpu.pipeline_mode<synchronous>, transform_indices = @transform_2, window_bounds = array<i64: 32, 1>}, {pipeline_mode = #tpu.pipeline_mode<synchronous>, transform_indices = @transform_3, window_bounds = array<i64: 8, 256>}, {pipeline_mode = #tpu.pipeline_mode<synchronous>, transform_indices = @transform_4, window_bounds = array<i64: 8, 8, 1>}, {transform_indices = @transform_5, window_bounds = array<i64: 8, 16, 128>}]} {
    %c0 = arith.constant 0 : index
    %c0_0 = arith.constant 0 : index
    %c0_1 = arith.constant 0 : index
    %0 = vector.load %arg1[%c0, %c0_0, %c0_1] : memref<8x16x128xf32, #tpu.memory_space<vmem>>, vector<8x16x128xf32>
    %c0_2 = arith.constant 0 : index
    %c0_3 = arith.constant 0 : index
    %1 = vector.load %arg2[%c0_2, %c0_3] : memref<512x128xf32, #tpu.memory_space<vmem>>, vector<512x128xf32>
    %2 = vector.shape_cast %0 : vector<8x16x128xf32> to vector<128x128xf32>
    %cst = arith.constant dense<0.000000e+00> : vector<512x128xf32>
    %3 = tpu.matmul %1, %2, %cst {dimension_numbers = #tpu.dot_dimension_numbers<[1], [0], [0], [1], [0, 0, 1, 1], [], []>} : vector<512x128xf32>, vector<128x128xf32>, vector<512x128xf32> -> vector<512x128xf32>
    %4 = vector.shape_cast %3 : vector<512x128xf32> to vector<8x64x128xf32>
    %5 = vector.extract_strided_slice %4 {offsets = [0, 0, 0], sizes = [8, 32, 128], strides = [1, 1, 1]} : vector<8x64x128xf32> to vector<8x32x128xf32>
    %c0_4 = arith.constant 0 : index
    %c0_5 = arith.constant 0 : index
    %6 = vector.load %arg3[%c0_4, %c0_5] : memref<32x1xf32, #tpu.memory_space<vmem>>, vector<32x1xf32>
    %7 = vector.shape_cast %6 : vector<32x1xf32> to vector<1x32x1xf32>
    %8 = vector.broadcast %7 : vector<1x32x1xf32> to vector<8x32x128xf32>
    %9 = arith.addf %5, %8 : vector<8x32x128xf32>
    %10 = vector.extract_strided_slice %4 {offsets = [0, 32, 0], sizes = [8, 32, 128], strides = [1, 1, 1]} : vector<8x64x128xf32> to vector<8x32x128xf32>
    %c0_6 = arith.constant 0 : index
    %c0_7 = arith.constant 0 : index
    %11 = vector.load %arg4[%c0_6, %c0_7] : memref<8x256xf32, #tpu.memory_space<vmem>>, vector<8x256xf32>
    %12 = vector.shape_cast %9 : vector<8x32x128xf32> to vector<256x128xf32>
    %cst_8 = arith.constant dense<0.000000e+00> : vector<8x128xf32>
    %13 = tpu.matmul %11, %12, %cst_8 {dimension_numbers = #tpu.dot_dimension_numbers<[1], [0], [0], [1], [0, 0, 1, 1], [], []>} : vector<8x256xf32>, vector<256x128xf32>, vector<8x128xf32> -> vector<8x128xf32>
    %14 = vector.shape_cast %10 : vector<8x32x128xf32> to vector<256x128xf32>
    %cst_9 = arith.constant dense<0.000000e+00> : vector<8x128xf32>
    %15 = tpu.matmul %11, %14, %cst_9 {dimension_numbers = #tpu.dot_dimension_numbers<[1], [0], [0], [1], [0, 0, 1, 1], [], []>} : vector<8x256xf32>, vector<256x128xf32>, vector<8x128xf32> -> vector<8x128xf32>
    %c0_10 = arith.constant 0 : index
    %c0_11 = arith.constant 0 : index
    %c0_12 = arith.constant 0 : index
    %16 = vector.load %arg5[%c0_10, %c0_11, %c0_12] : memref<8x8x1xf32, #tpu.memory_space<vmem>>, vector<8x8x1xf32>
    %17 = vector.extract_strided_slice %9 {offsets = [0, 0, 0], sizes = [1, 32, 128], strides = [1, 1, 1]} : vector<8x32x128xf32> to vector<1x32x128xf32>
    %18 = vector.broadcast %17 : vector<1x32x128xf32> to vector<8x32x128xf32>
    %19 = arith.addf %18, %10 : vector<8x32x128xf32>
    %20 = math.absf %19 : vector<8x32x128xf32>
    %21 = vector.shape_cast %20 : vector<8x32x128xf32> to vector<256x128xf32>
    %cst_13 = arith.constant dense<0.000000e+00> : vector<8x128xf32>
    %22 = tpu.matmul %11, %21, %cst_13 {dimension_numbers = #tpu.dot_dimension_numbers<[1], [0], [0], [1], [0, 0, 1, 1], [], []>} : vector<8x256xf32>, vector<256x128xf32>, vector<8x128xf32> -> vector<8x128xf32>
    %23 = vector.extract_strided_slice %13 {offsets = [0, 0], sizes = [1, 128], strides = [1, 1]} : vector<8x128xf32> to vector<1x128xf32>
    %24 = vector.broadcast %23 : vector<1x128xf32> to vector<8x128xf32>
    %25 = arith.addf %24, %15 : vector<8x128xf32>
    %cst_14 = arith.constant 6.000000e-01 : f32
    %26 = vector.broadcast %cst_14 : f32 to vector<8x128xf32>
    %27 = arith.mulf %26, %25 : vector<8x128xf32>
    %cst_15 = arith.constant 4.000000e-01 : f32
    %28 = vector.broadcast %cst_15 : f32 to vector<8x128xf32>
    %29 = arith.mulf %28, %22 : vector<8x128xf32>
    %30 = arith.addf %27, %29 : vector<8x128xf32>
    %31 = vector.extract_strided_slice %16 {offsets = [0, 0, 0], sizes = [1, 8, 1], strides = [1, 1, 1]} : vector<8x8x1xf32> to vector<1x8x1xf32>
    %32 = vector.shape_cast %31 : vector<1x8x1xf32> to vector<8x1xf32>
    %33 = vector.broadcast %32 : vector<8x1xf32> to vector<8x128xf32>
    %34 = arith.addf %30, %33 : vector<8x128xf32>
    %cst_16 = arith.constant dense<0xFF800000> : vector<128xf32>
    %35 = vector.multi_reduction <maximumf>, %34, %cst_16 [0] : vector<8x128xf32> to vector<128xf32>
    %36 = vector.shape_cast %35 : vector<128xf32> to vector<1x128xf32>
    %37 = vector.broadcast %36 : vector<1x128xf32> to vector<8x128xf32>
    %38 = arith.subf %34, %37 : vector<8x128xf32>
    %39 = math.exp %38 : vector<8x128xf32>
    %cst_17 = arith.constant dense<0.000000e+00> : vector<128xf32>
    %40 = vector.multi_reduction <add>, %39, %cst_17 [0] : vector<8x128xf32> to vector<128xf32>
    %41 = vector.shape_cast %40 : vector<128xf32> to vector<1x128xf32>
    %42 = tpu.reciprocal %41 {approx = true} : vector<1x128xf32> -> vector<1x128xf32>
    %43 = vector.broadcast %42 : vector<1x128xf32> to vector<8x128xf32>
    %44 = arith.mulf %39, %43 : vector<8x128xf32>
    %45 = vector.shape_cast %44 : vector<8x128xf32> to vector<8x1x128xf32>
    %46 = vector.broadcast %45 : vector<8x1x128xf32> to vector<8x16x128xf32>
    %47 = arith.mulf %46, %0 : vector<8x16x128xf32>
    %cst_18 = arith.constant dense<0.000000e+00> : vector<16x128xf32>
    %48 = vector.multi_reduction <add>, %47, %cst_18 [0] : vector<8x16x128xf32> to vector<16x128xf32>
    %49 = arith.negf %48 : vector<16x128xf32>
    %50 = math.exp %49 : vector<16x128xf32>
    %cst_19 = arith.constant 1.000000e+00 : f32
    %51 = vector.broadcast %cst_19 : f32 to vector<16x128xf32>
    %52 = arith.addf %51, %50 : vector<16x128xf32>
    %53 = arith.divf %51, %52 : vector<16x128xf32>
    %c0_20 = arith.constant 0 : index
    %c0_21 = arith.constant 0 : index
    %c0_22 = arith.constant 0 : index
    %54 = vector.load %arg6[%c0_20, %c0_21, %c0_22] : memref<8x16x128xf32, #tpu.memory_space<vmem>>, vector<1x16x128xf32>
    %55 = vector.shape_cast %54 : vector<1x16x128xf32> to vector<16x128xf32>
    %56 = vector.shape_cast %53 : vector<16x128xf32> to vector<1x16x128xf32>
    tpu.vector_store %arg6[%c0_20, %c0_21, %c0_22], %56 {strides = array<i32>} : memref<8x16x128xf32, #tpu.memory_space<vmem>>, vector<1x16x128xf32>,
    %57 = vector.extract_strided_slice %9 {offsets = [1, 0, 0], sizes = [1, 32, 128], strides = [1, 1, 1]} : vector<8x32x128xf32> to vector<1x32x128xf32>
    %58 = vector.broadcast %57 : vector<1x32x128xf32> to vector<8x32x128xf32>
    %59 = arith.addf %58, %10 : vector<8x32x128xf32>
    %60 = math.absf %59 : vector<8x32x128xf32>
    %61 = vector.shape_cast %60 : vector<8x32x128xf32> to vector<256x128xf32>
    %cst_23 = arith.constant dense<0.000000e+00> : vector<8x128xf32>
    %62 = tpu.matmul %11, %61, %cst_23 {dimension_numbers = #tpu.dot_dimension_numbers<[1], [0], [0], [1], [0, 0, 1, 1], [], []>} : vector<8x256xf32>, vector<256x128xf32>, vector<8x128xf32> -> vector<8x128xf32>
    %63 = vector.extract_strided_slice %13 {offsets = [1, 0], sizes = [1, 128], strides = [1, 1]} : vector<8x128xf32> to vector<1x128xf32>
    %64 = vector.broadcast %63 : vector<1x128xf32> to vector<8x128xf32>
    %65 = arith.addf %64, %15 : vector<8x128xf32>
    %cst_24 = arith.constant 6.000000e-01 : f32
    %66 = vector.broadcast %cst_24 : f32 to vector<8x128xf32>
    %67 = arith.mulf %66, %65 : vector<8x128xf32>
    %cst_25 = arith.constant 4.000000e-01 : f32
    %68 = vector.broadcast %cst_25 : f32 to vector<8x128xf32>
    %69 = arith.mulf %68, %62 : vector<8x128xf32>
    %70 = arith.addf %67, %69 : vector<8x128xf32>
    %71 = vector.extract_strided_slice %16 {offsets = [1, 0, 0], sizes = [1, 8, 1], strides = [1, 1, 1]} : vector<8x8x1xf32> to vector<1x8x1xf32>
    %72 = vector.shape_cast %71 : vector<1x8x1xf32> to vector<8x1xf32>
    %73 = vector.broadcast %72 : vector<8x1xf32> to vector<8x128xf32>
    %74 = arith.addf %70, %73 : vector<8x128xf32>
    %cst_26 = arith.constant dense<0xFF800000> : vector<128xf32>
    %75 = vector.multi_reduction <maximumf>, %74, %cst_26 [0] : vector<8x128xf32> to vector<128xf32>
    %76 = vector.shape_cast %75 : vector<128xf32> to vector<1x128xf32>
    %77 = vector.broadcast %76 : vector<1x128xf32> to vector<8x128xf32>
    %78 = arith.subf %74, %77 : vector<8x128xf32>
    %79 = math.exp %78 : vector<8x128xf32>
    %cst_27 = arith.constant dense<0.000000e+00> : vector<128xf32>
    %80 = vector.multi_reduction <add>, %79, %cst_27 [0] : vector<8x128xf32> to vector<128xf32>
    %81 = vector.shape_cast %80 : vector<128xf32> to vector<1x128xf32>
    %82 = tpu.reciprocal %81 {approx = true} : vector<1x128xf32> -> vector<1x128xf32>
    %83 = vector.broadcast %82 : vector<1x128xf32> to vector<8x128xf32>
    %84 = arith.mulf %79, %83 : vector<8x128xf32>
    %85 = vector.shape_cast %84 : vector<8x128xf32> to vector<8x1x128xf32>
    %86 = vector.broadcast %85 : vector<8x1x128xf32> to vector<8x16x128xf32>
    %87 = arith.mulf %86, %0 : vector<8x16x128xf32>
    %cst_28 = arith.constant dense<0.000000e+00> : vector<16x128xf32>
    %88 = vector.multi_reduction <add>, %87, %cst_28 [0] : vector<8x16x128xf32> to vector<16x128xf32>
    %89 = arith.negf %88 : vector<16x128xf32>
    %90 = math.exp %89 : vector<16x128xf32>
    %cst_29 = arith.constant 1.000000e+00 : f32
    %91 = vector.broadcast %cst_29 : f32 to vector<16x128xf32>
    %92 = arith.addf %91, %90 : vector<16x128xf32>
    %93 = arith.divf %91, %92 : vector<16x128xf32>
    %c1 = arith.constant 1 : index
    %c0_30 = arith.constant 0 : index
    %c0_31 = arith.constant 0 : index
    %94 = vector.load %arg6[%c1, %c0_30, %c0_31] : memref<8x16x128xf32, #tpu.memory_space<vmem>>, vector<1x16x128xf32>
    %95 = vector.shape_cast %94 : vector<1x16x128xf32> to vector<16x128xf32>
    %96 = vector.shape_cast %93 : vector<16x128xf32> to vector<1x16x128xf32>
    tpu.vector_store %arg6[%c1, %c0_30, %c0_31], %96 {strides = array<i32>} : memref<8x16x128xf32, #tpu.memory_space<vmem>>, vector<1x16x128xf32>,
    %97 = vector.extract_strided_slice %9 {offsets = [2, 0, 0], sizes = [1, 32, 128], strides = [1, 1, 1]} : vector<8x32x128xf32> to vector<1x32x128xf32>
    %98 = vector.broadcast %97 : vector<1x32x128xf32> to vector<8x32x128xf32>
    %99 = arith.addf %98, %10 : vector<8x32x128xf32>
    %100 = math.absf %99 : vector<8x32x128xf32>
    %101 = vector.shape_cast %100 : vector<8x32x128xf32> to vector<256x128xf32>
    %cst_32 = arith.constant dense<0.000000e+00> : vector<8x128xf32>
    %102 = tpu.matmul %11, %101, %cst_32 {dimension_numbers = #tpu.dot_dimension_numbers<[1], [0], [0], [1], [0, 0, 1, 1], [], []>} : vector<8x256xf32>, vector<256x128xf32>, vector<8x128xf32> -> vector<8x128xf32>
    %103 = vector.extract_strided_slice %13 {offsets = [2, 0], sizes = [1, 128], strides = [1, 1]} : vector<8x128xf32> to vector<1x128xf32>
    %104 = vector.broadcast %103 : vector<1x128xf32> to vector<8x128xf32>
    %105 = arith.addf %104, %15 : vector<8x128xf32>
    %cst_33 = arith.constant 6.000000e-01 : f32
    %106 = vector.broadcast %cst_33 : f32 to vector<8x128xf32>
    %107 = arith.mulf %106, %105 : vector<8x128xf32>
    %cst_34 = arith.constant 4.000000e-01 : f32
    %108 = vector.broadcast %cst_34 : f32 to vector<8x128xf32>
    %109 = arith.mulf %108, %102 : vector<8x128xf32>
    %110 = arith.addf %107, %109 : vector<8x128xf32>
    %111 = vector.extract_strided_slice %16 {offsets = [2, 0, 0], sizes = [1, 8, 1], strides = [1, 1, 1]} : vector<8x8x1xf32> to vector<1x8x1xf32>
    %112 = vector.shape_cast %111 : vector<1x8x1xf32> to vector<8x1xf32>
    %113 = vector.broadcast %112 : vector<8x1xf32> to vector<8x128xf32>
    %114 = arith.addf %110, %113 : vector<8x128xf32>
    %cst_35 = arith.constant dense<0xFF800000> : vector<128xf32>
    %115 = vector.multi_reduction <maximumf>, %114, %cst_35 [0] : vector<8x128xf32> to vector<128xf32>
    %116 = vector.shape_cast %115 : vector<128xf32> to vector<1x128xf32>
    %117 = vector.broadcast %116 : vector<1x128xf32> to vector<8x128xf32>
    %118 = arith.subf %114, %117 : vector<8x128xf32>
    %119 = math.exp %118 : vector<8x128xf32>
    %cst_36 = arith.constant dense<0.000000e+00> : vector<128xf32>
    %120 = vector.multi_reduction <add>, %119, %cst_36 [0] : vector<8x128xf32> to vector<128xf32>
    %121 = vector.shape_cast %120 : vector<128xf32> to vector<1x128xf32>
    %122 = tpu.reciprocal %121 {approx = true} : vector<1x128xf32> -> vector<1x128xf32>
    %123 = vector.broadcast %122 : vector<1x128xf32> to vector<8x128xf32>
    %124 = arith.mulf %119, %123 : vector<8x128xf32>
    %125 = vector.shape_cast %124 : vector<8x128xf32> to vector<8x1x128xf32>
    %126 = vector.broadcast %125 : vector<8x1x128xf32> to vector<8x16x128xf32>
    %127 = arith.mulf %126, %0 : vector<8x16x128xf32>
    %cst_37 = arith.constant dense<0.000000e+00> : vector<16x128xf32>
    %128 = vector.multi_reduction <add>, %127, %cst_37 [0] : vector<8x16x128xf32> to vector<16x128xf32>
    %129 = arith.negf %128 : vector<16x128xf32>
    %130 = math.exp %129 : vector<16x128xf32>
    %cst_38 = arith.constant 1.000000e+00 : f32
    %131 = vector.broadcast %cst_38 : f32 to vector<16x128xf32>
    %132 = arith.addf %131, %130 : vector<16x128xf32>
    %133 = arith.divf %131, %132 : vector<16x128xf32>
    %c2 = arith.constant 2 : index
    %c0_39 = arith.constant 0 : index
    %c0_40 = arith.constant 0 : index
    %134 = vector.load %arg6[%c2, %c0_39, %c0_40] : memref<8x16x128xf32, #tpu.memory_space<vmem>>, vector<1x16x128xf32>
    %135 = vector.shape_cast %134 : vector<1x16x128xf32> to vector<16x128xf32>
    %136 = vector.shape_cast %133 : vector<16x128xf32> to vector<1x16x128xf32>
    tpu.vector_store %arg6[%c2, %c0_39, %c0_40], %136 {strides = array<i32>} : memref<8x16x128xf32, #tpu.memory_space<vmem>>, vector<1x16x128xf32>,
    %137 = vector.extract_strided_slice %9 {offsets = [3, 0, 0], sizes = [1, 32, 128], strides = [1, 1, 1]} : vector<8x32x128xf32> to vector<1x32x128xf32>
    %138 = vector.broadcast %137 : vector<1x32x128xf32> to vector<8x32x128xf32>
    %139 = arith.addf %138, %10 : vector<8x32x128xf32>
    %140 = math.absf %139 : vector<8x32x128xf32>
    %141 = vector.shape_cast %140 : vector<8x32x128xf32> to vector<256x128xf32>
    %cst_41 = arith.constant dense<0.000000e+00> : vector<8x128xf32>
    %142 = tpu.matmul %11, %141, %cst_41 {dimension_numbers = #tpu.dot_dimension_numbers<[1], [0], [0], [1], [0, 0, 1, 1], [], []>} : vector<8x256xf32>, vector<256x128xf32>, vector<8x128xf32> -> vector<8x128xf32>
    %143 = vector.extract_strided_slice %13 {offsets = [3, 0], sizes = [1, 128], strides = [1, 1]} : vector<8x128xf32> to vector<1x128xf32>
    %144 = vector.broadcast %143 : vector<1x128xf32> to vector<8x128xf32>
    %145 = arith.addf %144, %15 : vector<8x128xf32>
    %cst_42 = arith.constant 6.000000e-01 : f32
    %146 = vector.broadcast %cst_42 : f32 to vector<8x128xf32>
    %147 = arith.mulf %146, %145 : vector<8x128xf32>
    %cst_43 = arith.constant 4.000000e-01 : f32
    %148 = vector.broadcast %cst_43 : f32 to vector<8x128xf32>
    %149 = arith.mulf %148, %142 : vector<8x128xf32>
    %150 = arith.addf %147, %149 : vector<8x128xf32>
    %151 = vector.extract_strided_slice %16 {offsets = [3, 0, 0], sizes = [1, 8, 1], strides = [1, 1, 1]} : vector<8x8x1xf32> to vector<1x8x1xf32>
    %152 = vector.shape_cast %151 : vector<1x8x1xf32> to vector<8x1xf32>
    %153 = vector.broadcast %152 : vector<8x1xf32> to vector<8x128xf32>
    %154 = arith.addf %150, %153 : vector<8x128xf32>
    %cst_44 = arith.constant dense<0xFF800000> : vector<128xf32>
    %155 = vector.multi_reduction <maximumf>, %154, %cst_44 [0] : vector<8x128xf32> to vector<128xf32>
    %156 = vector.shape_cast %155 : vector<128xf32> to vector<1x128xf32>
    %157 = vector.broadcast %156 : vector<1x128xf32> to vector<8x128xf32>
    %158 = arith.subf %154, %157 : vector<8x128xf32>
    %159 = math.exp %158 : vector<8x128xf32>
    %cst_45 = arith.constant dense<0.000000e+00> : vector<128xf32>
    %160 = vector.multi_reduction <add>, %159, %cst_45 [0] : vector<8x128xf32> to vector<128xf32>
    %161 = vector.shape_cast %160 : vector<128xf32> to vector<1x128xf32>
    %162 = tpu.reciprocal %161 {approx = true} : vector<1x128xf32> -> vector<1x128xf32>
    %163 = vector.broadcast %162 : vector<1x128xf32> to vector<8x128xf32>
    %164 = arith.mulf %159, %163 : vector<8x128xf32>
    %165 = vector.shape_cast %164 : vector<8x128xf32> to vector<8x1x128xf32>
    %166 = vector.broadcast %165 : vector<8x1x128xf32> to vector<8x16x128xf32>
    %167 = arith.mulf %166, %0 : vector<8x16x128xf32>
    %cst_46 = arith.constant dense<0.000000e+00> : vector<16x128xf32>
    %168 = vector.multi_reduction <add>, %167, %cst_46 [0] : vector<8x16x128xf32> to vector<16x128xf32>
    %169 = arith.negf %168 : vector<16x128xf32>
    %170 = math.exp %169 : vector<16x128xf32>
    %cst_47 = arith.constant 1.000000e+00 : f32
    %171 = vector.broadcast %cst_47 : f32 to vector<16x128xf32>
    %172 = arith.addf %171, %170 : vector<16x128xf32>
    %173 = arith.divf %171, %172 : vector<16x128xf32>
    %c3 = arith.constant 3 : index
    %c0_48 = arith.constant 0 : index
    %c0_49 = arith.constant 0 : index
    %174 = vector.load %arg6[%c3, %c0_48, %c0_49] : memref<8x16x128xf32, #tpu.memory_space<vmem>>, vector<1x16x128xf32>
    %175 = vector.shape_cast %174 : vector<1x16x128xf32> to vector<16x128xf32>
    %176 = vector.shape_cast %173 : vector<16x128xf32> to vector<1x16x128xf32>
    tpu.vector_store %arg6[%c3, %c0_48, %c0_49], %176 {strides = array<i32>} : memref<8x16x128xf32, #tpu.memory_space<vmem>>, vector<1x16x128xf32>,
    %177 = vector.extract_strided_slice %9 {offsets = [4, 0, 0], sizes = [1, 32, 128], strides = [1, 1, 1]} : vector<8x32x128xf32> to vector<1x32x128xf32>
    %178 = vector.broadcast %177 : vector<1x32x128xf32> to vector<8x32x128xf32>
    %179 = arith.addf %178, %10 : vector<8x32x128xf32>
    %180 = math.absf %179 : vector<8x32x128xf32>
    %181 = vector.shape_cast %180 : vector<8x32x128xf32> to vector<256x128xf32>
    %cst_50 = arith.constant dense<0.000000e+00> : vector<8x128xf32>
    %182 = tpu.matmul %11, %181, %cst_50 {dimension_numbers = #tpu.dot_dimension_numbers<[1], [0], [0], [1], [0, 0, 1, 1], [], []>} : vector<8x256xf32>, vector<256x128xf32>, vector<8x128xf32> -> vector<8x128xf32>
    %183 = vector.extract_strided_slice %13 {offsets = [4, 0], sizes = [1, 128], strides = [1, 1]} : vector<8x128xf32> to vector<1x128xf32>
    %184 = vector.broadcast %183 : vector<1x128xf32> to vector<8x128xf32>
    %185 = arith.addf %184, %15 : vector<8x128xf32>
    %cst_51 = arith.constant 6.000000e-01 : f32
    %186 = vector.broadcast %cst_51 : f32 to vector<8x128xf32>
    %187 = arith.mulf %186, %185 : vector<8x128xf32>
    %cst_52 = arith.constant 4.000000e-01 : f32
    %188 = vector.broadcast %cst_52 : f32 to vector<8x128xf32>
    %189 = arith.mulf %188, %182 : vector<8x128xf32>
    %190 = arith.addf %187, %189 : vector<8x128xf32>
    %191 = vector.extract_strided_slice %16 {offsets = [4, 0, 0], sizes = [1, 8, 1], strides = [1, 1, 1]} : vector<8x8x1xf32> to vector<1x8x1xf32>
    %192 = vector.shape_cast %191 : vector<1x8x1xf32> to vector<8x1xf32>
    %193 = vector.broadcast %192 : vector<8x1xf32> to vector<8x128xf32>
    %194 = arith.addf %190, %193 : vector<8x128xf32>
    %cst_53 = arith.constant dense<0xFF800000> : vector<128xf32>
    %195 = vector.multi_reduction <maximumf>, %194, %cst_53 [0] : vector<8x128xf32> to vector<128xf32>
    %196 = vector.shape_cast %195 : vector<128xf32> to vector<1x128xf32>
    %197 = vector.broadcast %196 : vector<1x128xf32> to vector<8x128xf32>
    %198 = arith.subf %194, %197 : vector<8x128xf32>
    %199 = math.exp %198 : vector<8x128xf32>
    %cst_54 = arith.constant dense<0.000000e+00> : vector<128xf32>
    %200 = vector.multi_reduction <add>, %199, %cst_54 [0] : vector<8x128xf32> to vector<128xf32>
    %201 = vector.shape_cast %200 : vector<128xf32> to vector<1x128xf32>
    %202 = tpu.reciprocal %201 {approx = true} : vector<1x128xf32> -> vector<1x128xf32>
    %203 = vector.broadcast %202 : vector<1x128xf32> to vector<8x128xf32>
    %204 = arith.mulf %199, %203 : vector<8x128xf32>
    %205 = vector.shape_cast %204 : vector<8x128xf32> to vector<8x1x128xf32>
    %206 = vector.broadcast %205 : vector<8x1x128xf32> to vector<8x16x128xf32>
    %207 = arith.mulf %206, %0 : vector<8x16x128xf32>
    %cst_55 = arith.constant dense<0.000000e+00> : vector<16x128xf32>
    %208 = vector.multi_reduction <add>, %207, %cst_55 [0] : vector<8x16x128xf32> to vector<16x128xf32>
    %209 = arith.negf %208 : vector<16x128xf32>
    %210 = math.exp %209 : vector<16x128xf32>
    %cst_56 = arith.constant 1.000000e+00 : f32
    %211 = vector.broadcast %cst_56 : f32 to vector<16x128xf32>
    %212 = arith.addf %211, %210 : vector<16x128xf32>
    %213 = arith.divf %211, %212 : vector<16x128xf32>
    %c4 = arith.constant 4 : index
    %c0_57 = arith.constant 0 : index
    %c0_58 = arith.constant 0 : index
    %214 = vector.load %arg6[%c4, %c0_57, %c0_58] : memref<8x16x128xf32, #tpu.memory_space<vmem>>, vector<1x16x128xf32>
    %215 = vector.shape_cast %214 : vector<1x16x128xf32> to vector<16x128xf32>
    %216 = vector.shape_cast %213 : vector<16x128xf32> to vector<1x16x128xf32>
    tpu.vector_store %arg6[%c4, %c0_57, %c0_58], %216 {strides = array<i32>} : memref<8x16x128xf32, #tpu.memory_space<vmem>>, vector<1x16x128xf32>,
    %217 = vector.extract_strided_slice %9 {offsets = [5, 0, 0], sizes = [1, 32, 128], strides = [1, 1, 1]} : vector<8x32x128xf32> to vector<1x32x128xf32>
    %218 = vector.broadcast %217 : vector<1x32x128xf32> to vector<8x32x128xf32>
    %219 = arith.addf %218, %10 : vector<8x32x128xf32>
    %220 = math.absf %219 : vector<8x32x128xf32>
    %221 = vector.shape_cast %220 : vector<8x32x128xf32> to vector<256x128xf32>
    %cst_59 = arith.constant dense<0.000000e+00> : vector<8x128xf32>
    %222 = tpu.matmul %11, %221, %cst_59 {dimension_numbers = #tpu.dot_dimension_numbers<[1], [0], [0], [1], [0, 0, 1, 1], [], []>} : vector<8x256xf32>, vector<256x128xf32>, vector<8x128xf32> -> vector<8x128xf32>
    %223 = vector.extract_strided_slice %13 {offsets = [5, 0], sizes = [1, 128], strides = [1, 1]} : vector<8x128xf32> to vector<1x128xf32>
    %224 = vector.broadcast %223 : vector<1x128xf32> to vector<8x128xf32>
    %225 = arith.addf %224, %15 : vector<8x128xf32>
    %cst_60 = arith.constant 6.000000e-01 : f32
    %226 = vector.broadcast %cst_60 : f32 to vector<8x128xf32>
    %227 = arith.mulf %226, %225 : vector<8x128xf32>
    %cst_61 = arith.constant 4.000000e-01 : f32
    %228 = vector.broadcast %cst_61 : f32 to vector<8x128xf32>
    %229 = arith.mulf %228, %222 : vector<8x128xf32>
    %230 = arith.addf %227, %229 : vector<8x128xf32>
    %231 = vector.extract_strided_slice %16 {offsets = [5, 0, 0], sizes = [1, 8, 1], strides = [1, 1, 1]} : vector<8x8x1xf32> to vector<1x8x1xf32>
    %232 = vector.shape_cast %231 : vector<1x8x1xf32> to vector<8x1xf32>
    %233 = vector.broadcast %232 : vector<8x1xf32> to vector<8x128xf32>
    %234 = arith.addf %230, %233 : vector<8x128xf32>
    %cst_62 = arith.constant dense<0xFF800000> : vector<128xf32>
    %235 = vector.multi_reduction <maximumf>, %234, %cst_62 [0] : vector<8x128xf32> to vector<128xf32>
    %236 = vector.shape_cast %235 : vector<128xf32> to vector<1x128xf32>
    %237 = vector.broadcast %236 : vector<1x128xf32> to vector<8x128xf32>
    %238 = arith.subf %234, %237 : vector<8x128xf32>
    %239 = math.exp %238 : vector<8x128xf32>
    %cst_63 = arith.constant dense<0.000000e+00> : vector<128xf32>
    %240 = vector.multi_reduction <add>, %239, %cst_63 [0] : vector<8x128xf32> to vector<128xf32>
    %241 = vector.shape_cast %240 : vector<128xf32> to vector<1x128xf32>
    %242 = tpu.reciprocal %241 {approx = true} : vector<1x128xf32> -> vector<1x128xf32>
    %243 = vector.broadcast %242 : vector<1x128xf32> to vector<8x128xf32>
    %244 = arith.mulf %239, %243 : vector<8x128xf32>
    %245 = vector.shape_cast %244 : vector<8x128xf32> to vector<8x1x128xf32>
    %246 = vector.broadcast %245 : vector<8x1x128xf32> to vector<8x16x128xf32>
    %247 = arith.mulf %246, %0 : vector<8x16x128xf32>
    %cst_64 = arith.constant dense<0.000000e+00> : vector<16x128xf32>
    %248 = vector.multi_reduction <add>, %247, %cst_64 [0] : vector<8x16x128xf32> to vector<16x128xf32>
    %249 = arith.negf %248 : vector<16x128xf32>
    %250 = math.exp %249 : vector<16x128xf32>
    %cst_65 = arith.constant 1.000000e+00 : f32
    %251 = vector.broadcast %cst_65 : f32 to vector<16x128xf32>
    %252 = arith.addf %251, %250 : vector<16x128xf32>
    %253 = arith.divf %251, %252 : vector<16x128xf32>
    %c5 = arith.constant 5 : index
    %c0_66 = arith.constant 0 : index
    %c0_67 = arith.constant 0 : index
    %254 = vector.load %arg6[%c5, %c0_66, %c0_67] : memref<8x16x128xf32, #tpu.memory_space<vmem>>, vector<1x16x128xf32>
    %255 = vector.shape_cast %254 : vector<1x16x128xf32> to vector<16x128xf32>
    %256 = vector.shape_cast %253 : vector<16x128xf32> to vector<1x16x128xf32>
    tpu.vector_store %arg6[%c5, %c0_66, %c0_67], %256 {strides = array<i32>} : memref<8x16x128xf32, #tpu.memory_space<vmem>>, vector<1x16x128xf32>,
    %257 = vector.extract_strided_slice %9 {offsets = [6, 0, 0], sizes = [1, 32, 128], strides = [1, 1, 1]} : vector<8x32x128xf32> to vector<1x32x128xf32>
    %258 = vector.broadcast %257 : vector<1x32x128xf32> to vector<8x32x128xf32>
    %259 = arith.addf %258, %10 : vector<8x32x128xf32>
    %260 = math.absf %259 : vector<8x32x128xf32>
    %261 = vector.shape_cast %260 : vector<8x32x128xf32> to vector<256x128xf32>
    %cst_68 = arith.constant dense<0.000000e+00> : vector<8x128xf32>
    %262 = tpu.matmul %11, %261, %cst_68 {dimension_numbers = #tpu.dot_dimension_numbers<[1], [0], [0], [1], [0, 0, 1, 1], [], []>} : vector<8x256xf32>, vector<256x128xf32>, vector<8x128xf32> -> vector<8x128xf32>
    %263 = vector.extract_strided_slice %13 {offsets = [6, 0], sizes = [1, 128], strides = [1, 1]} : vector<8x128xf32> to vector<1x128xf32>
    %264 = vector.broadcast %263 : vector<1x128xf32> to vector<8x128xf32>
    %265 = arith.addf %264, %15 : vector<8x128xf32>
    %cst_69 = arith.constant 6.000000e-01 : f32
    %266 = vector.broadcast %cst_69 : f32 to vector<8x128xf32>
    %267 = arith.mulf %266, %265 : vector<8x128xf32>
    %cst_70 = arith.constant 4.000000e-01 : f32
    %268 = vector.broadcast %cst_70 : f32 to vector<8x128xf32>
    %269 = arith.mulf %268, %262 : vector<8x128xf32>
    %270 = arith.addf %267, %269 : vector<8x128xf32>
    %271 = vector.extract_strided_slice %16 {offsets = [6, 0, 0], sizes = [1, 8, 1], strides = [1, 1, 1]} : vector<8x8x1xf32> to vector<1x8x1xf32>
    %272 = vector.shape_cast %271 : vector<1x8x1xf32> to vector<8x1xf32>
    %273 = vector.broadcast %272 : vector<8x1xf32> to vector<8x128xf32>
    %274 = arith.addf %270, %273 : vector<8x128xf32>
    %cst_71 = arith.constant dense<0xFF800000> : vector<128xf32>
    %275 = vector.multi_reduction <maximumf>, %274, %cst_71 [0] : vector<8x128xf32> to vector<128xf32>
    %276 = vector.shape_cast %275 : vector<128xf32> to vector<1x128xf32>
    %277 = vector.broadcast %276 : vector<1x128xf32> to vector<8x128xf32>
    %278 = arith.subf %274, %277 : vector<8x128xf32>
    %279 = math.exp %278 : vector<8x128xf32>
    %cst_72 = arith.constant dense<0.000000e+00> : vector<128xf32>
    %280 = vector.multi_reduction <add>, %279, %cst_72 [0] : vector<8x128xf32> to vector<128xf32>
    %281 = vector.shape_cast %280 : vector<128xf32> to vector<1x128xf32>
    %282 = tpu.reciprocal %281 {approx = true} : vector<1x128xf32> -> vector<1x128xf32>
    %283 = vector.broadcast %282 : vector<1x128xf32> to vector<8x128xf32>
    %284 = arith.mulf %279, %283 : vector<8x128xf32>
    %285 = vector.shape_cast %284 : vector<8x128xf32> to vector<8x1x128xf32>
    %286 = vector.broadcast %285 : vector<8x1x128xf32> to vector<8x16x128xf32>
    %287 = arith.mulf %286, %0 : vector<8x16x128xf32>
    %cst_73 = arith.constant dense<0.000000e+00> : vector<16x128xf32>
    %288 = vector.multi_reduction <add>, %287, %cst_73 [0] : vector<8x16x128xf32> to vector<16x128xf32>
    %289 = arith.negf %288 : vector<16x128xf32>
    %290 = math.exp %289 : vector<16x128xf32>
    %cst_74 = arith.constant 1.000000e+00 : f32
    %291 = vector.broadcast %cst_74 : f32 to vector<16x128xf32>
    %292 = arith.addf %291, %290 : vector<16x128xf32>
    %293 = arith.divf %291, %292 : vector<16x128xf32>
    %c6 = arith.constant 6 : index
    %c0_75 = arith.constant 0 : index
    %c0_76 = arith.constant 0 : index
    %294 = vector.load %arg6[%c6, %c0_75, %c0_76] : memref<8x16x128xf32, #tpu.memory_space<vmem>>, vector<1x16x128xf32>
    %295 = vector.shape_cast %294 : vector<1x16x128xf32> to vector<16x128xf32>
    %296 = vector.shape_cast %293 : vector<16x128xf32> to vector<1x16x128xf32>
    tpu.vector_store %arg6[%c6, %c0_75, %c0_76], %296 {strides = array<i32>} : memref<8x16x128xf32, #tpu.memory_space<vmem>>, vector<1x16x128xf32>,
    %297 = vector.extract_strided_slice %9 {offsets = [7, 0, 0], sizes = [1, 32, 128], strides = [1, 1, 1]} : vector<8x32x128xf32> to vector<1x32x128xf32>
    %298 = vector.broadcast %297 : vector<1x32x128xf32> to vector<8x32x128xf32>
    %299 = arith.addf %298, %10 : vector<8x32x128xf32>
    %300 = math.absf %299 : vector<8x32x128xf32>
    %301 = vector.shape_cast %300 : vector<8x32x128xf32> to vector<256x128xf32>
    %cst_77 = arith.constant dense<0.000000e+00> : vector<8x128xf32>
    %302 = tpu.matmul %11, %301, %cst_77 {dimension_numbers = #tpu.dot_dimension_numbers<[1], [0], [0], [1], [0, 0, 1, 1], [], []>} : vector<8x256xf32>, vector<256x128xf32>, vector<8x128xf32> -> vector<8x128xf32>
    %303 = vector.extract_strided_slice %13 {offsets = [7, 0], sizes = [1, 128], strides = [1, 1]} : vector<8x128xf32> to vector<1x128xf32>
    %304 = vector.broadcast %303 : vector<1x128xf32> to vector<8x128xf32>
    %305 = arith.addf %304, %15 : vector<8x128xf32>
    %cst_78 = arith.constant 6.000000e-01 : f32
    %306 = vector.broadcast %cst_78 : f32 to vector<8x128xf32>
    %307 = arith.mulf %306, %305 : vector<8x128xf32>
    %cst_79 = arith.constant 4.000000e-01 : f32
    %308 = vector.broadcast %cst_79 : f32 to vector<8x128xf32>
    %309 = arith.mulf %308, %302 : vector<8x128xf32>
    %310 = arith.addf %307, %309 : vector<8x128xf32>
    %311 = vector.extract_strided_slice %16 {offsets = [7, 0, 0], sizes = [1, 8, 1], strides = [1, 1, 1]} : vector<8x8x1xf32> to vector<1x8x1xf32>
    %312 = vector.shape_cast %311 : vector<1x8x1xf32> to vector<8x1xf32>
    %313 = vector.broadcast %312 : vector<8x1xf32> to vector<8x128xf32>
    %314 = arith.addf %310, %313 : vector<8x128xf32>
    %cst_80 = arith.constant dense<0xFF800000> : vector<128xf32>
    %315 = vector.multi_reduction <maximumf>, %314, %cst_80 [0] : vector<8x128xf32> to vector<128xf32>
    %316 = vector.shape_cast %315 : vector<128xf32> to vector<1x128xf32>
    %317 = vector.broadcast %316 : vector<1x128xf32> to vector<8x128xf32>
    %318 = arith.subf %314, %317 : vector<8x128xf32>
    %319 = math.exp %318 : vector<8x128xf32>
    %cst_81 = arith.constant dense<0.000000e+00> : vector<128xf32>
    %320 = vector.multi_reduction <add>, %319, %cst_81 [0] : vector<8x128xf32> to vector<128xf32>
    %321 = vector.shape_cast %320 : vector<128xf32> to vector<1x128xf32>
    %322 = tpu.reciprocal %321 {approx = true} : vector<1x128xf32> -> vector<1x128xf32>
    %323 = vector.broadcast %322 : vector<1x128xf32> to vector<8x128xf32>
    %324 = arith.mulf %319, %323 : vector<8x128xf32>
    %325 = vector.shape_cast %324 : vector<8x128xf32> to vector<8x1x128xf32>
    %326 = vector.broadcast %325 : vector<8x1x128xf32> to vector<8x16x128xf32>
    %327 = arith.mulf %326, %0 : vector<8x16x128xf32>
    %cst_82 = arith.constant dense<0.000000e+00> : vector<16x128xf32>
    %328 = vector.multi_reduction <add>, %327, %cst_82 [0] : vector<8x16x128xf32> to vector<16x128xf32>
    %329 = arith.negf %328 : vector<16x128xf32>
    %330 = math.exp %329 : vector<16x128xf32>
    %cst_83 = arith.constant 1.000000e+00 : f32
    %331 = vector.broadcast %cst_83 : f32 to vector<16x128xf32>
    %332 = arith.addf %331, %330 : vector<16x128xf32>
    %333 = arith.divf %331, %332 : vector<16x128xf32>
    %c7 = arith.constant 7 : index
    %c0_84 = arith.constant 0 : index
    %c0_85 = arith.constant 0 : index
    %334 = vector.load %arg6[%c7, %c0_84, %c0_85] : memref<8x16x128xf32, #tpu.memory_space<vmem>>, vector<1x16x128xf32>
    %335 = vector.shape_cast %334 : vector<1x16x128xf32> to vector<16x128xf32>
    %336 = vector.shape_cast %333 : vector<16x128xf32> to vector<1x16x128xf32>
    tpu.vector_store %arg6[%c7, %c0_84, %c0_85], %336 {strides = array<i32>} : memref<8x16x128xf32, #tpu.memory_space<vmem>>, vector<1x16x128xf32>,
    return
  }
  func.func @transform_0(%arg0: i32) -> (i32, i32, i32) {
    %c0_i32 = arith.constant 0 : i32
    %c0_i32_0 = arith.constant 0 : i32
    %c0_i32_1 = arith.constant 0 : i32
    return %c0_i32, %c0_i32_0, %arg0 : i32, i32, i32
  }
  func.func @transform_1(%arg0: i32) -> (i32, i32) {
    %c0_i32 = arith.constant 0 : i32
    %c0_i32_0 = arith.constant 0 : i32
    %c0_i32_1 = arith.constant 0 : i32
    return %c0_i32, %c0_i32_0 : i32, i32
  }
  func.func @transform_2(%arg0: i32) -> (i32, i32) {
    %c0_i32 = arith.constant 0 : i32
    %c0_i32_0 = arith.constant 0 : i32
    %c0_i32_1 = arith.constant 0 : i32
    return %c0_i32, %c0_i32_0 : i32, i32
  }
  func.func @transform_3(%arg0: i32) -> (i32, i32) {
    %c0_i32 = arith.constant 0 : i32
    %c0_i32_0 = arith.constant 0 : i32
    %c0_i32_1 = arith.constant 0 : i32
    return %c0_i32, %c0_i32_0 : i32, i32
  }
  func.func @transform_4(%arg0: i32) -> (i32, i32, i32) {
    %c0_i32 = arith.constant 0 : i32
    %c0_i32_0 = arith.constant 0 : i32
    %c0_i32_1 = arith.constant 0 : i32
    %c0_i32_2 = arith.constant 0 : i32
    return %c0_i32, %c0_i32_0, %c0_i32_1 : i32, i32, i32
  }
  func.func @transform_5(%arg0: i32) -> (i32, i32, i32) {
    %c0_i32 = arith.constant 0 : i32
    %c0_i32_0 = arith.constant 0 : i32
    %c0_i32_1 = arith.constant 0 : i32
    return %c0_i32, %c0_i32_0, %arg0 : i32, i32, i32
  }
}

</mosaic_0001>

<bundles_post_ra>
// kernel: tpu_custom_call.1
= control target key start
LH: loop header
LB: loop body
LE: loop exit
PB: predicated region body
PF: predicated region fallthrough
CT: control target
= control target key end

     0   :  { %10 = vsyncpa [#allocation3], 0  ;;  %s6052_s0 = inlined_call_operand.hbm [shape: f32[8,16,128], index: 0, kind: input, shape index: {}]   ;;  %s6053_s1 = inlined_call_operand.hbm [shape: f32[512,128], index: 1, kind: input, shape index: {}]   ;;  %s6054_s2 = inlined_call_operand.vmem [shape: f32[32,1], index: 2, kind: input, shape index: {}]   ;;  %s6055_s3 = inlined_call_operand.vmem [shape: f32[8,256], index: 3, kind: input, shape index: {}]   ;;  %s6056_s4 = inlined_call_operand.vmem [shape: f32[8,8,1], index: 4, kind: input, shape index: {}]   ;;  %s6057_s5 = inlined_call_operand.hbm [shape: f32[8,16,128], index: 5, kind: output, shape index: {}]  }
   0x1   :  { %11 = vsyncpa [#allocation6], 0 }
   0x2   :  { %12 = vsyncpa [#allocation4], 0  ;;  %s4273_s18 = smov [#allocation2]   ;;  %s4201_s22 = scalar_lea.hbm %s6052_s0, 2048 }
   0x3   :  { %s18_s19 = sshll.u32 %s4273_s18, 4  ;;  %p4202_p0 = scmp.ne.s32.totalorder %s6052_s0, %s4201_s22  ;;  %s19_s19 = int_to_ptr.vmem [resolvable:$true] %s18_s19 }
   0x4   :  { %p4205_p1 = scmp.lt.u32.totalorder %s4201_s22, %s6052_s0 }
   0x6   :  { %p4207_p2 = pnand %p4205_p1, %p4202_p0 }
   0x8   :  { %4210 = shalt.err (!%p4207_p2)
}
   0x9   :  { %s4211_s27 = scalar_lea.vmem %s19_s19, 2048  ;;  %p4216_p4 = scmp.lt.s32.totalorder %s19_s19, %s19_s19 }
   0xa   :  { %p4212_p3 = scmp.ne.s32.totalorder %s19_s19, %s4211_s27  ;;  %p4217_p5 = scmp.lt.s32.totalorder %s4211_s27, %s4211_s27 }
   0xc   :  { %p4218_p6 = por %p4217_p5, %p4216_p4 }
   0xe   :  { %p4219_p7 = pnand %p4218_p6, %p4212_p3 }
  0x10   :  { %4222 = shalt.err (!%p4219_p7)
}
  0x11   :  { %s4274_s28 = smov 128   ;;  %s4275_s29 = smov 8  }
  0x12   :  { %24 = dma.hbm_to_vmem [thread:$0]  %s6052_s0, 2048, %s19_s19, [#allocation3], %s4274_s28, %s4274_s28, %s4275_s29  }
  0x13   :  { %s4276_s7 = smov [#allocation5]   ;;  %s4223_s11 = scalar_lea.hbm %s6053_s1, 8192 }
  0x14   :  { %s30_s8 = sshll.u32 %s4276_s7, 4  ;;  %p4224_p8 = scmp.ne.s32.totalorder %s6053_s1, %s4223_s11  ;;  %s31_s8 = int_to_ptr.vmem [resolvable:$true] %s30_s8 }
  0x15   :  { %p4227_p9 = scmp.lt.u32.totalorder %s4223_s11, %s6053_s1 }
  0x17   :  { %p4229_p10 = pnand %p4227_p9, %p4224_p8 }
  0x19   :  { %4232 = shalt.err (!%p4229_p10)
}
  0x1a   :  { %s4233_s16 = scalar_lea.vmem %s31_s8, 8192  ;;  %p4238_p12 = scmp.lt.s32.totalorder %s31_s8, %s31_s8 }
  0x1b   :  { %p4234_p11 = scmp.ne.s32.totalorder %s31_s8, %s4233_s16  ;;  %p4239_p13 = scmp.lt.s32.totalorder %s4233_s16, %s4233_s16 }
  0x1d   :  { %p4240_p0 = por %p4239_p13, %p4238_p12 }
  0x1f   :  { %p4241_p1 = pnand %p4240_p0, %p4234_p11 }
  0x21   :  { %4244 = shalt.err (!%p4241_p1)
}
  0x22   :  { %36 = dma.hbm_to_vmem [thread:$0]  %s6053_s1, 8192, %s31_s8, [#allocation6], %s4274_s28, %s4274_s28, %s4275_s29  }
  0x23   :  { %4267 = dma.done.wait [#allocation3], 2048  }
  0x24   :  { %4268 = vsyncadd [#allocation3], 4294965248 }
  0x25   :  { %4269 = dma.done.wait [#allocation6], 8192  }
  0x26   :  { %4270 = vsyncadd [#allocation6], 4294959104  ;;  %v4277_v0 = vmov 0   ;;  %v49_v1 = vld [vmem:[#allocation2] sm:$0xff]  ;;  %v50_v2 = vld [vmem:[#allocation2 + $0x8] sm:$0xff] }
  0x27   :  { %4070 = vset.pattern.permute.xlu0 %v4277_v0  ;;  %4071 = vset.pattern.permute.xlu1 %v4277_v0  ;;  %v51_v3 = vld [vmem:[#allocation2 + $0x10] sm:$0xff]  ;;  %v3711_v4 = vpack.c.bf16 %v50_v2, %v49_v1  ;;  %v52_v5 = vld [vmem:[#allocation2 + $0x18] sm:$0xff]  ;;  %v53_v7 = vld [vmem:[#allocation2 + $0x20] sm:$0xff] }
  0x28   :  { %v3715_v6 = vpack.c.bf16 %v52_v5, %v51_v3  ;;  %v54_v8 = vld [vmem:[#allocation2 + $0x28] sm:$0xff]  ;;  %v65_v10 = vld [vmem:[#allocation5] sm:$0xff]  ;;  %v55_v11 = vld [vmem:[#allocation2 + $0x30] sm:$0xff] }
  0x29   :  { %3712 = vmatprep.subr.bf16.mxu0 %v3711_v4  ;;  %v3719_v9 = vpack.c.bf16 %v54_v8, %v53_v7  ;;  %v56_v12 = vld [vmem:[#allocation2 + $0x38] sm:$0xff]  ;;  %3615 = vmatprep.mubr.f32.mxu0 %v65_v10  ;;  %v57_v14 = vld [vmem:[#allocation2 + $0x40] sm:$0xff]  ;;  %v58_v15 = vld [vmem:[#allocation2 + $0x48] sm:$0xff] }
  0x2a   :  { %3714 = vmatpush3.bf16.msra.mxu0 %v3711_v4  ;;  %v3723_v13 = vpack.c.bf16 %v56_v12, %v55_v11  ;;  %v3727_v16 = vpack.c.bf16 %v58_v15, %v57_v14  ;;  %v59_v17 = vld [vmem:[#allocation2 + $0x50] sm:$0xff]  ;;  %v60_v18 = vld [vmem:[#allocation2 + $0x58] sm:$0xff]  ;;  %v61_v20 = vld [vmem:[#allocation2 + $0x60] sm:$0xff] }
  0x2b   :  { %3716 = vmatprep.subr.bf16.mxu0 %v3715_v6  ;;  %v3731_v19 = vpack.c.bf16 %v60_v18, %v59_v17  ;;  %v62_v21 = vld [vmem:[#allocation2 + $0x68] sm:$0xff]  ;;  %v514_v22 = vld [vmem:[%s6054_s2] sm:$0xff]  ;;  %v516_v23 = vld [vmem:[%s6054_s2 + $0x10] sm:$0xff] }
  0x2c   :  { %520 = vperm.xlu0 %4070, %v514_v22   ;;  %v3735_v24 = vpack.c.bf16 %v62_v21, %v61_v20  ;;  %530 = vperm.xlu1 %4071, %v516_v23   ;;  %v515_v25 = vld [vmem:[%s6054_s2 + $0x8] sm:$0xff]  ;;  %v63_v26 = vld [vmem:[#allocation2 + $0x70] sm:$0xff]  ;;  %v64_v27 = vld [vmem:[#allocation2 + $0x78] sm:$0xff] }
  0x2d   :  { %v517_v28 = vld [vmem:[%s6054_s2 + $0x18] sm:$0xff]  ;;  %v3739_v29 = vpack.c.bf16 %v64_v27, %v63_v26  ;;  %v712_v30 = vld [vmem:[%s6056_s4] sm:$0xff]  ;;  %v713_v31 = vld [vmem:[%s6056_s4 + $0x8] sm:$0xff] }
  0x2e   :  { %3718 = vmatpush3.bf16.msra.mxu0 %v3715_v6  ;;  %v66_v32 = vld [vmem:[#allocation5 + $0x8] sm:$0xff]  ;;  %v67_v33 = vld [vmem:[#allocation5 + $0x10] sm:$0xff]  ;;  %v715_v35 = vld [vmem:[%s6056_s4 + $0x18] sm:$0xff] }
  0x2f   :  { %3720 = vmatprep.subr.bf16.mxu0 %v3719_v9  ;;  %v714_v34 = vld [vmem:[%s6056_s4 + $0x10] sm:$0xff]  ;;  %v68_v36 = vld [vmem:[#allocation5 + $0x18] sm:$0xff]  ;;  %v69_v37 = vld [vmem:[#allocation5 + $0x20] sm:$0xff] }
  0x30   :  { %525 = vperm.xlu0 %4070, %v515_v25   ;;  %535 = vperm.xlu1 %4071, %v517_v28   ;;  %v716_v38 = vld [vmem:[%s6056_s4 + $0x20] sm:$0xff]  ;;  %v717_v39 = vld [vmem:[%s6056_s4 + $0x28] sm:$0xff]  ;;  %v71_v41 = vld [vmem:[#allocation5 + $0x30] sm:$0xff] }
  0x31   :  { %v70_v40 = vld [vmem:[#allocation5 + $0x28] sm:$0xff]  ;;  %v718_v42 = vld [vmem:[%s6056_s4 + $0x30] sm:$0xff]  ;;  %v719_v43 = vld [vmem:[%s6056_s4 + $0x38] sm:$0xff] }
  0x32   :  { %3722 = vmatpush3.bf16.msra.mxu0 %v3719_v9  ;;  %v72_v44 = vld [vmem:[#allocation5 + $0x38] sm:$0xff]  ;;  %v73_v45 = vld [vmem:[#allocation5 + $0x40] sm:$0xff]  ;;  %v74_v46 = vld [vmem:[#allocation5 + $0x48] sm:$0xff] }
  0x33   :  { %3724 = vmatprep.subr.bf16.mxu0 %v3723_v13  ;;  %v75_v47 = vld [vmem:[#allocation5 + $0x50] sm:$0xff]  ;;  %v76_v48 = vld [vmem:[#allocation5 + $0x58] sm:$0xff]  ;;  %v77_v49 = vld [vmem:[#allocation5 + $0x60] sm:$0xff] }
  0x34   :  { %864 = vperm.xlu0 %4070, %v712_v30   ;;  %1163 = vperm.xlu1 %4071, %v713_v31   ;;  %v78_v50 = vld [vmem:[#allocation5 + $0x68] sm:$0xff]  ;;  %v79_v51 = vld [vmem:[#allocation5 + $0x70] sm:$0xff]  ;;  %v80_v52 = vld [vmem:[#allocation5 + $0x78] sm:$0xff] }
  0x35   :  { %v81_v53 = vld [vmem:[#allocation5 + $0x80] sm:$0xff]  ;;  %v82_v54 = vld [vmem:[#allocation5 + $0x88] sm:$0xff]  ;;  %v83_v55 = vld [vmem:[#allocation5 + $0x90] sm:$0xff] }
  0x36   :  { %3726 = vmatpush3.bf16.msra.mxu0 %v3723_v13  ;;  %v84_v56 = vld [vmem:[#allocation5 + $0x98] sm:$0xff]  ;;  %v85_v57 = vld [vmem:[#allocation5 + $0xa0] sm:$0xff]  ;;  %v86_v58 = vld [vmem:[#allocation5 + $0xa8] sm:$0xff] }
  0x37   :  { %3728 = vmatprep.subr.bf16.mxu0 %v3727_v16  ;;  %v87_v59 = vld [vmem:[#allocation5 + $0xb0] sm:$0xff]  ;;  %v88_v60 = vld [vmem:[#allocation5 + $0xb8] sm:$0xff]  ;;  %v89_v61 = vld [vmem:[#allocation5 + $0xc0] sm:$0xff] }
  0x38   :  { %1463 = vperm.xlu0 %4070, %v714_v34   ;;  %1763 = vperm.xlu1 %4071, %v715_v35   ;;  %v90_v62 = vld [vmem:[#allocation5 + $0xc8] sm:$0xff]  ;;  %v91_v63 = vld [vmem:[#allocation5 + $0xd0] sm:$0xff]  ;;  %v92_v0 = vld [vmem:[#allocation5 + $0xd8] sm:$0xff] }
  0x39   :  { %v93_v1 = vld [vmem:[#allocation5 + $0xe0] sm:$0xff]  ;;  %v94_v2 = vld [vmem:[#allocation5 + $0xe8] sm:$0xff]  ;;  %v95_v3 = vld [vmem:[#allocation5 + $0xf0] sm:$0xff] }
  0x3a   :  { %3730 = vmatpush3.bf16.msra.mxu0 %v3727_v16  ;;  %v96_v4 = vld [vmem:[#allocation5 + $0xf8] sm:$0xff]  ;;  %v97_v5 = vld [vmem:[#allocation5 + $0x100] sm:$0xff]  ;;  %v98_v6 = vld [vmem:[#allocation5 + $0x108] sm:$0xff] }
  0x3b   :  { %3732 = vmatprep.subr.bf16.mxu0 %v3731_v19  ;;  %v99_v7 = vld [vmem:[#allocation5 + $0x110] sm:$0xff]  ;;  %v100_v8 = vld [vmem:[#allocation5 + $0x118] sm:$0xff]  ;;  %v101_v9 = vld [vmem:[#allocation5 + $0x120] sm:$0xff] }
  0x3c   :  { %2063 = vperm.xlu0 %4070, %v716_v38   ;;  %2363 = vperm.xlu1 %4071, %v717_v39   ;;  %v102_v10 = vld [vmem:[#allocation5 + $0x128] sm:$0xff]  ;;  %v103_v11 = vld [vmem:[#allocation5 + $0x130] sm:$0xff]  ;;  %v104_v12 = vld [vmem:[#allocation5 + $0x138] sm:$0xff] }
  0x3d   :  { %v105_v13 = vld [vmem:[#allocation5 + $0x140] sm:$0xff]  ;;  %v106_v14 = vld [vmem:[#allocation5 + $0x148] sm:$0xff]  ;;  %v107_v15 = vld [vmem:[#allocation5 + $0x150] sm:$0xff] }
  0x3e   :  { %3734 = vmatpush3.bf16.msra.mxu0 %v3731_v19  ;;  %v108_v16 = vld [vmem:[#allocation5 + $0x158] sm:$0xff]  ;;  %v109_v17 = vld [vmem:[#allocation5 + $0x160] sm:$0xff]  ;;  %v110_v18 = vld [vmem:[#allocation5 + $0x168] sm:$0xff] }
  0x3f   :  { %3736 = vmatprep.subr.bf16.mxu0 %v3735_v24  ;;  %v111_v19 = vld [vmem:[#allocation5 + $0x170] sm:$0xff]  ;;  %v112_v20 = vld [vmem:[#allocation5 + $0x178] sm:$0xff]  ;;  %v113_v21 = vld [vmem:[#allocation5 + $0x180] sm:$0xff] }
  0x40   :  { %2663 = vperm.xlu0 %4070, %v718_v42   ;;  %2963 = vperm.xlu1 %4071, %v719_v43   ;;  %v114_v22 = vld [vmem:[#allocation5 + $0x188] sm:$0xff]  ;;  %v115_v23 = vld [vmem:[#allocation5 + $0x190] sm:$0xff]  ;;  %v117_v25 = vld [vmem:[#allocation5 + $0x1a0] sm:$0xff] }
  0x41   :  { %v118_v26 = vld [vmem:[#allocation5 + $0x1a8] sm:$0xff]  ;;  %v119_v27 = vld [vmem:[#allocation5 + $0x1b0] sm:$0xff]  ;;  %v120_v28 = vld [vmem:[#allocation5 + $0x1b8] sm:$0xff] }
  0x42   :  { %3738 = vmatpush3.bf16.msra.mxu0 %v3735_v24  ;;  %v116_v24 = vld [vmem:[#allocation5 + $0x198] sm:$0xff]  ;;  %v122_v30 = vld [vmem:[#allocation5 + $0x1c8] sm:$0xff]  ;;  %v123_v31 = vld [vmem:[#allocation5 + $0x1d0] sm:$0xff] }
  0x43   :  { %3740 = vmatprep.subr.bf16.mxu0 %v3739_v29  ;;  %v126_v34 = vld [vmem:[#allocation5 + $0x1e8] sm:$0xff]  ;;  %v127_v35 = vld [vmem:[#allocation5 + $0x1f0] sm:$0xff] }
  0x46   :  { %3742 = vmatpush3.bf16.msra.mxu0 %v3739_v29  ;;  %v121_v29 = vld [vmem:[#allocation5 + $0x1c0] sm:$0xff] }
  0x49   :  { %3616 = vmatmul.mubr.f32.vlgmr.msra.gmra.mrb[0].mxu0 %v66_v32  ;;  %v124_v32 = vld [vmem:[#allocation5 + $0x1d8] sm:$0xff] }
  0x4a   :  { %3618 = vmatprep.mubr.f32.mxu0 %v67_v33  ;;  %v125_v33 = vld [vmem:[#allocation5 + $0x1e0] sm:$0xff] }
  0x4d   :  { %3619 = vmatmul.mubr.f32.gmra.mrb[2].mxu0 %v68_v36  ;;  %v128_v36 = vld [vmem:[#allocation5 + $0x1f8] sm:$0xff] }
  0x4e   :  { %3621 = vmatprep.mubr.f32.mxu0 %v69_v37  ;;  %v571_v37 = vld [vmem:[%s6055_s3 + $0x8] sm:$0xff] }
  0x4f   :  { %636 = vmatprep.mubr.f32.mxu1 %v571_v37 }
  0x51   :  { %3622 = vmatmul.mubr.f32.gmra.mrb[4].mxu0 %v70_v40 }
  0x52   :  { %3624 = vmatprep.mubr.f32.mxu0 %v71_v41 }
  0x55   :  { %3625 = vmatmul.mubr.f32.gmra.mrb[6].mxu0 %v72_v44 }
  0x56   :  { %3627 = vmatprep.mubr.f32.mxu0 %v73_v45 }
  0x59   :  { %3628 = vmatmul.mubr.f32.gmra.mrb[8].mxu0 %v74_v46 }
  0x5a   :  { %3630 = vmatprep.mubr.f32.mxu0 %v75_v47 }
  0x5d   :  { %3631 = vmatmul.mubr.f32.gmra.mrb[10].mxu0 %v76_v48 }
  0x5e   :  { %3633 = vmatprep.mubr.f32.mxu0 %v77_v49 }
  0x61   :  { %3634 = vmatmul.mubr.f32.gmra.mrb[12].mxu0 %v78_v50 }
  0x62   :  { %3636 = vmatprep.mubr.f32.mxu0 %v79_v51 }
  0x65   :  { %3637 = vmatmul.mubr.f32.gmra.mrb[14].mxu0 %v80_v52 }
  0x66   :  { %3639 = vmatprep.mubr.f32.mxu0 %v81_v53 }
  0x69   :  { %3640 = vmatmul.mubr.f32.gmra.mrb[16].mxu0 %v82_v54 }
  0x6a   :  { %3642 = vmatprep.mubr.f32.mxu0 %v83_v55 }
  0x6d   :  { %3643 = vmatmul.mubr.f32.gmra.mrb[18].mxu0 %v84_v56 }
  0x6e   :  { %3645 = vmatprep.mubr.f32.mxu0 %v85_v57 }
  0x71   :  { %3646 = vmatmul.mubr.f32.gmra.mrb[20].mxu0 %v86_v58 }
  0x72   :  { %3648 = vmatprep.mubr.f32.mxu0 %v87_v59 }
  0x75   :  { %3649 = vmatmul.mubr.f32.gmra.mrb[22].mxu0 %v88_v60 }
  0x76   :  { %3651 = vmatprep.mubr.f32.mxu0 %v89_v61 }
  0x79   :  { %3652 = vmatmul.mubr.f32.gmra.mrb[24].mxu0 %v90_v62 }
  0x7a   :  { %3654 = vmatprep.mubr.f32.mxu0 %v91_v63 }
  0x7d   :  { %3655 = vmatmul.mubr.f32.gmra.mrb[26].mxu0 %v92_v0 }
  0x7e   :  { %3657 = vmatprep.mubr.f32.mxu0 %v93_v1 }
  0x81   :  { %3658 = vmatmul.mubr.f32.gmra.mrb[28].mxu0 %v94_v2 }
  0x82   :  { %3660 = vmatprep.mubr.f32.mxu0 %v95_v3 }
  0x85   :  { %3661 = vmatmul.mubr.f32.gmra.mrb[30].mxu0 %v96_v4 }
  0x86   :  { %3663 = vmatprep.mubr.f32.mxu0 %v97_v5 }
  0x89   :  { %3664 = vmatmul.mubr.f32.gmra.mrb[32].mxu0 %v98_v6 }
  0x8a   :  { %3666 = vmatprep.mubr.f32.mxu0 %v99_v7 }
  0x8d   :  { %3667 = vmatmul.mubr.f32.gmra.mrb[34].mxu0 %v100_v8 }
  0x8e   :  { %3669 = vmatprep.mubr.f32.mxu0 %v101_v9 }
  0x91   :  { %3670 = vmatmul.mubr.f32.gmra.mrb[36].mxu0 %v102_v10 }
  0x92   :  { %3672 = vmatprep.mubr.f32.mxu0 %v103_v11 }
  0x95   :  { %3673 = vmatmul.mubr.f32.gmra.mrb[38].mxu0 %v104_v12 }
  0x96   :  { %3675 = vmatprep.mubr.f32.mxu0 %v105_v13 }
  0x99   :  { %3676 = vmatmul.mubr.f32.gmra.mrb[40].mxu0 %v106_v14 }
  0x9a   :  { %3678 = vmatprep.mubr.f32.mxu0 %v107_v15 }
  0x9d   :  { %3679 = vmatmul.mubr.f32.gmra.mrb[42].mxu0 %v108_v16 }
  0x9e   :  { %3681 = vmatprep.mubr.f32.mxu0 %v109_v17 }
  0xa1   :  { %3682 = vmatmul.mubr.f32.gmra.mrb[44].mxu0 %v110_v18 }
  0xa2   :  { %3684 = vmatprep.mubr.f32.mxu0 %v111_v19 }
  0xa5   :  { %3685 = vmatmul.mubr.f32.gmra.mrb[46].mxu0 %v112_v20 }
  0xa6   :  { %3687 = vmatprep.mubr.f32.mxu0 %v113_v21 }
  0xa9   :  { %3688 = vmatmul.mubr.f32.gmra.mrb[48].mxu0 %v114_v22 }
  0xaa   :  { %3690 = vmatprep.mubr.f32.mxu0 %v115_v23 }
  0xab   :  { %v4379_v38 = vpop.permute.xlu0 %520  ;;  %v4381_v41 = vpop.permute.xlu1 %530 }
  0xad   :  { %3691 = vmatmul.mubr.f32.gmra.mrb[50].mxu0 %v116_v24 }
  0xae   :  { %3693 = vmatprep.mubr.f32.mxu0 %v117_v25 }
  0xaf   :  { %v4383_v42 = vpop.permute.xlu0 %525  ;;  %v4391_v47 = vpop.permute.xlu1 %535 }
  0xb1   :  { %3694 = vmatmul.mubr.f32.gmra.mrb[52].mxu0 %v118_v26 }
  0xb2   :  { %3696 = vmatprep.mubr.f32.mxu0 %v119_v27 }
  0xb5   :  { %3697 = vmatmul.mubr.f32.gmra.mrb[54].mxu0 %v120_v28 }
  0xb6   :  { %3699 = vmatprep.mubr.f32.mxu0 %v121_v29 }
  0xb9   :  { %3700 = vmatmul.mubr.f32.gmra.mrb[56].mxu0 %v122_v30 }
  0xba   :  { %3702 = vmatprep.mubr.f32.mxu0 %v123_v31 }
  0xbd   :  { %3703 = vmatmul.mubr.f32.gmra.mrb[58].mxu0 %v124_v32 }
  0xbe   :  { %3705 = vmatprep.mubr.f32.mxu0 %v125_v33 }
  0xc1   :  { %3706 = vmatmul.mubr.f32.gmra.mrb[60].mxu0 %v126_v34 }
  0xc2   :  { %3708 = vmatprep.mubr.f32.mxu0 %v127_v35 }
  0xc5   :  { %3709 = vmatmul.mubr.f32.gmra.mrb[62].mxu0 %v128_v36 }
  0xc6   :  { %1447 = vmatprep.mubr.f32.mxu0 %v571_v37 }
 0x11c   :  { %v3617_v39 = vpop.f32.mrb[0].mxu0 }
 0x11d   :  { %v195_v40 = vpop.f32.mrb[1].mxu0  ;;  %v4386_v45 = vadd.f32 %v3617_v39, %v4383_v42 }
 0x11e   :  { %v4389_v46 = vadd.f32 %v4379_v38, %v195_v40 }
 0x120   :  { %v3620_v43 = vpop.f32.mrb[2].mxu0 }
 0x121   :  { %v205_v44 = vpop.f32.mrb[3].mxu0  ;;  %v4404_v53 = vadd.f32 %v3620_v43, %v4391_v47 }
 0x122   :  { %v4407_v55 = vadd.f32 %v4381_v41, %v205_v44 }
 0x124   :  { %v4393_v48 = vpop.f32.mrb[4].mxu0 }
 0x125   :  { %v4395_v49 = vpop.f32.mrb[5].mxu0  ;;  %v721_v50 = vadd.f32 %v4393_v48, %v4386_v45 }
 0x126   :  { %v720_v52 = vadd.f32 %v4389_v46, %v4395_v49 }
 0x127   :  { %v753_v54 = vand.u32 2147483647, %v721_v50 }
 0x128   :  { %v4409_v56 = vpop.f32.mrb[6].mxu0  ;;  %v752_v57 = vand.u32 2147483647, %v720_v52 }
 0x129   :  { %v4411_v58 = vpop.f32.mrb[7].mxu0  ;;  %v723_v59 = vadd.f32 %v4409_v56, %v4404_v53 }
 0x12a   :  { %6121 = vst [vmem:[#allocation11_spill] sm:$0xff] %v4411_v58  ;;  %v4417_v61 = vpack.c.bf16 %v753_v54, %v752_v57  ;;  %v722_v62 = vadd.f32 %v4407_v55, %v4411_v58 }
 0x12b   :  { %v755_v63 = vand.u32 2147483647, %v723_v59 }
 0x12c   :  { %6122 = vst [vmem:[#allocation12_spill] sm:$0xff] %v4417_v61  ;;  %v3629_v0 = vpop.f32.mrb[8].mxu0  ;;  %v754_v1 = vand.u32 2147483647, %v722_v62 }
 0x12d   :  { %v4422_v2 = vadd.f32 %v3629_v0, %v4383_v42  ;;  %v235_v3 = vpop.f32.mrb[9].mxu0 }
 0x12e   :  { %v4425_v4 = vadd.f32 %v4379_v38, %v235_v3  ;;  %v4427_v5 = vpack.c.bf16 %v755_v63, %v754_v1 }
 0x12f   :  { %6123 = vst [vmem:[#allocation13_spill] sm:$0xff] %v4422_v2  ;;  %v1020_v6 = vadd.f32 %v4393_v48, %v4422_v2 }
 0x130   :  { %6124 = vst [vmem:[#allocation14_spill] sm:$0xff] %v4425_v4  ;;  %6125 = vst [vmem:[#allocation15_spill] sm:$0xff] %v4427_v5  ;;  %v3632_v7 = vpop.f32.mrb[10].mxu0  ;;  %v1019_v8 = vadd.f32 %v4425_v4, %v4395_v49 }
 0x131   :  { %v4434_v9 = vadd.f32 %v3632_v7, %v4391_v47  ;;  %v245_v10 = vpop.f32.mrb[11].mxu0  ;;  %v1052_v11 = vand.u32 2147483647, %v1020_v6 }
 0x132   :  { %v4437_v12 = vadd.f32 %v4381_v41, %v245_v10  ;;  %v1051_v13 = vand.u32 2147483647, %v1019_v8 }
 0x133   :  { %6126 = vst [vmem:[#allocation16_spill] sm:$0xff] %v4434_v9  ;;  %v1022_v14 = vadd.f32 %v4409_v56, %v4434_v9 }
 0x134   :  { %6127 = vst [vmem:[#allocation17_spill] sm:$0xff] %v4437_v12  ;;  %v4441_v15 = vpop.f32.mrb[12].mxu0  ;;  %v4443_v16 = vpack.c.bf16 %v1052_v11, %v1051_v13  ;;  %v1021_v17 = vadd.f32 %v4437_v12, %v4411_v58 }
 0x135   :  { %6128 = vst [vmem:[#allocation18_spill] sm:$0xff] %v4441_v15  ;;  %v4447_v18 = vpop.f32.mrb[13].mxu0  ;;  %v725_v19 = vadd.f32 %v4441_v15, %v4386_v45  ;;  %v1054_v20 = vand.u32 2147483647, %v1022_v14  ;;  %v1024_v21 = vadd.f32 %v4441_v15, %v4422_v2 }
 0x136   :  { %6129 = vst [vmem:[#allocation19_spill] sm:$0xff] %v4443_v16  ;;  %6130 = vst [vmem:[#allocation20_spill] sm:$0xff] %v4447_v18  ;;  %v724_v23 = vadd.f32 %v4389_v46, %v4447_v18  ;;  %v1053_v24 = vand.u32 2147483647, %v1021_v17  ;;  %v1023_v25 = vadd.f32 %v4425_v4, %v4447_v18 }
 0x137   :  { %v757_v26 = vand.u32 2147483647, %v725_v19  ;;  %v1056_v27 = vand.u32 2147483647, %v1024_v21 }
 0x138   :  { %v4459_v28 = vpop.f32.mrb[14].mxu0  ;;  %v756_v29 = vand.u32 2147483647, %v724_v23  ;;  %v4461_v30 = vpack.c.bf16 %v1054_v20, %v1053_v24  ;;  %v1055_v31 = vand.u32 2147483647, %v1023_v25 }
 0x139   :  { %6131 = vst [vmem:[#allocation21_spill] sm:$0xff] %v4459_v28  ;;  %v4463_v32 = vpop.f32.mrb[15].mxu0  ;;  %v727_v33 = vadd.f32 %v4459_v28, %v4404_v53  ;;  %v1026_v34 = vadd.f32 %v4459_v28, %v4434_v9 }
 0x13a   :  { %6132 = vst [vmem:[#allocation22_spill] sm:$0xff] %v4461_v30  ;;  %6133 = vst [vmem:[#allocation23_spill] sm:$0xff] %v4463_v32  ;;  %v4471_v36 = vpack.c.bf16 %v757_v26, %v756_v29  ;;  %v726_v37 = vadd.f32 %v4407_v55, %v4463_v32  ;;  %v4475_v39 = vpack.c.bf16 %v1056_v27, %v1055_v31 }
 0x13b   :  { %v759_v40 = vand.u32 2147483647, %v727_v33  ;;  %v1025_v43 = vadd.f32 %v4437_v12, %v4463_v32  ;;  %v1058_v44 = vand.u32 2147483647, %v1026_v34 }
 0x13c   :  { %6134 = vst [vmem:[#allocation24_spill] sm:$0xff] %v4471_v36  ;;  %6135 = vst [vmem:[#allocation25_spill] sm:$0xff] %v4475_v39  ;;  %v3641_v50 = vpop.f32.mrb[16].mxu0  ;;  %v758_v52 = vand.u32 2147483647, %v726_v37 }
 0x13d   :  { %v4480_v54 = vadd.f32 %v3641_v50, %v4383_v42  ;;  %v275_v57 = vpop.f32.mrb[17].mxu0  ;;  %v1057_v59 = vand.u32 2147483647, %v1025_v43 }
 0x13e   :  { %v4483_v62 = vadd.f32 %v4379_v38, %v275_v57  ;;  %v4485_v63 = vpack.c.bf16 %v759_v40, %v758_v52 }
 0x13f   :  { %v1320_v0 = vadd.f32 %v4393_v48, %v4480_v54  ;;  %v1324_v1 = vadd.f32 %v4441_v15, %v4480_v54  ;;  %v4491_v3 = vpack.c.bf16 %v1058_v44, %v1057_v59 }
 0x140   :  { %6136 = vst [vmem:[#allocation26_spill] sm:$0xff] %v4485_v63  ;;  %v3644_v6 = vpop.f32.mrb[18].mxu0  ;;  %v1319_v7 = vadd.f32 %v4483_v62, %v4395_v49  ;;  %v1323_v8 = vadd.f32 %v4483_v62, %v4447_v18 }
 0x141   :  { %6137 = vst [vmem:[#allocation27_spill] sm:$0xff] %v4491_v3  ;;  %v4500_v11 = vadd.f32 %v3644_v6, %v4391_v47  ;;  %v285_v13 = vpop.f32.mrb[19].mxu0  ;;  %v1352_v14 = vand.u32 2147483647, %v1320_v0  ;;  %v1356_v17 = vand.u32 2147483647, %v1324_v1 }
 0x142   :  { %v4503_v19 = vadd.f32 %v4381_v41, %v285_v13  ;;  %v1351_v20 = vand.u32 2147483647, %v1319_v7  ;;  %v1355_v21 = vand.u32 2147483647, %v1323_v8 }
 0x143   :  { %v1322_v25 = vadd.f32 %v4409_v56, %v4500_v11  ;;  %v1326_v26 = vadd.f32 %v4459_v28, %v4500_v11 }
 0x144   :  { %v4513_v27 = vpop.f32.mrb[20].mxu0  ;;  %v4515_v29 = vpack.c.bf16 %v1352_v14, %v1351_v20  ;;  %v1321_v31 = vadd.f32 %v4503_v19, %v4411_v58  ;;  %v4519_v33 = vpack.c.bf16 %v1356_v17, %v1355_v21  ;;  %v1325_v34 = vadd.f32 %v4503_v19, %v4463_v32 }
 0x145   :  { %6138 = vst [vmem:[#allocation28_spill] sm:$0xff] %v4513_v27  ;;  %v4523_v37 = vpop.f32.mrb[21].mxu0  ;;  %v1354_v40 = vand.u32 2147483647, %v1322_v25  ;;  %v1358_v43 = vand.u32 2147483647, %v1326_v26  ;;  %v1328_v50 = vadd.f32 %v4513_v27, %v4480_v54  ;;  %v729_v7 = vadd.f32 %v4513_v27, %v4386_v45 }
 0x146   :  { %6139 = vst [vmem:[#allocation29_spill] sm:$0xff] %v4523_v37  ;;  %v1353_v52 = vand.u32 2147483647, %v1321_v31  ;;  %v1357_v57 = vand.u32 2147483647, %v1325_v34  ;;  %v1327_v59 = vadd.f32 %v4483_v62, %v4523_v37  ;;  %v728_v6 = vadd.f32 %v4389_v46, %v4523_v37 }
 0x147   :  { %v1360_v1 = vand.u32 2147483647, %v1328_v50  ;;  %v1027_v8 = vadd.f32 %v4425_v4, %v4523_v37  ;;  %v1028_v21 = vadd.f32 %v4513_v27, %v4422_v2  ;;  %v761_v34 = vand.u32 2147483647, %v729_v7 }
 0x148   :  { %v4539_v13 = vpop.f32.mrb[22].mxu0  ;;  %v4541_v14 = vpack.c.bf16 %v1354_v40, %v1353_v52  ;;  %v4543_v17 = vpack.c.bf16 %v1358_v43, %v1357_v57  ;;  %v1359_v20 = vand.u32 2147483647, %v1327_v59  ;;  %v760_v31 = vand.u32 2147483647, %v728_v6 }
 0x149   :  { %6140 = vst [vmem:[#allocation30_spill] sm:$0xff] %v4539_v13  ;;  %v4547_v25 = vpop.f32.mrb[23].mxu0  ;;  %v1330_v26 = vadd.f32 %v4539_v13, %v4500_v11  ;;  %v731_v50 = vadd.f32 %v4539_v13, %v4404_v53  ;;  %v1059_v6 = vand.u32 2147483647, %v1027_v8  ;;  %v1060_v8 = vand.u32 2147483647, %v1028_v21 }
 0x14a   :  { %6141 = vst [vmem:[#allocation31_spill] sm:$0xff] %v4547_v25  ;;  %v4553_v0 = vpack.c.bf16 %v1360_v1, %v1359_v20  ;;  %v1329_v40 = vadd.f32 %v4503_v19, %v4547_v25  ;;  %v730_v52 = vadd.f32 %v4407_v55, %v4547_v25  ;;  %v4561_v59 = vpack.c.bf16 %v761_v34, %v760_v31 }
 0x14b   :  { %v1362_v57 = vand.u32 2147483647, %v1330_v26  ;;  %v763_v35 = vand.u32 2147483647, %v731_v50  ;;  %v1029_v1 = vadd.f32 %v4437_v12, %v4547_v25  ;;  %v1030_v20 = vadd.f32 %v4539_v13, %v4434_v9 }
 0x14c   :  { %6142 = vst [vmem:[#allocation32_spill] sm:$0xff] %v4553_v0  ;;  %6143 = vst [vmem:[#allocation33_spill] sm:$0xff] %v4561_v59  ;;  %v3653_v7 = vpop.f32.mrb[24].mxu0  ;;  %v1361_v22 = vand.u32 2147483647, %v1329_v40  ;;  %v4581_v44 = vpack.c.bf16 %v1060_v8, %v1059_v6 }
 0x14d   :  { %v762_v60 = vand.u32 2147483647, %v730_v52  ;;  %v4568_v51 = vadd.f32 %v3653_v7, %v4383_v42  ;;  %v315_v43 = vpop.f32.mrb[25].mxu0  ;;  %v1061_v52 = vand.u32 2147483647, %v1029_v1 }
 0x14e   :  { %v4575_v34 = vadd.f32 %v4379_v38, %v315_v43  ;;  %v4577_v50 = vpack.c.bf16 %v1362_v57, %v1361_v22  ;;  %6147 = vst [vmem:[#allocation37_spill] sm:$0xff] %v4581_v44  ;;  %v1062_v7 = vand.u32 2147483647, %v1030_v20 }
 0x14f   :  { %6144 = vst [vmem:[#allocation34_spill] sm:$0xff] %v4568_v51  ;;  %v4579_v40 = vpack.c.bf16 %v763_v35, %v762_v60  ;;  %v1620_v10 = vadd.f32 %v4393_v48, %v4568_v51  ;;  %v1624_v26 = vadd.f32 %v4441_v15, %v4568_v51  ;;  %v4607_v23 = vadd.f32 %v4513_v27, %v4568_v51 }
 0x150   :  { %6145 = vst [vmem:[#allocation35_spill] sm:$0xff] %v4577_v50  ;;  %v3656_v24 = vpop.f32.mrb[26].mxu0  ;;  %v1619_v22 = vadd.f32 %v4575_v34, %v4395_v49  ;;  %v1623_v60 = vadd.f32 %v4575_v34, %v4447_v18  ;;  %v4595_v35 = vadd.f32 %v4575_v34, %v4523_v37  ;;  %v4600_v6 = vpack.c.bf16 %v1062_v7, %v1061_v52 }
 0x151   :  { %6146 = vst [vmem:[#allocation36_spill] sm:$0xff] %v4579_v40  ;;  %v4598_v43 = vadd.f32 %v3656_v24, %v4391_v47  ;;  %v325_v57 = vpop.f32.mrb[27].mxu0  ;;  %v1652_v1 = vand.u32 2147483647, %v1620_v10  ;;  %v1656_v20 = vand.u32 2147483647, %v1624_v26 }
 0x152   :  { %6148 = vst [vmem:[#allocation38_spill] sm:$0xff] %v4595_v35  ;;  %6150 = vst [vmem:[#allocation40_spill] sm:$0xff] %v4600_v6  ;;  %v4603_v8 = vadd.f32 %v4381_v41, %v325_v57  ;;  %v1651_v21 = vand.u32 2147483647, %v1619_v22  ;;  %v1655_v31 = vand.u32 2147483647, %v1623_v60 }
 0x153   :  { %6149 = vst [vmem:[#allocation39_spill] sm:$0xff] %v4598_v43  ;;  %6152 = vst [vmem:[#allocation42_spill] sm:$0xff] %v4607_v23  ;;  %v4611_v44 = vadd.f32 %v4409_v56, %v4598_v43  ;;  %v4615_v24 = vadd.f32 %v4459_v28, %v4598_v43  ;;  %v4620_v26 = vadd.f32 %v4539_v13, %v4598_v43 }
 0x154   :  { %6151 = vst [vmem:[#allocation41_spill] sm:$0xff] %v4603_v8  ;;  %v4622_v52 = vpop.f32.mrb[28].mxu0  ;;  %v4626_v22 = vpack.c.bf16 %v1652_v1, %v1651_v21  ;;  %v4630_v60 = vadd.f32 %v4603_v8, %v4411_v58  ;;  %v4632_v57 = vpack.c.bf16 %v1656_v20, %v1655_v31  ;;  %v4653_v16 = vadd.f32 %v4603_v8, %v4463_v32 }
 0x155   :  { %6153 = vst [vmem:[#allocation43_spill] sm:$0xff] %v4611_v44  ;;  %6154 = vst [vmem:[#allocation44_spill] sm:$0xff] %v4615_v24  ;;  %v4634_v6 = vpop.f32.mrb[29].mxu0  ;;  %v1332_v10 = vadd.f32 %v4622_v52, %v4480_v54  ;;  %v733_v3 = vadd.f32 %v4622_v52, %v4386_v45  ;;  %v1032_v39 = vadd.f32 %v4622_v52, %v4422_v2 }
 0x156   :  { %6155 = vst [vmem:[#allocation45_spill] sm:$0xff] %v4620_v26  ;;  %6156 = vst [vmem:[#allocation46_spill] sm:$0xff] %v4622_v52  ;;  %v1331_v1 = vadd.f32 %v4483_v62, %v4634_v6  ;;  %v732_v20 = vadd.f32 %v4389_v46, %v4634_v6  ;;  %v1031_v7 = vadd.f32 %v4425_v4, %v4634_v6 }
 0x157   :  { %6157 = vst [vmem:[#allocation47_spill] sm:$0xff] %v4626_v22  ;;  %6158 = vst [vmem:[#allocation48_spill] sm:$0xff] %v4630_v60  ;;  %v765_v22 = vand.u32 2147483647, %v733_v3  ;;  %v1064_v30 = vand.u32 2147483647, %v1032_v39  ;;  %v4659_v31 = vadd.f32 %v4603_v8, %v4547_v25  ;;  %v4663_v63 = vadd.f32 %v4575_v34, %v4634_v6 }
 0x158   :  { %6159 = vst [vmem:[#allocation49_spill] sm:$0xff] %v4632_v57  ;;  %6160 = vst [vmem:[#allocation50_spill] sm:$0xff] %v4634_v6  ;;  %v1364_v57 = vand.u32 2147483647, %v1332_v10  ;;  %v4655_v21 = vpop.f32.mrb[30].mxu0  ;;  %v6172_v43 = vpack.c.bf16 %v4386_v45, %v4389_v46 }
 0x159   :  { %6161 = vst [vmem:[#allocation51_spill] sm:$0xff] %v4653_v16  ;;  %6162 = vst [vmem:[#allocation52_spill] sm:$0xff] %v4655_v21  ;;  %v1363_v40 = vand.u32 2147483647, %v1331_v1  ;;  %v764_v59 = vand.u32 2147483647, %v732_v20  ;;  %v1334_v39 = vadd.f32 %v4655_v21, %v4500_v11  ;;  %v4671_v3 = vadd.f32 %v4655_v21, %v4404_v53 }
 0x15a   :  { %6163 = vst [vmem:[#allocation53_spill] sm:$0xff] %v4659_v31  ;;  %6164 = vst [vmem:[#allocation54_spill] sm:$0xff] %v4663_v63  ;;  %v4665_v36 = vpop.f32.mrb[31].mxu0  ;;  %v1063_v10 = vand.u32 2147483647, %v1031_v7  ;;  %v4675_v1 = vadd.f32 %v4655_v21, %v4434_v9 }
 0x15b   :  { %6165 = vst [vmem:[#allocation55_spill] sm:$0xff] %v4665_v36  ;;  %v4677_v20 = vpack.c.bf16 %v1364_v57, %v1363_v40  ;;  %v1333_v5 = vadd.f32 %v4503_v19, %v4665_v36  ;;  %v4683_v63 = vpack.c.bf16 %v765_v22, %v764_v59  ;;  %v1366_v26 = vand.u32 2147483647, %v1334_v39 }
 0x15c   :  { %v4687_v31 = vadd.f32 %v4407_v55, %v4665_v36  ;;  %v4690_v35 = vpack.c.bf16 %v1064_v30, %v1063_v10  ;;  %v3665_v23 = vpop.f32.mrb[32].mxu0  ;;  %v4694_v57 = vadd.f32 %v4437_v12, %v4665_v36  ;;  %v4699_v59 = vadd.f32 %v4622_v52, %v4568_v51 }
 0x15d   :  { %6166 = vst [vmem:[#allocation56_spill] sm:$0xff] %v4677_v20  ;;  %6167 = vst [vmem:[#allocation57_spill] sm:$0xff] %v4683_v63  ;;  %v1365_v40 = vand.u32 2147483647, %v1333_v5  ;;  %v4702_v22 = vadd.f32 %v3665_v23, %v4383_v42  ;;  %v355_v39 = vpop.f32.mrb[33].mxu0  ;;  %v4708_v5 = vadd.f32 %v4603_v8, %v4665_v36 }
 0x15e   :  { %6168 = vst [vmem:[#allocation58_spill] sm:$0xff] %v4690_v35  ;;  %6169 = vst [vmem:[#allocation59_spill] sm:$0xff] %v4699_v59  ;;  %v4711_v10 = vadd.f32 %v4379_v38, %v355_v39 }
 0x15f   :  { %6170 = vst [vmem:[#allocation60_spill] sm:$0xff] %v4708_v5  ;;  %v4713_v24 = vpack.c.bf16 %v1366_v26, %v1365_v40  ;;  %v1920_v23 = vadd.f32 %v4393_v48, %v4702_v22  ;;  %v1924_v61 = vadd.f32 %v4441_v15, %v4702_v22  ;;  %v1928_v30 = vadd.f32 %v4513_v27, %v4702_v22 }
 0x160   :  { %v4725_v63 = vadd.f32 %v4622_v52, %v4702_v22  ;;  %v3668_v39 = vpop.f32.mrb[34].mxu0  ;;  %v3743_v26 = vpack.c.bf16 %v4702_v22, %v4711_v10  ;;  %v1919_v40 = vadd.f32 %v4711_v10, %v4395_v49  ;;  %v1923_v35 = vadd.f32 %v4711_v10, %v4447_v18 }
 0x161   :  { %6171 = vst [vmem:[#allocation61_spill] sm:$0xff] %v4713_v24  ;;  %v1927_v7 = vadd.f32 %v4711_v10, %v4523_v37  ;;  %v4736_v5 = vadd.f32 %v3668_v39, %v4391_v47  ;;  %v365_v59 = vpop.f32.mrb[35].mxu0  ;;  %v1952_v16 = vand.u32 2147483647, %v1920_v23  ;;  %v1956_v44 = vand.u32 2147483647, %v1924_v61 }
 0x162   :  { %v4740_v60 = vadd.f32 %v4711_v10, %v4634_v6  ;;  %v4743_v52 = vadd.f32 %v4381_v41, %v365_v59  ;;  %3744 = vmatprep.subr.bf16.mxu1 %v3743_v26  ;;  %v1951_v24 = vand.u32 2147483647, %v1919_v40  ;;  %v1955_v20 = vand.u32 2147483647, %v1923_v35 }
 0x163   :  { %v1959_v8 = vand.u32 2147483647, %v1927_v7  ;;  %3746 = vmatpush3.bf16.msra.mxu1 %v6172_v43  ;;  %v1922_v39 = vadd.f32 %v4409_v56, %v4736_v5  ;;  %v1926_v61 = vadd.f32 %v4459_v28, %v4736_v5  ;;  %v1960_v23 = vand.u32 2147483647, %v1928_v30 }
 0x164   :  { %v4754_v6 = vadd.f32 %v4539_v13, %v4736_v5  ;;  %v4756_v59 = vpop.f32.mrb[36].mxu0  ;;  %v3747_v35 = vpack.c.bf16 %v4736_v5, %v4743_v52  ;;  %v4760_v7 = vpack.c.bf16 %v1952_v16, %v1951_v24  ;;  %v1921_v43 = vadd.f32 %v4743_v52, %v4411_v58 }
 0x165   :  { %v4764_v26 = vpack.c.bf16 %v1956_v44, %v1955_v20  ;;  %v4766_v40 = vpop.f32.mrb[37].mxu0  ;;  %v1336_v30 = vadd.f32 %v4756_v59, %v4480_v54  ;;  %v1936_v13 = vadd.f32 %v4756_v59, %v4702_v22  ;;  %v1954_v27 = vand.u32 2147483647, %v1922_v39 }
 0x166   :  { %6173 = vst [vmem:[#allocation62_spill] sm:$0xff] %v4760_v7  ;;  %6175 = vst [vmem:[#allocation64_spill] sm:$0xff] %v4766_v40  ;;  %v1925_v37 = vadd.f32 %v4743_v52, %v4463_v32  ;;  %3748 = vmatprep.subr.bf16.mxu1 %v3747_v35  ;;  %v1335_v16 = vadd.f32 %v4483_v62, %v4766_v40  ;;  %v1935_v24 = vadd.f32 %v4711_v10, %v4766_v40 }
 0x167   :  { %6174 = vst [vmem:[#allocation63_spill] sm:$0xff] %v4764_v26  ;;  %v1953_v20 = vand.u32 2147483647, %v1921_v43  ;;  %v6176_v26 = vpack.c.bf16 %v4404_v53, %v4407_v55  ;;  %v1368_v7 = vand.u32 2147483647, %v1336_v30  ;;  %v4783_v28 = vpack.c.bf16 %v1960_v23, %v1959_v8 }
 0x168   :  { %v1968_v39 = vand.u32 2147483647, %v1936_v13  ;;  %v1957_v51 = vand.u32 2147483647, %v1925_v37  ;;  %v4785_v35 = vpop.f32.mrb[38].mxu0  ;;  %v736_v44 = vadd.f32 %v4389_v46, %v4766_v40  ;;  %v737_v8 = vadd.f32 %v4756_v59, %v4386_v45 }
 0x169   :  { %3750 = vmatpush3.bf16.msra.mxu1 %v6176_v26  ;;  %6177 = vst [vmem:[#allocation65_spill] sm:$0xff] %v4783_v28  ;;  %v1367_v50 = vand.u32 2147483647, %v1335_v16  ;;  %v1967_v32 = vand.u32 2147483647, %v1935_v24  ;;  %v4787_v15 = vpack.c.bf16 %v1954_v27, %v1953_v20  ;;  %v4791_v0 = vpop.f32.mrb[39].mxu0  ;;  %v1338_v43 = vadd.f32 %v4785_v35, %v4500_v11 }
 0x16a   :  { %v1938_v13 = vadd.f32 %v4785_v35, %v4736_v5  ;;  %v1958_v37 = vand.u32 2147483647, %v1926_v61  ;;  %v1337_v27 = vadd.f32 %v4503_v19, %v4791_v0  ;;  %v1937_v24 = vadd.f32 %v4743_v52, %v4791_v0 }
 0x16b   :  { %6178 = vst [vmem:[#allocation66_spill] sm:$0xff] %v4787_v15  ;;  %v3871_v23 = vpack.c.bf16 %v1368_v7, %v1367_v50  ;;  %v4803_v30 = vpack.c.bf16 %v1968_v39, %v1967_v32  ;;  %v1370_v16 = vand.u32 2147483647, %v1338_v43  ;;  %v768_v58 = vand.u32 2147483647, %v736_v44 }
 0x16c   :  { %v1970_v20 = vand.u32 2147483647, %v1938_v13  ;;  %v4807_v28 = vpack.c.bf16 %v1958_v37, %v1957_v51  ;;  %v3677_v61 = vpop.f32.mrb[40].mxu0  ;;  %v1369_v15 = vand.u32 2147483647, %v1337_v27  ;;  %v1929_v50 = vadd.f32 %v4743_v52, %v4547_v25 }
 0x16d   :  { %6179 = vst [vmem:[#allocation67_spill] sm:$0xff] %v4803_v30  ;;  %3872 = vmatprep.subr.bf16.mxu0 %v3871_v23  ;;  %v738_v7 = vadd.f32 %v4407_v55, %v4791_v0  ;;  %v4814_v32 = vadd.f32 %v3677_v61, %v4383_v42  ;;  %v395_v39 = vpop.f32.mrb[41].mxu0  ;;  %v1969_v43 = vand.u32 2147483647, %v1937_v24  ;;  %v769_v13 = vand.u32 2147483647, %v737_v8 }
 0x16e   :  { %6180 = vst [vmem:[#allocation68_spill] sm:$0xff] %v4807_v28  ;;  %3874 = vmatpush3.bf16.msra.mxu0 %v4515_v29  ;;  %v739_v51 = vadd.f32 %v4785_v35, %v4404_v53  ;;  %v4820_v37 = vadd.f32 %v4379_v38, %v395_v39  ;;  %v3875_v44 = vpack.c.bf16 %v1370_v16, %v1369_v15  ;;  %v1961_v23 = vand.u32 2147483647, %v1929_v50 }
 0x16f   :  { %6181 = vst [vmem:[#allocation69_spill] sm:$0xff] %v4814_v32  ;;  %v1962_v27 = vand.u32 2147483647, %v4754_v6  ;;  %v4823_v26 = vpack.c.bf16 %v1970_v20, %v1969_v43  ;;  %v4825_v28 = vpack.c.bf16 %v769_v13, %v768_v58  ;;  %v770_v61 = vand.u32 2147483647, %v738_v7 }
 0x170   :  { %6182 = vst [vmem:[#allocation70_spill] sm:$0xff] %v4820_v37  ;;  %v771_v30 = vand.u32 2147483647, %v739_v51  ;;  %v3680_v25 = vpop.f32.mrb[42].mxu0  ;;  %3876 = vmatprep.subr.bf16.mxu0 %v3875_v44  ;;  %v3751_v29 = vpack.c.bf16 %v4814_v32, %v4820_v37  ;;  %v1963_v24 = vand.u32 2147483647, %v4740_v60  ;;  %v1933_v20 = vadd.f32 %v4743_v52, %v4665_v36 }
 0x171   :  { %6183 = vst [vmem:[#allocation71_spill] sm:$0xff] %v4823_v26  ;;  %6184 = vst [vmem:[#allocation72_spill] sm:$0xff] %v4825_v28  ;;  %v4829_v8 = vpack.c.bf16 %v1962_v27, %v1961_v23  ;;  %v1964_v15 = vand.u32 2147483647, %v4725_v63  ;;  %v4834_v16 = vadd.f32 %v3680_v25, %v4391_v47  ;;  %v405_v6 = vpop.f32.mrb[43].mxu0  ;;  %v1934_v50 = vadd.f32 %v4655_v21, %v4736_v5 }
 0x172   :  { %3878 = vmatpush3.bf16.msra.mxu0 %v4541_v14  ;;  %v4837_v58 = vpack.c.bf16 %v771_v30, %v770_v61  ;;  %v4844_v7 = vadd.f32 %v4381_v41, %v405_v6  ;;  %3752 = vmatprep.subr.bf16.mxu1 %v3751_v29  ;;  %v6190_v63 = vand.u32 2147483647, %v4687_v31  ;;  %v6191_v25 = vand.u32 2147483647, %v4671_v3 }
 0x173   :  { %6185 = vst [vmem:[#allocation73_spill] sm:$0xff] %v4829_v8  ;;  %6186 = vst [vmem:[#allocation74_spill] sm:$0xff] %v4834_v16  ;;  %v4846_v60 = vpack.c.bf16 %v1964_v15, %v1963_v24  ;;  %v4856_v14 = vadd.f32 %v4425_v4, %v4766_v40  ;;  %v6193_v30 = vpack.c.bf16 %v4422_v2, %v4425_v4  ;;  %v1965_v43 = vand.u32 2147483647, %v1933_v20 }
 0x174   :  { %6187 = vst [vmem:[#allocation75_spill] sm:$0xff] %v4837_v58  ;;  %6188 = vst [vmem:[#allocation76_spill] sm:$0xff] %v4844_v7  ;;  %v4852_v39 = vpack.c.bf16 %v6191_v25, %v6190_v63  ;;  %v1966_v13 = vand.u32 2147483647, %v1934_v50  ;;  %v4863_v51 = vadd.f32 %v4756_v59, %v4422_v2  ;;  %v4867_v31 = vadd.f32 %v4437_v12, %v4791_v0  ;;  %v4869_v3 = vpop.f32.mrb[44].mxu0 }
 0x175   :  { %6189 = vst [vmem:[#allocation77_spill] sm:$0xff] %v4846_v60  ;;  %3754 = vmatpush3.bf16.msra.mxu1 %v6193_v30  ;;  %v3755_v44 = vpack.c.bf16 %v4834_v16, %v4844_v7  ;;  %v4876_v27 = vadd.f32 %v4785_v35, %v4434_v9  ;;  %v6195_v61 = vand.u32 2147483647, %v4694_v57  ;;  %v6196_v29 = vand.u32 2147483647, %v4675_v1  ;;  %v4884_v15 = vpop.f32.mrb[45].mxu0 }
 0x176   :  { %6192 = vst [vmem:[#allocation78_spill] sm:$0xff] %v4852_v39  ;;  %6194 = vst [vmem:[#allocation79_spill] sm:$0xff] %v4867_v31  ;;  %v1340_v6 = vadd.f32 %v4869_v3, %v4480_v54  ;;  %v1940_v20 = vadd.f32 %v4869_v3, %v4702_v22  ;;  %v741_v50 = vadd.f32 %v4869_v3, %v4386_v45 }
 0x177   :  { %v4882_v24 = vpack.c.bf16 %v6196_v29, %v6195_v61  ;;  %v4892_v63 = vpack.c.bf16 %v1966_v13, %v1965_v43  ;;  %3756 = vmatprep.subr.bf16.mxu1 %v3755_v44  ;;  %v1339_v57 = vadd.f32 %v4483_v62, %v4884_v15  ;;  %v1939_v25 = vadd.f32 %v4711_v10, %v4884_v15 }
 0x178   :  { %v740_v30 = vadd.f32 %v4389_v46, %v4884_v15  ;;  %v6199_v61 = vpack.c.bf16 %v4434_v9, %v4437_v12  ;;  %v1372_v29 = vand.u32 2147483647, %v1340_v6  ;;  %v1972_v43 = vand.u32 2147483647, %v1940_v20  ;;  %v4909_v23 = vpop.f32.mrb[46].mxu0 }
 0x179   :  { %6197 = vst [vmem:[#allocation80_spill] sm:$0xff] %v4882_v24  ;;  %6198 = vst [vmem:[#allocation81_spill] sm:$0xff] %v4892_v63  ;;  %v773_v13 = vand.u32 2147483647, %v741_v50  ;;  %v4907_v44 = vadd.f32 %v4425_v4, %v4884_v15  ;;  %v1371_v1 = vand.u32 2147483647, %v1339_v57  ;;  %v4913_v39 = vadd.f32 %v4869_v3, %v4422_v2 }
 0x17a   :  { %3758 = vmatpush3.bf16.msra.mxu1 %v6199_v61  ;;  %v1971_v24 = vand.u32 2147483647, %v1939_v25  ;;  %v4917_v63 = vadd.f32 %v4575_v34, %v4766_v40  ;;  %v4919_v61 = vpop.f32.mrb[47].mxu0  ;;  %v1342_v6 = vadd.f32 %v4909_v23, %v4500_v11  ;;  %v1942_v20 = vadd.f32 %v4909_v23, %v4736_v5 }
 0x17b   :  { %6200 = vst [vmem:[#allocation82_spill] sm:$0xff] %v4907_v44  ;;  %6201 = vst [vmem:[#allocation83_spill] sm:$0xff] %v4913_v39  ;;  %v772_v50 = vand.u32 2147483647, %v740_v30  ;;  %v743_v57 = vadd.f32 %v4909_v23, %v4404_v53  ;;  %v3879_v25 = vpack.c.bf16 %v1372_v29, %v1371_v1  ;;  %v1341_v60 = vadd.f32 %v4503_v19, %v4919_v61 }
 0x17c   :  { %6202 = vst [vmem:[#allocation84_spill] sm:$0xff] %v4917_v63  ;;  %v4931_v58 = vpack.c.bf16 %v1972_v43, %v1971_v24  ;;  %v1374_v7 = vand.u32 2147483647, %v1342_v6  ;;  %v1941_v32 = vadd.f32 %v4743_v52, %v4919_v61  ;;  %v1974_v37 = vand.u32 2147483647, %v1942_v20  ;;  %v3689_v30 = vpop.f32.mrb[48].mxu0 }
 0x17d   :  { %v4935_v8 = vpack.c.bf16 %v773_v13, %v772_v50  ;;  %3880 = vmatprep.subr.bf16.mxu0 %v3879_v25  ;;  %v1373_v28 = vand.u32 2147483647, %v1341_v60  ;;  %v742_v1 = vadd.f32 %v4407_v55, %v4919_v61  ;;  %v775_v29 = vand.u32 2147483647, %v743_v57  ;;  %v435_v43 = vpop.f32.mrb[49].mxu0 }
 0x17e   :  { %6203 = vst [vmem:[#allocation85_spill] sm:$0xff] %v4931_v58  ;;  %v4941_v63 = vadd.f32 %v4437_v12, %v4919_v61  ;;  %v4944_v24 = vadd.f32 %v3689_v30, %v4383_v42  ;;  %3882 = vmatpush3.bf16.msra.mxu0 %v4519_v33  ;;  %v1973_v6 = vand.u32 2147483647, %v1941_v32  ;;  %v4950_v60 = vadd.f32 %v4909_v23, %v4434_v9 }
 0x17f   :  { %6204 = vst [vmem:[#allocation86_spill] sm:$0xff] %v4935_v8  ;;  %v4953_v20 = vadd.f32 %v4379_v38, %v435_v43  ;;  %v3883_v50 = vpack.c.bf16 %v1374_v7, %v1373_v28  ;;  %v774_v57 = vand.u32 2147483647, %v742_v1 }
 0x180   :  { %6205 = vst [vmem:[#allocation87_spill] sm:$0xff] %v4941_v63  ;;  %6206 = vst [vmem:[#allocation88_spill] sm:$0xff] %v4950_v60  ;;  %v4956_v16 = vpack.c.bf16 %v1974_v37, %v1973_v6  ;;  %v2536_v30 = vadd.f32 %v4756_v59, %v4944_v24  ;;  %v2520_v33 = vadd.f32 %v4393_v48, %v4944_v24  ;;  %v3692_v13 = vpop.f32.mrb[50].mxu0 }
 0x181   :  { %v4964_v32 = vadd.f32 %v4869_v3, %v4944_v24  ;;  %3884 = vmatprep.subr.bf16.mxu0 %v3883_v50  ;;  %v3759_v28 = vpack.c.bf16 %v4944_v24, %v4953_v20  ;;  %v2535_v7 = vadd.f32 %v4953_v20, %v4766_v40  ;;  %v4970_v37 = vpack.c.bf16 %v775_v29, %v774_v57  ;;  %v445_v6 = vpop.f32.mrb[51].mxu0 }
 0x182   :  { %6207 = vst [vmem:[#allocation89_spill] sm:$0xff] %v4956_v16  ;;  %v2519_v1 = vadd.f32 %v4953_v20, %v4395_v49  ;;  %v4975_v43 = vadd.f32 %v3692_v13, %v4391_v47  ;;  %3886 = vmatpush3.bf16.msra.mxu0 %v4543_v17  ;;  %v2568_v25 = vand.u32 2147483647, %v2536_v30  ;;  %v2552_v8 = vand.u32 2147483647, %v2520_v33 }
 0x183   :  { %6208 = vst [vmem:[#allocation90_spill] sm:$0xff] %v4970_v37  ;;  %v2539_v50 = vadd.f32 %v4953_v20, %v4884_v15  ;;  %v4981_v16 = vadd.f32 %v4381_v41, %v445_v6  ;;  %3760 = vmatprep.subr.bf16.mxu1 %v3759_v28  ;;  %v2567_v29 = vand.u32 2147483647, %v2535_v7  ;;  %v2572_v37 = vand.u32 2147483647, %v4964_v32 }
 0x184   :  { %v2551_v57 = vand.u32 2147483647, %v2519_v1  ;;  %v6209_v13 = vpack.c.bf16 %v4480_v54, %v4483_v62  ;;  %v2538_v17 = vadd.f32 %v4785_v35, %v4975_v43  ;;  %v2522_v30 = vadd.f32 %v4409_v56, %v4975_v43  ;;  %v4995_v28 = vpop.f32.mrb[52].mxu0 }
 0x185   :  { %v2571_v33 = vand.u32 2147483647, %v2539_v50  ;;  %v4993_v6 = vadd.f32 %v4953_v20, %v4447_v18  ;;  %v3763_v32 = vpack.c.bf16 %v4975_v43, %v4981_v16  ;;  %v4999_v7 = vpack.c.bf16 %v2568_v25, %v2567_v29  ;;  %v5005_v58 = vpop.f32.mrb[53].mxu0  ;;  %v6214_v25 = vld [vmem:[#allocation11_spill] sm:$0xff] }
 0x186   :  { %3762 = vmatpush3.bf16.msra.mxu1 %v6209_v13  ;;  %v5001_v1 = vpack.c.bf16 %v2552_v8, %v2551_v57  ;;  %v2537_v13 = vadd.f32 %v4981_v16, %v4791_v0  ;;  %v1344_v50 = vadd.f32 %v4995_v28, %v4480_v54  ;;  %v1944_v9 = vadd.f32 %v4995_v28, %v4702_v22 }
 0x187   :  { %6210 = vst [vmem:[#allocation91_spill] sm:$0xff] %v4999_v7  ;;  %v2570_v12 = vand.u32 2147483647, %v2538_v17  ;;  %v745_v2 = vadd.f32 %v4995_v28, %v4386_v45  ;;  %3764 = vmatprep.subr.bf16.mxu1 %v3763_v32  ;;  %v1343_v8 = vadd.f32 %v4483_v62, %v5005_v58  ;;  %v1943_v29 = vadd.f32 %v4711_v10, %v5005_v58 }
 0x188   :  { %6211 = vst [vmem:[#allocation92_spill] sm:$0xff] %v5001_v1  ;;  %v2569_v57 = vand.u32 2147483647, %v2537_v13  ;;  %v6212_v1 = vpack.c.bf16 %v4500_v11, %v4503_v19  ;;  %v1376_v7 = vand.u32 2147483647, %v1344_v50  ;;  %v744_v4 = vadd.f32 %v4389_v46, %v5005_v58  ;;  %v5024_v60 = vpop.f32.mrb[54].mxu0 }
 0x189   :  { %v1976_v17 = vand.u32 2147483647, %v1944_v9  ;;  %v777_v32 = vand.u32 2147483647, %v745_v2  ;;  %v1375_v63 = vand.u32 2147483647, %v1343_v8  ;;  %v2521_v39 = vadd.f32 %v4981_v16, %v6214_v25 }
 0x18a   :  { %3766 = vmatpush3.bf16.msra.mxu1 %v6212_v1  ;;  %v1975_v26 = vand.u32 2147483647, %v1943_v29  ;;  %v5026_v21 = vpack.c.bf16 %v2570_v12, %v2569_v57  ;;  %v5030_v13 = vpop.f32.mrb[55].mxu0  ;;  %v1346_v1 = vadd.f32 %v5024_v60, %v4500_v11  ;;  %v1946_v9 = vadd.f32 %v5024_v60, %v4736_v5 }
 0x18b   :  { %v776_v50 = vand.u32 2147483647, %v744_v4  ;;  %v2554_v36 = vand.u32 2147483647, %v2522_v30  ;;  %v3887_v2 = vpack.c.bf16 %v1376_v7, %v1375_v63  ;;  %v1345_v8 = vadd.f32 %v4503_v19, %v5030_v13 }
 0x18c   :  { %6213 = vst [vmem:[#allocation93_spill] sm:$0xff] %v5026_v21  ;;  %v5040_v29 = vpack.c.bf16 %v1976_v17, %v1975_v26  ;;  %v1378_v57 = vand.u32 2147483647, %v1346_v1  ;;  %v1945_v21 = vadd.f32 %v4743_v52, %v5030_v13  ;;  %v1978_v44 = vand.u32 2147483647, %v1946_v9  ;;  %v3701_v18 = vpop.f32.mrb[56].mxu0 }
 0x18d   :  { %v5044_v31 = vpack.c.bf16 %v777_v32, %v776_v50  ;;  %3888 = vmatprep.subr.bf16.mxu0 %v3887_v2  ;;  %v1377_v4 = vand.u32 2147483647, %v1345_v8  ;;  %v2553_v30 = vand.u32 2147483647, %v2521_v39  ;;  %v5046_v63 = vpack.c.bf16 %v2572_v37, %v2571_v33  ;;  %v475_v26 = vpop.f32.mrb[57].mxu0  ;;  %v6219_v17 = vld [vmem:[#allocation32_spill] sm:$0xff] }
 0x18e   :  { %6215 = vst [vmem:[#allocation11_spill] sm:$0xff] %v5040_v29  ;;  %v746_v7 = vadd.f32 %v4407_v55, %v5030_v13  ;;  %v5051_v12 = vadd.f32 %v3701_v18, %v4383_v42  ;;  %3890 = vmatpush3.bf16.msra.mxu0 %v6219_v17  ;;  %v1977_v1 = vand.u32 2147483647, %v1945_v21  ;;  %v747_v32 = vadd.f32 %v5024_v60, %v4404_v53  ;;  %v6220_v9 = vld [vmem:[#allocation18_spill] sm:$0xff] }
 0x18f   :  { %6216 = vst [vmem:[#allocation94_spill] sm:$0xff] %v5044_v31  ;;  %6217 = vst [vmem:[#allocation95_spill] sm:$0xff] %v5046_v63  ;;  %v2524_v50 = vadd.f32 %v6220_v9, %v4944_v24  ;;  %v5059_v39 = vadd.f32 %v4379_v38, %v475_v26  ;;  %v3891_v37 = vpack.c.bf16 %v1378_v57, %v1377_v4  ;;  %v2555_v18 = vand.u32 2147483647, %v4993_v6  ;;  %v6226_v6 = vld [vmem:[#allocation35_spill] sm:$0xff]  ;;  %v6229_v26 = vld [vmem:[#allocation21_spill] sm:$0xff] }
 0x190   :  { %6218 = vst [vmem:[#allocation96_spill] sm:$0xff] %v5051_v12  ;;  %v5061_v33 = vpack.c.bf16 %v2554_v36, %v2553_v30  ;;  %v778_v2 = vand.u32 2147483647, %v746_v7  ;;  %v5063_v8 = vpack.c.bf16 %v1978_v44, %v1977_v1  ;;  %v779_v42 = vand.u32 2147483647, %v747_v32  ;;  %v3704_v21 = vpop.f32.mrb[58].mxu0 }
 0x191   :  { %6221 = vst [vmem:[#allocation32_spill] sm:$0xff] %v5059_v39  ;;  %v2556_v17 = vand.u32 2147483647, %v2524_v50  ;;  %3892 = vmatprep.subr.bf16.mxu0 %v3891_v37  ;;  %v3767_v63 = vpack.c.bf16 %v5051_v12, %v5059_v39  ;;  %v2541_v31 = vadd.f32 %v4981_v16, %v4919_v61  ;;  %v2542_v38 = vadd.f32 %v4909_v23, %v4975_v43  ;;  %v6224_v36 = vld [vmem:[#allocation23_spill] sm:$0xff]  ;;  %v485_v4 = vpop.f32.mrb[59].mxu0  ;;  %v6231_v39 = vld [vmem:[#allocation34_spill] sm:$0xff] }
 0x192   :  { %6222 = vst [vmem:[#allocation18_spill] sm:$0xff] %v5061_v33  ;;  %6223 = vst [vmem:[#allocation97_spill] sm:$0xff] %v5063_v8  ;;  %v2525_v57 = vadd.f32 %v4981_v16, %v6224_v36  ;;  %v5075_v44 = vadd.f32 %v3704_v21, %v4391_v47  ;;  %3894 = vmatpush3.bf16.msra.mxu0 %v6226_v6  ;;  %v5078_v30 = vpack.c.bf16 %v779_v42, %v778_v2 }
 0x193   :  { %v5080_v7 = vpack.c.bf16 %v2556_v17, %v2555_v18  ;;  %v2526_v1 = vadd.f32 %v6229_v26, %v4975_v43  ;;  %v5085_v32 = vadd.f32 %v4381_v41, %v485_v4  ;;  %3768 = vmatprep.subr.bf16.mxu1 %v3767_v63  ;;  %v2573_v50 = vand.u32 2147483647, %v2541_v31  ;;  %v6233_v18 = vld [vmem:[#allocation29_spill] sm:$0xff] }
 0x194   :  { %6225 = vst [vmem:[#allocation23_spill] sm:$0xff] %v5075_v44  ;;  %6227 = vst [vmem:[#allocation35_spill] sm:$0xff] %v5078_v30  ;;  %v2574_v37 = vand.u32 2147483647, %v2542_v38  ;;  %v2557_v12 = vand.u32 2147483647, %v2525_v57  ;;  %v6232_v47 = vpack.c.bf16 %v6231_v39, %v4575_v34  ;;  %v2543_v2 = vadd.f32 %v4953_v20, %v5005_v58 }
 0x195   :  { %6228 = vst [vmem:[#allocation98_spill] sm:$0xff] %v5080_v7  ;;  %6230 = vst [vmem:[#allocation21_spill] sm:$0xff] %v5085_v32  ;;  %v2558_v21 = vand.u32 2147483647, %v2526_v1  ;;  %v2544_v42 = vadd.f32 %v4995_v28, %v4944_v24  ;;  %v5096_v17 = vadd.f32 %v4953_v20, %v6233_v18  ;;  %v5098_v41 = vpop.f32.mrb[60].mxu0  ;;  %v3771_v31 = vpack.c.bf16 %v5075_v44, %v5085_v32  ;;  %v6235_v38 = vld [vmem:[#allocation28_spill] sm:$0xff] }
 0x196   :  { %3770 = vmatpush3.bf16.msra.mxu1 %v6232_v47  ;;  %v5102_v63 = vpack.c.bf16 %v2574_v37, %v2573_v50  ;;  %v2528_v57 = vadd.f32 %v6235_v38, %v4944_v24  ;;  %v5108_v4 = vadd.f32 %v4981_v16, %v5030_v13  ;;  %v5110_v6 = vpop.f32.mrb[61].mxu0  ;;  %v1348_v1 = vadd.f32 %v5098_v41, %v4480_v54  ;;  %v5123_v37 = vld [vmem:[%s6055_s3] sm:$0xff] }
 0x197   :  { %v1948_v47 = vadd.f32 %v5098_v41, %v4702_v22  ;;  %v749_v44 = vadd.f32 %v5098_v41, %v4386_v45  ;;  %v5118_v50 = vpack.c.bf16 %v2558_v21, %v2557_v12  ;;  %3772 = vmatprep.subr.bf16.mxu1 %v3771_v31  ;;  %v1347_v32 = vadd.f32 %v4483_v62, %v5110_v6  ;;  %v6237_v12 = vld [vmem:[#allocation39_spill] sm:$0xff]  ;;  %v6238_v21 = vld [vmem:[#allocation41_spill] sm:$0xff] }
 0x198   :  { %6234 = vst [vmem:[#allocation34_spill] sm:$0xff] %v5102_v63  ;;  %v1947_v22 = vadd.f32 %v4711_v10, %v5110_v6  ;;  %v748_v45 = vadd.f32 %v4389_v46, %v5110_v6  ;;  %v6239_v31 = vpack.c.bf16 %v6237_v12, %v6238_v21  ;;  %v2546_v30 = vadd.f32 %v5024_v60, %v4975_v43  ;;  %v5138_v62 = vpop.f32.mrb[62].mxu0 }
 0x199   :  { %6236 = vst [vmem:[#allocation29_spill] sm:$0xff] %v5118_v50  ;;  %v1380_v50 = vand.u32 2147483647, %v1348_v1  ;;  %v1980_v63 = vand.u32 2147483647, %v1948_v47  ;;  %v6240_v54 = vpack.c.bf16 %v4756_v59, %v4766_v40  ;;  %v6244_v1 = vld [vmem:[#allocation31_spill] sm:$0xff]  ;;  %v1950_v40 = vadd.f32 %v5138_v62, %v4736_v5 }
 0x19a   :  { %3774 = vmatpush3.bf16.msra.mxu1 %v6239_v31  ;;  %v781_v7 = vand.u32 2147483647, %v749_v44  ;;  %v1379_v10 = vand.u32 2147483647, %v1347_v32  ;;  %v1979_v33 = vand.u32 2147483647, %v1947_v22  ;;  %v2529_v44 = vadd.f32 %v4981_v16, %v6244_v1 }
 0x19b   :  { %3776 = vmatprep.subr.bf16.mxu1 %v6240_v54  ;;  %v6241_v46 = vand.u32 2147483647, %v4856_v14  ;;  %v6242_v8 = vand.u32 2147483647, %v4863_v51  ;;  %v5151_v47 = vpop.f32.mrb[63].mxu0  ;;  %v1350_v31 = vadd.f32 %v5138_v62, %v4500_v11  ;;  %v5170_v5 = vld [vmem:[%s6055_s3 + $0x8] sm:$0xff] }
 0x19c   :  { %v780_v54 = vand.u32 2147483647, %v748_v45  ;;  %v2575_v32 = vand.u32 2147483647, %v2543_v2  ;;  %v3895_v14 = vpack.c.bf16 %v1380_v50, %v1379_v10  ;;  %v1349_v51 = vadd.f32 %v4503_v19, %v5151_v47  ;;  %s4279_s3 = smov [#allocation7]  }
 0x19d   :  { %v5147_v29 = vpack.c.bf16 %v6242_v8, %v6241_v46  ;;  %637 = vmatmul.mubr.f32.vlgmr.msra.gmra.mrb[0].mxu1 %v5123_v37  ;;  %v5162_v22 = vpack.c.bf16 %v1980_v63, %v1979_v33  ;;  %v6245_v46 = vpack.c.bf16 %v4393_v48, %v4395_v49  ;;  %v1382_v11 = vand.u32 2147483647, %v1350_v31  ;;  %s3124_s20 = sshll.u32 %s4279_s3, 4  ;;  %s3125_s20 = int_to_ptr.vmem [resolvable:$true] %s3124_s20 }
 0x19e   :  { %706 = vmatprep.mubr.f32.mxu1 %v5170_v5  ;;  %v1949_v19 = vadd.f32 %v4743_v52, %v5151_v47  ;;  %v1982_v2 = vand.u32 2147483647, %v1950_v40  ;;  %v5175_v50 = vpack.c.bf16 %v781_v7, %v780_v54  ;;  %v6246_v33 = vpack.c.bf16 %v4785_v35, %v4791_v0  ;;  %3896 = vmatprep.subr.bf16.mxu0 %v3895_v14  ;;  %v6248_v7 = vld [vmem:[#allocation30_spill] sm:$0xff]  ;;  %s4245_s21 = scalar_lea.vmem %s3125_s20, 2048  ;;  %p4250_p3 = scmp.lt.s32.totalorder %s3125_s20, %s3125_s20 }
 0x19f   :  { %6243 = vst [vmem:[#allocation28_spill] sm:$0xff] %v5147_v29  ;;  %3778 = vmatpush3.bf16.msra.mxu1 %v6245_v46  ;;  %v1381_v63 = vand.u32 2147483647, %v1349_v51  ;;  %v2576_v45 = vand.u32 2147483647, %v2544_v42  ;;  %v750_v10 = vadd.f32 %v4407_v55, %v5151_v47  ;;  %v751_v31 = vadd.f32 %v5138_v62, %v4404_v53  ;;  %v6247_v46 = vld [vmem:[#allocation56_spill] sm:$0xff]  ;;  %p4246_p2 = scmp.ne.s32.totalorder %s3125_s20, %s4245_s21  ;;  %p4251_p4 = scmp.lt.s32.totalorder %s4245_s21, %s4245_s21 }
 0x1a0   :  { %3780 = vmatprep.subr.bf16.mxu1 %v6246_v33  ;;  %3898 = vmatpush3.bf16.msra.mxu0 %v6247_v46  ;;  %v1981_v8 = vand.u32 2147483647, %v1949_v19  ;;  %v2559_v52 = vand.u32 2147483647, %v5096_v17  ;;  %v2560_v40 = vand.u32 2147483647, %v2528_v57  ;;  %v2530_v54 = vadd.f32 %v6248_v7, %v4975_v43 }
 0x1a1   :  { %v3899_v29 = vpack.c.bf16 %v1382_v11, %v1381_v63  ;;  %v5188_v33 = vpack.c.bf16 %v2576_v45, %v2575_v32  ;;  %v782_v14 = vand.u32 2147483647, %v750_v10  ;;  %v783_v42 = vand.u32 2147483647, %v751_v31  ;;  %v6252_v10 = vld [vmem:[#allocation61_spill] sm:$0xff]  ;;  %p4252_p5 = por %p4251_p4, %p4250_p3 }
 0x1a2   :  { %v6249_v55 = vpack.c.bf16 %v4409_v56, %v6214_v25  ;;  %v5193_v51 = vpack.c.bf16 %v1982_v2, %v1981_v8  ;;  %v5195_v53 = vpack.c.bf16 %v2560_v40, %v2559_v52  ;;  %v2577_v19 = vand.u32 2147483647, %v5108_v4  ;;  %v6254_v2 = vld [vmem:[#allocation50_spill] sm:$0xff] }
 0x1a3   :  { %v2578_v17 = vand.u32 2147483647, %v2546_v30  ;;  %v6251_v57 = vpack.c.bf16 %v4869_v3, %v4884_v15  ;;  %3900 = vmatprep.subr.bf16.mxu0 %v3899_v29  ;;  %v5201_v32 = vpack.c.bf16 %v783_v42, %v782_v14  ;;  %v2561_v11 = vand.u32 2147483647, %v2529_v44  ;;  %v6255_v29 = vld [vmem:[#allocation67_spill] sm:$0xff]  ;;  %v6257_v52 = vld [vmem:[#allocation46_spill] sm:$0xff]  ;;  %p4253_p6 = pnand %p4252_p5, %p4246_p2 }
 0x1a4   :  { %3782 = vmatpush3.bf16.msra.mxu1 %v6249_v55  ;;  %6250 = vst [vmem:[#allocation39_spill] sm:$0xff] %v5195_v53  ;;  %v2562_v63 = vand.u32 2147483647, %v2530_v54  ;;  %v2547_v45 = vadd.f32 %v4953_v20, %v5110_v6  ;;  %3902 = vmatpush3.bf16.msra.mxu0 %v6252_v10  ;;  %v2548_v4 = vadd.f32 %v5098_v41, %v4944_v24  ;;  %v1070_v30 = vand.u32 2147483647, %v4876_v27  ;;  %v6258_v14 = vld [vmem:[#allocation20_spill] sm:$0xff] }
 0x1a5   :  { %3784 = vmatprep.subr.bf16.mxu1 %v6251_v57  ;;  %v5206_v8 = vpack.c.bf16 %v2578_v17, %v2577_v19  ;;  %v2531_v31 = vadd.f32 %v4953_v20, %v6254_v2  ;;  %3936 = vmatprep.subr.bf16.mxu0 %v6255_v29  ;;  %v2532_v40 = vadd.f32 %v6257_v52, %v4944_v24  ;;  %v6260_v27 = vld [vmem:[#allocation79_spill] sm:$0xff] }
 0x1a6   :  { %v5214_v46 = vpack.c.bf16 %v2562_v63, %v2561_v11  ;;  %v2579_v44 = vand.u32 2147483647, %v2547_v45  ;;  %v2549_v54 = vadd.f32 %v4981_v16, %v5151_v47  ;;  %v6259_v42 = vpack.c.bf16 %v6220_v9, %v6258_v14  ;;  %v6264_v45 = vld [vmem:[#allocation82_spill] sm:$0xff]  ;;  %v6265_v29 = vld [vmem:[#allocation55_spill] sm:$0xff] }
 0x1a7   :  { %6253 = vst [vmem:[#allocation41_spill] sm:$0xff] %v5206_v8  ;;  %v2580_v55 = vand.u32 2147483647, %v2548_v4  ;;  %v6261_v19 = vand.u32 2147483647, %v6260_v27  ;;  %v2550_v57 = vadd.f32 %v5138_v62, %v4975_v43  ;;  %v6263_v11 = vpack.c.bf16 %v4909_v23, %v4919_v61  ;;  %1448 = vmatmul.mubr.f32.vlgmr.msra.gmra.mrb[64].mxu0 %v5123_v37  ;;  %v6267_v27 = vld [vmem:[#allocation83_spill] sm:$0xff] }
 0x1a8   :  { %6256 = vst [vmem:[#allocation31_spill] sm:$0xff] %v5214_v46  ;;  %3786 = vmatpush3.bf16.msra.mxu1 %v6259_v42  ;;  %v2563_v20 = vand.u32 2147483647, %v2531_v31  ;;  %v2564_v24 = vand.u32 2147483647, %v2532_v40  ;;  %v2533_v4 = vadd.f32 %v4981_v16, %v6265_v29  ;;  %v6266_v42 = vld [vmem:[#allocation62_spill] sm:$0xff]  ;;  %2047 = vmatprep.mubr.f32.mxu0 %v5170_v5 }
 0x1a9   :  { %v5225_v17 = vpack.c.bf16 %v1070_v30, %v6261_v19  ;;  %3788 = vmatprep.subr.bf16.mxu1 %v6263_v11  ;;  %v2581_v63 = vand.u32 2147483647, %v2549_v54  ;;  %v1071_v10 = vand.u32 2147483647, %v6264_v45  ;;  %3938 = vmatpush3.bf16.msra.mxu0 %v6266_v42  ;;  %v5238_v30 = vpack.c.bf16 %v2580_v55, %v2579_v44  ;;  %v6268_v11 = vld [vmem:[#allocation52_spill] sm:$0xff]  ;;  %v6269_v46 = vld [vmem:[#allocation71_spill] sm:$0xff] }
 0x1aa   :  { %v2582_v31 = vand.u32 2147483647, %v2550_v57  ;;  %v1072_v19 = vand.u32 2147483647, %v6267_v27  ;;  %3940 = vmatprep.subr.bf16.mxu0 %v6269_v46  ;;  %v5244_v40 = vpack.c.bf16 %v2564_v24, %v2563_v20  ;;  %v2565_v54 = vand.u32 2147483647, %v2533_v4 }
 0x1ab   :  { %6262 = vst [vmem:[#allocation56_spill] sm:$0xff] %v5225_v17  ;;  %v2534_v17 = vadd.f32 %v6268_v11, %v4975_v43  ;;  %v6271_v45 = vld [vmem:[#allocation87_spill] sm:$0xff]  ;;  %v6272_v16 = vld [vmem:[#allocation88_spill] sm:$0xff]  ;;  %v6273_v42 = vpack.c.bf16 %v6229_v26, %v6224_v36  ;;  %v6276_v43 = vld [vmem:[#allocation14_spill] sm:$0xff]  ;;  %v6277_v46 = vpack.c.bf16 %v4995_v28, %v5005_v58 }
 0x1ac   :  { %6270 = vst [vmem:[#allocation30_spill] sm:$0xff] %v5244_v40  ;;  %v1073_v8 = vand.u32 2147483647, %v6271_v45  ;;  %v1074_v53 = vand.u32 2147483647, %v6272_v16  ;;  %v5251_v44 = vpack.c.bf16 %v2582_v31, %v2581_v63  ;;  %v5253_v55 = vpack.c.bf16 %v1072_v19, %v1071_v10  ;;  %v6279_v24 = vld [vmem:[#allocation13_spill] sm:$0xff] }
 0x1ad   :  { %3790 = vmatpush3.bf16.msra.mxu1 %v6273_v42  ;;  %v2566_v57 = vand.u32 2147483647, %v2534_v17  ;;  %v1043_v27 = vadd.f32 %v6276_v43, %v5005_v58  ;;  %v1044_v4 = vadd.f32 %v4995_v28, %v6279_v24  ;;  %v6280_v45 = vld [vmem:[#allocation17_spill] sm:$0xff]  ;;  %v6281_v63 = vld [vmem:[#allocation16_spill] sm:$0xff]  ;;  %v6282_v31 = vld [vmem:[#allocation66_spill] sm:$0xff]  ;;  %v1047_v42 = vadd.f32 %v6276_v43, %v5110_v6 }
 0x1ae   :  { %6274 = vst [vmem:[#allocation61_spill] sm:$0xff] %v5251_v44  ;;  %6275 = vst [vmem:[#allocation50_spill] sm:$0xff] %v5253_v55  ;;  %3792 = vmatprep.subr.bf16.mxu1 %v6277_v46  ;;  %v5260_v20 = vpack.c.bf16 %v1074_v53, %v1073_v8  ;;  %v1045_v16 = vadd.f32 %v6280_v45, %v5030_v13  ;;  %v1046_v10 = vadd.f32 %v5024_v60, %v6281_v63  ;;  %v6284_v8 = vld [vmem:[#allocation85_spill] sm:$0xff] }
 0x1af   :  { %3942 = vmatpush3.bf16.msra.mxu0 %v6282_v31  ;;  %v5269_v17 = vpack.c.bf16 %v2566_v57, %v2565_v54  ;;  %v1075_v19 = vand.u32 2147483647, %v1043_v27  ;;  %v1048_v53 = vadd.f32 %v5098_v41, %v6279_v24  ;;  %v1076_v46 = vand.u32 2147483647, %v1044_v4  ;;  %v6292_v40 = vld [vmem:[#allocation89_spill] sm:$0xff] }
 0x1b0   :  { %6278 = vst [vmem:[#allocation67_spill] sm:$0xff] %v5260_v20  ;;  %3944 = vmatprep.subr.bf16.mxu0 %v6284_v8  ;;  %v1077_v20 = vand.u32 2147483647, %v1045_v16  ;;  %v1078_v55 = vand.u32 2147483647, %v1046_v10  ;;  %v1049_v44 = vadd.f32 %v6280_v45, %v5151_v47  ;;  %v6285_v31 = vpack.c.bf16 %v6235_v38, %v6233_v18  ;;  %v6289_v10 = vld [vmem:[#allocation84_spill] sm:$0xff] }
 0x1b1   :  { %6283 = vst [vmem:[#allocation46_spill] sm:$0xff] %v5269_v17  ;;  %v1079_v54 = vand.u32 2147483647, %v1047_v42  ;;  %v1080_v57 = vand.u32 2147483647, %v1048_v53  ;;  %v1050_v43 = vadd.f32 %v5138_v62, %v6281_v63  ;;  %v1636_v27 = vadd.f32 %v4756_v59, %v6231_v39 }
 0x1b2   :  { %3794 = vmatpush3.bf16.msra.mxu1 %v6285_v31  ;;  %v6286_v24 = vpack.c.bf16 %v5024_v60, %v5030_v13  ;;  %v5288_v4 = vpack.c.bf16 %v1076_v46, %v1075_v19  ;;  %v5290_v16 = vpack.c.bf16 %v1078_v55, %v1077_v20  ;;  %v1081_v45 = vand.u32 2147483647, %v1049_v44  ;;  %v6290_v31 = vld [vmem:[#allocation63_spill] sm:$0xff]  ;;  %v6293_v46 = vld [vmem:[#allocation48_spill] sm:$0xff] }
 0x1b3   :  { %v1667_v8 = vand.u32 2147483647, %v6289_v10  ;;  %3946 = vmatpush3.bf16.msra.mxu0 %v6290_v31  ;;  %v5294_v42 = vpack.c.bf16 %v1080_v57, %v1079_v54  ;;  %v1082_v53 = vand.u32 2147483647, %v1050_v43  ;;  %v1668_v63 = vand.u32 2147483647, %v1636_v27 }
 0x1b4   :  { %3796 = vmatprep.subr.bf16.mxu1 %v6286_v24  ;;  %6287 = vst [vmem:[#allocation20_spill] sm:$0xff] %v5288_v4  ;;  %6288 = vst [vmem:[#allocation79_spill] sm:$0xff] %v5290_v16  ;;  %v1637_v17 = vadd.f32 %v6238_v21, %v4791_v0  ;;  %3948 = vmatprep.subr.bf16.mxu0 %v6292_v40  ;;  %v1638_v19 = vadd.f32 %v4785_v35, %v6237_v12  ;;  %v6294_v55 = vand.u32 2147483647, %v6293_v46  ;;  %v6295_v20 = vld [vmem:[#allocation43_spill] sm:$0xff] }
 0x1b5   :  { %6291 = vst [vmem:[#allocation82_spill] sm:$0xff] %v5294_v42  ;;  %v6296_v44 = vand.u32 2147483647, %v6295_v20  ;;  %v1639_v54 = vadd.f32 %v4575_v34, %v4884_v15  ;;  %v1640_v57 = vadd.f32 %v4869_v3, %v6231_v39  ;;  %v6298_v43 = vpack.c.bf16 %v6248_v7, %v6244_v1  ;;  %v6302_v42 = vld [vmem:[#allocation68_spill] sm:$0xff] }
 0x1b6   :  { %v5314_v40 = vpack.c.bf16 %v1082_v53, %v1081_v45  ;;  %v5316_v27 = vpack.c.bf16 %v1668_v63, %v1667_v8  ;;  %v1669_v10 = vand.u32 2147483647, %v1637_v17  ;;  %v1641_v31 = vadd.f32 %v6238_v21, %v4919_v61  ;;  %v6303_v53 = vld [vmem:[#allocation44_spill] sm:$0xff] }
 0x1b7   :  { %v5305_v24 = vpack.c.bf16 %v6296_v44, %v6294_v55  ;;  %3798 = vmatpush3.bf16.msra.mxu1 %v6298_v43  ;;  %v6301_v46 = vpack.c.bf16 %v5098_v41, %v5110_v6  ;;  %v1670_v55 = vand.u32 2147483647, %v1638_v19  ;;  %v1671_v20 = vand.u32 2147483647, %v1639_v54  ;;  %3950 = vmatpush3.bf16.msra.mxu0 %v6302_v42  ;;  %v6304_v43 = vld [vmem:[#allocation11_spill] sm:$0xff] }
 0x1b8   :  { %6299 = vst [vmem:[#allocation62_spill] sm:$0xff] %v5314_v40  ;;  %6300 = vst [vmem:[#allocation83_spill] sm:$0xff] %v5316_v27  ;;  %v1672_v44 = vand.u32 2147483647, %v1640_v57  ;;  %v1673_v45 = vand.u32 2147483647, %v1641_v31  ;;  %v1643_v17 = vadd.f32 %v4575_v34, %v5005_v58  ;;  %v1644_v63 = vadd.f32 %v4995_v28, %v6231_v39  ;;  %3952 = vmatprep.subr.bf16.mxu0 %v6304_v43 }
 0x1b9   :  { %6297 = vst [vmem:[#allocation55_spill] sm:$0xff] %v5305_v24  ;;  %3800 = vmatprep.subr.bf16.mxu1 %v6301_v46  ;;  %v1642_v24 = vadd.f32 %v4909_v23, %v6237_v12  ;;  %v1658_v8 = vand.u32 2147483647, %v6303_v53  ;;  %v5332_v46 = vpack.c.bf16 %v1670_v55, %v1669_v10  ;;  %v6305_v57 = vld [vmem:[#allocation42_spill] sm:$0xff]  ;;  %v6306_v42 = vpack.c.bf16 %v6257_v52, %v6254_v2  ;;  %v6307_v31 = vld [vmem:[#allocation51_spill] sm:$0xff] }
 0x1ba   :  { %v5334_v19 = vpack.c.bf16 %v1672_v44, %v1671_v20  ;;  %v1660_v27 = vand.u32 2147483647, %v6305_v57  ;;  %v6308_v53 = vand.u32 2147483647, %v6307_v31  ;;  %v1675_v16 = vand.u32 2147483647, %v1643_v17 }
 0x1bb   :  { %v1674_v54 = vand.u32 2147483647, %v1642_v24  ;;  %3802 = vmatpush3.bf16.msra.mxu1 %v6306_v42  ;;  %v1676_v4 = vand.u32 2147483647, %v1644_v63  ;;  %v1645_v43 = vadd.f32 %v6238_v21, %v5030_v13  ;;  %v6310_v10 = vpack.c.bf16 %v5138_v62, %v5151_v47  ;;  %v6312_v55 = vld [vmem:[#allocation38_spill] sm:$0xff]  ;;  %v6316_v17 = vld [vmem:[#allocation65_spill] sm:$0xff] }
 0x1bc   :  { %v5342_v40 = vpack.c.bf16 %v1658_v8, %v6308_v53  ;;  %v6313_v20 = vand.u32 2147483647, %v6312_v55  ;;  %v1646_v57 = vadd.f32 %v5024_v60, %v6237_v12  ;;  %v6315_v8 = vld [vmem:[#allocation53_spill] sm:$0xff]  ;;  %3954 = vmatpush3.bf16.msra.mxu0 %v6316_v17  ;;  %v6320_v55 = vld [vmem:[#allocation54_spill] sm:$0xff]  ;;  %v6324_v17 = vld [vmem:[#allocation72_spill] sm:$0xff] }
 0x1bd   :  { %3804 = vmatprep.subr.bf16.mxu1 %v6310_v10  ;;  %v5349_v24 = vpack.c.bf16 %v1674_v54, %v1673_v45  ;;  %v1661_v42 = vand.u32 2147483647, %v6315_v8  ;;  %v5359_v63 = vpack.c.bf16 %v1676_v4, %v1675_v16  ;;  %v1677_v31 = vand.u32 2147483647, %v1645_v43  ;;  %v6318_v53 = vld [vmem:[#allocation45_spill] sm:$0xff] }
 0x1be   :  { %6309 = vst [vmem:[#allocation52_spill] sm:$0xff] %v5342_v40  ;;  %v5353_v44 = vpack.c.bf16 %v1660_v27, %v6313_v20  ;;  %v1662_v40 = vand.u32 2147483647, %v6318_v53  ;;  %v1647_v45 = vadd.f32 %v4575_v34, %v5110_v6  ;;  %v6319_v54 = vld [vmem:[#allocation97_spill] sm:$0xff]  ;;  %v1678_v10 = vand.u32 2147483647, %v1646_v57 }
 0x1bf   :  { %6311 = vst [vmem:[#allocation71_spill] sm:$0xff] %v5349_v24  ;;  %6317 = vst [vmem:[#allocation88_spill] sm:$0xff] %v5359_v63  ;;  %3956 = vmatprep.subr.bf16.mxu0 %v6319_v54  ;;  %v1648_v27 = vadd.f32 %v5098_v41, %v6231_v39  ;;  %v1663_v20 = vand.u32 2147483647, %v6320_v55  ;;  %v6322_v4 = vpack.c.bf16 %v6268_v11, %v6265_v29  ;;  %v6327_v55 = vld [vmem:[#allocation73_spill] sm:$0xff] }
 0x1c0   :  { %6314 = vst [vmem:[#allocation87_spill] sm:$0xff] %v5353_v44  ;;  %v6321_v44 = vld [vmem:[#allocation59_spill] sm:$0xff]  ;;  %v5372_v16 = vpack.c.bf16 %v1662_v40, %v1661_v42  ;;  %v1679_v43 = vand.u32 2147483647, %v1647_v45  ;;  %v1649_v34 = vadd.f32 %v6238_v21, %v5151_v47  ;;  %v1650_v57 = vadd.f32 %v5138_v62, %v6237_v12  ;;  %3958 = vmatpush3.bf16.msra.mxu0 %v6327_v55  ;;  %v6328_v45 = vld [vmem:[#allocation60_spill] sm:$0xff] }
 0x1c1   :  { %v1664_v8 = vand.u32 2147483647, %v6321_v44  ;;  %3806 = vmatpush3.bf16.msra.mxu1 %v6322_v4  ;;  %v5379_v39 = vpack.c.bf16 %v1678_v10, %v1677_v31  ;;  %v1680_v53 = vand.u32 2147483647, %v1648_v27  ;;  %v1634_v44 = vadd.f32 %v6268_v11, %v6237_v12  ;;  %v6329_v21 = vld [vmem:[#allocation64_spill] sm:$0xff]  ;;  %3960 = vmatprep.subr.bf16.mxu0 %v5162_v22  ;;  %v6332_v27 = vld [vmem:[#allocation69_spill] sm:$0xff] }
 0x1c2   :  { %6323 = vst [vmem:[#allocation14_spill] sm:$0xff] %v5372_v16  ;;  %3808 = vmatprep.subr.bf16.mxu1 %v6324_v17  ;;  %v1681_v40 = vand.u32 2147483647, %v1649_v34  ;;  %v1682_v42 = vand.u32 2147483647, %v1650_v57  ;;  %v6330_v16 = vld [vmem:[#allocation70_spill] sm:$0xff]  ;;  %v2220_v17 = vadd.f32 %v4393_v48, %v6332_v27 }
 0x1c3   :  { %6325 = vst [vmem:[#allocation13_spill] sm:$0xff] %v5379_v39  ;;  %v5381_v54 = vpack.c.bf16 %v1664_v8, %v1663_v20  ;;  %v1665_v4 = vand.u32 2147483647, %v6328_v45  ;;  %v2235_v63 = vadd.f32 %v6330_v16, %v6329_v21  ;;  %v5391_v31 = vpack.c.bf16 %v1680_v53, %v1679_v43  ;;  %v6333_v8 = vld [vmem:[#allocation12_spill] sm:$0xff]  ;;  %v6336_v53 = vld [vmem:[#allocation75_spill] sm:$0xff]  ;;  %v6343_v39 = vld [vmem:[#allocation86_spill] sm:$0xff] }
 0x1c4   :  { %707 = vmatmul.mubr.f32.vlgmr.msra.gmra.mrb[2].mxu1 %v5123_v37  ;;  %v1666_v10 = vand.u32 2147483647, %v1634_v44  ;;  %v2236_v20 = vadd.f32 %v4756_v59, %v6332_v27  ;;  %v2219_v12 = vadd.f32 %v6330_v16, %v4395_v49  ;;  %v5399_v34 = vpack.c.bf16 %v1682_v42, %v1681_v40  ;;  %v6335_v22 = vld [vmem:[#allocation76_spill] sm:$0xff] }
 0x1c5   :  { %6326 = vst [vmem:[#allocation17_spill] sm:$0xff] %v5381_v54  ;;  %6331 = vst [vmem:[#allocation16_spill] sm:$0xff] %v5391_v31  ;;  %3810 = vmatpush3.bf16.msra.mxu1 %v6333_v8  ;;  %848 = vmatprep.mubr.f32.mxu1 %v5170_v5  ;;  %v2267_v57 = vand.u32 2147483647, %v2235_v63  ;;  %v2237_v43 = vadd.f32 %v6335_v22, %v4791_v0  ;;  %v6338_v54 = vld [vmem:[#allocation74_spill] sm:$0xff]  ;;  %v6339_v31 = vld [vmem:[#allocation77_spill] sm:$0xff]  ;;  %v2221_v63 = vadd.f32 %v6335_v22, %v6214_v25 }
 0x1c6   :  { %6334 = vst [vmem:[#allocation66_spill] sm:$0xff] %v5399_v34  ;;  %3812 = vmatprep.subr.bf16.mxu1 %v6336_v53  ;;  %v5406_v44 = vpack.c.bf16 %v1666_v10, %v1665_v4  ;;  %v2268_v55 = vand.u32 2147483647, %v2236_v20  ;;  %v2251_v45 = vand.u32 2147483647, %v2219_v12  ;;  %v2238_v8 = vadd.f32 %v4785_v35, %v6338_v54  ;;  %3962 = vmatpush3.bf16.msra.mxu0 %v6339_v31  ;;  %v6341_v31 = vld [vmem:[#allocation15_spill] sm:$0xff] }
 0x1c7   :  { %v2252_v40 = vand.u32 2147483647, %v2220_v17  ;;  %v2269_v42 = vand.u32 2147483647, %v2237_v43  ;;  %v2222_v34 = vadd.f32 %v4409_v56, %v6338_v54  ;;  %3964 = vmatprep.subr.bf16.mxu0 %v5193_v51  ;;  %v2239_v10 = vadd.f32 %v6330_v16, %v4884_v15 }
 0x1c8   :  { %6337 = vst [vmem:[#allocation85_spill] sm:$0xff] %v5406_v44  ;;  %v5416_v53 = vpack.c.bf16 %v2268_v55, %v2267_v57  ;;  %v2270_v4 = vand.u32 2147483647, %v2238_v8  ;;  %v2240_v20 = vadd.f32 %v4869_v3, %v6332_v27  ;;  %v2253_v17 = vand.u32 2147483647, %v2221_v63  ;;  %v6347_v63 = vld [vmem:[#allocation91_spill] sm:$0xff] }
 0x1c9   :  { %3814 = vmatpush3.bf16.msra.mxu1 %v6341_v31  ;;  %v5423_v12 = vpack.c.bf16 %v2252_v40, %v2251_v45  ;;  %v2254_v43 = vand.u32 2147483647, %v2222_v34  ;;  %v2223_v44 = vadd.f32 %v6330_v16, %v6258_v14  ;;  %v2271_v57 = vand.u32 2147483647, %v2239_v10  ;;  %v6349_v10 = vld [vmem:[#allocation24_spill] sm:$0xff] }
 0x1ca   :  { %6340 = vst [vmem:[#allocation84_spill] sm:$0xff] %v5416_v53  ;;  %3816 = vmatprep.subr.bf16.mxu1 %v6343_v39  ;;  %v5428_v51 = vpack.c.bf16 %v2270_v4, %v2269_v42  ;;  %v2272_v55 = vand.u32 2147483647, %v2240_v20  ;;  %v2224_v8 = vadd.f32 %v6220_v9, %v6332_v27  ;;  %v6345_v53 = vld [vmem:[#allocation81_spill] sm:$0xff]  ;;  %v2241_v34 = vadd.f32 %v6335_v22, %v4919_v61 }
 0x1cb   :  { %6342 = vst [vmem:[#allocation63_spill] sm:$0xff] %v5423_v12  ;;  %3966 = vmatpush3.bf16.msra.mxu0 %v6345_v53  ;;  %v5433_v24 = vpack.c.bf16 %v2254_v43, %v2253_v17  ;;  %v2255_v45 = vand.u32 2147483647, %v2223_v44  ;;  %v2242_v40 = vadd.f32 %v4909_v23, %v6338_v54  ;;  %v2225_v4 = vadd.f32 %v6335_v22, %v6224_v36  ;;  %v6350_v43 = vld [vmem:[#allocation90_spill] sm:$0xff] }
 0x1cc   :  { %6344 = vst [vmem:[#allocation89_spill] sm:$0xff] %v5428_v51  ;;  %4000 = vmatprep.subr.bf16.mxu0 %v6347_v63  ;;  %v5440_v39 = vpack.c.bf16 %v2272_v55, %v2271_v57  ;;  %v2256_v42 = vand.u32 2147483647, %v2224_v8  ;;  %v2226_v53 = vadd.f32 %v6229_v26, %v6338_v54  ;;  %v2273_v44 = vand.u32 2147483647, %v2241_v34  ;;  %v6361_v51 = vld [vmem:[#allocation33_spill] sm:$0xff] }
 0x1cd   :  { %6346 = vst [vmem:[#allocation48_spill] sm:$0xff] %v5433_v24  ;;  %3818 = vmatpush3.bf16.msra.mxu1 %v6349_v10  ;;  %v2274_v20 = vand.u32 2147483647, %v2242_v40  ;;  %v2243_v31 = vadd.f32 %v6330_v16, %v5005_v58  ;;  %v2244_v17 = vadd.f32 %v4995_v28, %v6332_v27  ;;  %v2257_v55 = vand.u32 2147483647, %v2225_v4  ;;  %v6352_v10 = vld [vmem:[#allocation92_spill] sm:$0xff] }
 0x1ce   :  { %6348 = vst [vmem:[#allocation43_spill] sm:$0xff] %v5440_v39  ;;  %3820 = vmatprep.subr.bf16.mxu1 %v6350_v43  ;;  %2048 = vmatmul.mubr.f32.vlgmr.msra.gmra.mrb[66].mxu0 %v5123_v37  ;;  %v5453_v57 = vpack.c.bf16 %v2256_v42, %v2255_v45  ;;  %v2258_v8 = vand.u32 2147483647, %v2226_v53  ;;  %v2227_v63 = vadd.f32 %v6330_v16, %v6233_v18  ;;  %v6354_v24 = vld [vmem:[#allocation93_spill] sm:$0xff] }
 0x1cf   :  { %4002 = vmatpush3.bf16.msra.mxu0 %v6352_v10  ;;  %2647 = vmatprep.mubr.f32.mxu0 %v5170_v5  ;;  %v5459_v34 = vpack.c.bf16 %v2274_v20, %v2273_v44  ;;  %v2275_v40 = vand.u32 2147483647, %v2243_v31  ;;  %v2276_v39 = vand.u32 2147483647, %v2244_v17  ;;  %v2228_v43 = vadd.f32 %v6235_v38, %v6332_v27  ;;  %v6356_v10 = vld [vmem:[#allocation26_spill] sm:$0xff] }
 0x1d0   :  { %6351 = vst [vmem:[#allocation68_spill] sm:$0xff] %v5453_v57  ;;  %4004 = vmatprep.subr.bf16.mxu0 %v6354_v24  ;;  %v5464_v45 = vpack.c.bf16 %v2258_v8, %v2257_v55  ;;  %v2259_v42 = vand.u32 2147483647, %v2227_v63  ;;  %v2245_v4 = vadd.f32 %v6335_v22, %v5030_v13  ;;  %v2246_v53 = vadd.f32 %v5024_v60, %v6338_v54  ;;  %v6358_v17 = vld [vmem:[#allocation94_spill] sm:$0xff] }
 0x1d1   :  { %6353 = vst [vmem:[#allocation44_spill] sm:$0xff] %v5459_v34  ;;  %3822 = vmatpush3.bf16.msra.mxu1 %v6356_v10  ;;  %v5471_v44 = vpack.c.bf16 %v2276_v39, %v2275_v40  ;;  %v2260_v20 = vand.u32 2147483647, %v2228_v43  ;;  %v2229_v31 = vadd.f32 %v6335_v22, %v6244_v1  ;;  %v2230_v24 = vadd.f32 %v6248_v7, %v6338_v54  ;;  %v6359_v10 = vld [vmem:[#allocation18_spill] sm:$0xff]  ;;  %v6360_v34 = vld [vmem:[#allocation95_spill] sm:$0xff] }
 0x1d2   :  { %6355 = vst [vmem:[#allocation11_spill] sm:$0xff] %v5464_v45  ;;  %3824 = vmatprep.subr.bf16.mxu1 %v6358_v17  ;;  %v2277_v55 = vand.u32 2147483647, %v2245_v4  ;;  %v2278_v8 = vand.u32 2147483647, %v2246_v53  ;;  %v2247_v63 = vadd.f32 %v6330_v16, %v5110_v6  ;;  %v2248_v45 = vadd.f32 %v5098_v41, %v6332_v27 }
 0x1d3   :  { %6357 = vst [vmem:[#allocation42_spill] sm:$0xff] %v5471_v44  ;;  %4006 = vmatpush3.bf16.msra.mxu0 %v6359_v10  ;;  %v5483_v39 = vpack.c.bf16 %v2260_v20, %v2259_v42  ;;  %v2261_v40 = vand.u32 2147483647, %v2229_v31  ;;  %v2262_v43 = vand.u32 2147483647, %v2230_v24  ;;  %v2231_v44 = vadd.f32 %v6330_v16, %v6254_v2  ;;  %v6362_v31 = vld [vmem:[#allocation35_spill] sm:$0xff] }
 0x1d4   :  { %4008 = vmatprep.subr.bf16.mxu0 %v6360_v34  ;;  %v5488_v17 = vpack.c.bf16 %v2278_v8, %v2277_v55  ;;  %v2279_v4 = vand.u32 2147483647, %v2247_v63  ;;  %v2280_v53 = vand.u32 2147483647, %v2248_v45  ;;  %v2232_v57 = vadd.f32 %v6257_v52, %v6332_v27  ;;  %v6364_v8 = vld [vmem:[#allocation32_spill] sm:$0xff] }
 0x1d5   :  { %3826 = vmatpush3.bf16.msra.mxu1 %v6361_v51  ;;  %v5493_v12 = vpack.c.bf16 %v2262_v43, %v2261_v40  ;;  %v2263_v42 = vand.u32 2147483647, %v2231_v44  ;;  %v2249_v20 = vadd.f32 %v6335_v22, %v5151_v47  ;;  %v2250_v16 = vadd.f32 %v5138_v62, %v6338_v54  ;;  %v6363_v51 = vld [vmem:[#allocation98_spill] sm:$0xff]  ;;  %v6365_v10 = vld [vmem:[#allocation96_spill] sm:$0xff] }
 0x1d6   :  { %3828 = vmatprep.subr.bf16.mxu1 %v6362_v31  ;;  %v5500_v34 = vpack.c.bf16 %v2280_v53, %v2279_v4  ;;  %v2264_v24 = vand.u32 2147483647, %v2232_v57  ;;  %v2233_v45 = vadd.f32 %v6335_v22, %v6265_v29  ;;  %v2234_v27 = vadd.f32 %v6268_v11, %v6338_v54  ;;  %v6366_v43 = vld [vmem:[#allocation34_spill] sm:$0xff]  ;;  %v6367_v54 = vld [vmem:[#allocation36_spill] sm:$0xff] }
 0x1d7   :  { %4010 = vmatpush3.bf16.msra.mxu0 %v6363_v51  ;;  %v2281_v44 = vand.u32 2147483647, %v2249_v20  ;;  %v2282_v55 = vand.u32 2147483647, %v2250_v16  ;;  %v2835_v63 = vadd.f32 %v6364_v8, %v6329_v21  ;;  %v2836_v40 = vadd.f32 %v4756_v59, %v6365_v10  ;;  %v6370_v51 = vld [vmem:[#allocation29_spill] sm:$0xff] }
 0x1d8   :  { %4012 = vmatprep.subr.bf16.mxu0 %v6366_v43  ;;  %v5512_v4 = vpack.c.bf16 %v2264_v24, %v2263_v42  ;;  %v2265_v57 = vand.u32 2147483647, %v2233_v45  ;;  %v2266_v53 = vand.u32 2147483647, %v2234_v27  ;;  %v2819_v22 = vadd.f32 %v6364_v8, %v4395_v49  ;;  %v6368_v24 = vld [vmem:[#allocation21_spill] sm:$0xff]  ;;  %v6369_v27 = vld [vmem:[#allocation23_spill] sm:$0xff] }
 0x1d9   :  { %3830 = vmatpush3.bf16.msra.mxu1 %v6367_v54  ;;  %v5517_v31 = vpack.c.bf16 %v2282_v55, %v2281_v44  ;;  %v2867_v20 = vand.u32 2147483647, %v2835_v63  ;;  %v2868_v16 = vand.u32 2147483647, %v2836_v40  ;;  %v2820_v21 = vadd.f32 %v4393_v48, %v6365_v10  ;;  %v6371_v43 = vld [vmem:[#allocation57_spill] sm:$0xff] }
 0x1da   :  { %3832 = vmatprep.subr.bf16.mxu1 %v5175_v50  ;;  %v5522_v59 = vpack.c.bf16 %v2266_v53, %v2265_v57  ;;  %v2851_v42 = vand.u32 2147483647, %v2819_v22  ;;  %v2837_v45 = vadd.f32 %v6368_v24, %v4791_v0  ;;  %v2838_v49 = vadd.f32 %v4785_v35, %v6369_v27 }
 0x1db   :  { %4014 = vmatpush3.bf16.msra.mxu0 %v6370_v51  ;;  %v5529_v44 = vpack.c.bf16 %v2868_v16, %v2867_v20  ;;  %v2852_v55 = vand.u32 2147483647, %v2820_v21  ;;  %v2821_v63 = vadd.f32 %v6368_v24, %v6214_v25  ;;  %v2822_v48 = vadd.f32 %v4409_v56, %v6369_v27  ;;  %v6372_v20 = vld [vmem:[#allocation39_spill] sm:$0xff]  ;;  %v6374_v51 = vld [vmem:[#allocation78_spill] sm:$0xff] }
 0x1dc   :  { %4016 = vmatprep.subr.bf16.mxu0 %v5188_v33  ;;  %v2869_v50 = vand.u32 2147483647, %v2837_v45  ;;  %v2870_v40 = vand.u32 2147483647, %v2838_v49  ;;  %v2839_v0 = vadd.f32 %v6364_v8, %v4884_v15  ;;  %v2840_v35 = vadd.f32 %v4869_v3, %v6365_v10 }
 0x1dd   :  { %3834 = vmatpush3.bf16.msra.mxu1 %v6371_v43  ;;  %v5541_v57 = vpack.c.bf16 %v2852_v55, %v2851_v42  ;;  %v2853_v53 = vand.u32 2147483647, %v2821_v63  ;;  %v2854_v22 = vand.u32 2147483647, %v2822_v48  ;;  %v2823_v25 = vadd.f32 %v6364_v8, %v6258_v14  ;;  %v6373_v42 = vld [vmem:[#allocation41_spill] sm:$0xff]  ;;  %v6375_v48 = vld [vmem:[#allocation28_spill] sm:$0xff] }
 0x1de   :  { %3836 = vmatprep.subr.bf16.mxu1 %v5201_v32  ;;  %v5546_v56 = vpack.c.bf16 %v2870_v40, %v2869_v50  ;;  %v2871_v33 = vand.u32 2147483647, %v2839_v0  ;;  %v2872_v54 = vand.u32 2147483647, %v2840_v35  ;;  %v2824_v15 = vadd.f32 %v6220_v9, %v6365_v10 }
 0x1df   :  { %4018 = vmatpush3.bf16.msra.mxu0 %v6372_v20  ;;  %v5551_v3 = vpack.c.bf16 %v2854_v22, %v2853_v53  ;;  %v2855_v16 = vand.u32 2147483647, %v2823_v25  ;;  %v2841_v21 = vadd.f32 %v6368_v24, %v4919_v61  ;;  %v2842_v14 = vadd.f32 %v4909_v23, %v6369_v27  ;;  %v6378_v20 = vld [vmem:[#allocation56_spill] sm:$0xff] }
 0x1e0   :  { %4020 = vmatprep.subr.bf16.mxu0 %v6373_v42  ;;  %v5558_v32 = vpack.c.bf16 %v2872_v54, %v2871_v33  ;;  %v2856_v45 = vand.u32 2147483647, %v2824_v15  ;;  %v2825_v49 = vadd.f32 %v6368_v24, %v6224_v36  ;;  %v2826_v9 = vadd.f32 %v6229_v26, %v6369_v27  ;;  %v6376_v26 = vld [vmem:[#allocation31_spill] sm:$0xff] }
 0x1e1   :  { %3838 = vmatpush3.bf16.msra.mxu1 %v6374_v51  ;;  %v2873_v55 = vand.u32 2147483647, %v2841_v21  ;;  %v2874_v63 = vand.u32 2147483647, %v2842_v14  ;;  %v2843_v61 = vadd.f32 %v6364_v8, %v5005_v58  ;;  %v2844_v23 = vadd.f32 %v4995_v28, %v6365_v10  ;;  %v6377_v33 = vld [vmem:[#allocation19_spill] sm:$0xff]  ;;  %v6379_v14 = vld [vmem:[#allocation30_spill] sm:$0xff] }
 0x1e2   :  { %3840 = vmatprep.subr.bf16.mxu1 %v6375_v48  ;;  %v5570_v50 = vpack.c.bf16 %v2856_v45, %v2855_v16  ;;  %v2857_v40 = vand.u32 2147483647, %v2825_v49  ;;  %v2858_v0 = vand.u32 2147483647, %v2826_v9  ;;  %v2827_v36 = vadd.f32 %v6364_v8, %v6233_v18 }
 0x1e3   :  { %4022 = vmatpush3.bf16.msra.mxu0 %v6376_v26  ;;  %v5575_v35 = vpack.c.bf16 %v2874_v63, %v2873_v55  ;;  %v2875_v43 = vand.u32 2147483647, %v2843_v61  ;;  %v2876_v53 = vand.u32 2147483647, %v2844_v23  ;;  %v2828_v58 = vadd.f32 %v6235_v38, %v6365_v10  ;;  %v6381_v63 = vld [vmem:[#allocation22_spill] sm:$0xff] }
 0x1e4   :  { %849 = vmatmul.mubr.f32.vlgmr.msra.gmra.mrb[4].mxu1 %v5123_v37  ;;  %4024 = vmatprep.subr.bf16.mxu0 %v5238_v30  ;;  %v5581_v28 = vpack.c.bf16 %v2858_v0, %v2857_v40  ;;  %v2859_v22 = vand.u32 2147483647, %v2827_v36  ;;  %v2845_v25 = vadd.f32 %v6368_v24, %v5030_v13  ;;  %v2846_v18 = vadd.f32 %v5024_v60, %v6369_v27 }
 0x1e5   :  { %3842 = vmatpush3.bf16.msra.mxu1 %v6377_v33  ;;  %1147 = vmatprep.mubr.f32.mxu1 %v5170_v5  ;;  %v5589_v54 = vpack.c.bf16 %v2876_v53, %v2875_v43  ;;  %v2860_v38 = vand.u32 2147483647, %v2828_v58  ;;  %v2829_v15 = vadd.f32 %v6368_v24, %v6244_v1  ;;  %v2830_v30 = vadd.f32 %v6248_v7, %v6369_v27  ;;  %v6380_v7 = vld [vmem:[#allocation61_spill] sm:$0xff]  ;;  %v6391_v33 = vld [vmem:[#allocation82_spill] sm:$0xff] }
 0x1e6   :  { %3844 = vmatprep.subr.bf16.mxu1 %v6378_v20  ;;  %v2877_v16 = vand.u32 2147483647, %v2845_v25  ;;  %v2878_v13 = vand.u32 2147483647, %v2846_v18  ;;  %v2847_v60 = vadd.f32 %v6364_v8, %v5110_v6  ;;  %v2848_v21 = vadd.f32 %v5098_v41, %v6365_v10  ;;  %v6389_v25 = vld [vmem:[#allocation79_spill] sm:$0xff]  ;;  %v6390_v18 = vld [vmem:[#allocation40_spill] sm:$0xff] }
 0x1e7   :  { %4026 = vmatpush3.bf16.msra.mxu0 %v6379_v14  ;;  %v5601_v42 = vpack.c.bf16 %v2860_v38, %v2859_v22  ;;  %v2861_v45 = vand.u32 2147483647, %v2829_v15  ;;  %v2862_v49 = vand.u32 2147483647, %v2830_v30  ;;  %v2831_v1 = vadd.f32 %v6364_v8, %v6254_v2  ;;  %v6382_v8 = vld [vmem:[#allocation50_spill] sm:$0xff]  ;;  %v6385_v22 = vld [vmem:[#allocation67_spill] sm:$0xff] }
 0x1e8   :  { %4028 = vmatprep.subr.bf16.mxu0 %v6380_v7  ;;  %v5606_v9 = vpack.c.bf16 %v2878_v13, %v2877_v16  ;;  %v2879_v51 = vand.u32 2147483647, %v2847_v60  ;;  %v2880_v55 = vand.u32 2147483647, %v2848_v21  ;;  %v2832_v6 = vadd.f32 %v6257_v52, %v6365_v10  ;;  %v6383_v10 = vld [vmem:[#allocation46_spill] sm:$0xff]  ;;  %v6394_v30 = vld [vmem:[#allocation80_spill] sm:$0xff] }
 0x1e9   :  { %3846 = vmatpush3.bf16.msra.mxu1 %v6381_v63  ;;  %v5611_v41 = vpack.c.bf16 %v2862_v49, %v2861_v45  ;;  %v2863_v61 = vand.u32 2147483647, %v2831_v1  ;;  %v2849_v23 = vadd.f32 %v6368_v24, %v5151_v47  ;;  %v2850_v2 = vadd.f32 %v5138_v62, %v6369_v27  ;;  %v6384_v62 = vld [vmem:[#allocation25_spill] sm:$0xff]  ;;  %v6392_v38 = vld [vmem:[#allocation58_spill] sm:$0xff]  ;;  %v6395_v20 = vld [vmem:[#allocation83_spill] sm:$0xff] }
 0x1ea   :  { %3848 = vmatprep.subr.bf16.mxu1 %v6382_v8  ;;  %v5618_v48 = vpack.c.bf16 %v2880_v55, %v2879_v51  ;;  %v2864_v40 = vand.u32 2147483647, %v2832_v6  ;;  %v2833_v0 = vadd.f32 %v6368_v24, %v6265_v29  ;;  %v2834_v52 = vadd.f32 %v6268_v11, %v6369_v27  ;;  %v6386_v24 = vld [vmem:[#allocation27_spill] sm:$0xff]  ;;  %v6387_v11 = vld [vmem:[#allocation20_spill] sm:$0xff]  ;;  %v6388_v27 = vld [vmem:[#allocation37_spill] sm:$0xff] }
 0x1eb   :  { %4030 = vmatpush3.bf16.msra.mxu0 %v6383_v10  ;;  %v2881_v36 = vand.u32 2147483647, %v2849_v23  ;;  %v2882_v26 = vand.u32 2147483647, %v2850_v2  ;;  %v6393_v15 = vld [vmem:[#allocation62_spill] sm:$0xff]  ;;  %v6396_v16 = vld [vmem:[#allocation47_spill] sm:$0xff] }
 0x1ec   :  { %v5625_v43 = vpack.c.bf16 %v2864_v40, %v2863_v61  ;;  %v2865_v47 = vand.u32 2147483647, %v2833_v0  ;;  %v2866_v53 = vand.u32 2147483647, %v2834_v52  ;;  %v6397_v13 = vld [vmem:[#allocation55_spill] sm:$0xff]  ;;  %v6398_v60 = vld [vmem:[#allocation49_spill] sm:$0xff] }
 0x1ed   :  { %3850 = vmatpush3.bf16.msra.mxu1 %v6384_v62  ;;  %v5628_v58 = vpack.c.bf16 %v2882_v26, %v2881_v36  ;;  %v6399_v21 = vld [vmem:[#allocation71_spill] sm:$0xff]  ;;  %v6400_v14 = vld [vmem:[#allocation52_spill] sm:$0xff]  ;;  %v6403_v1 = vld [vmem:[#allocation13_spill] sm:$0xff] }
 0x1ee   :  { %3852 = vmatprep.subr.bf16.mxu1 %v6385_v22  ;;  %2648 = vmatmul.mubr.f32.vlgmr.msra.gmra.mrb[68].mxu0 %v5123_v37  ;;  %v4061_v29 = vpack.c.bf16 %v2866_v53, %v2865_v47  ;;  %v6401_v45 = vld [vmem:[#allocation88_spill] sm:$0xff]  ;;  %v6402_v49 = vld [vmem:[#allocation87_spill] sm:$0xff]  ;;  %v6404_v7 = vld [vmem:[#allocation14_spill] sm:$0xff]  ;;  %v865_v53 = vpop.permute.xlu0 %864 }
 0x1ef   :  { %v6405_v51 = vld [vmem:[#allocation16_spill] sm:$0xff]  ;;  %v6407_v55 = vld [vmem:[#allocation66_spill] sm:$0xff]  ;;  %v6410_v63 = vld [vmem:[#allocation63_spill] sm:$0xff] }
 0x1f0   :  { %v6409_v6 = vld [vmem:[#allocation84_spill] sm:$0xff]  ;;  %v6411_v61 = vld [vmem:[#allocation89_spill] sm:$0xff]  ;;  %v6413_v2 = vld [vmem:[#allocation43_spill] sm:$0xff] }
 0x1f1   :  { %3854 = vmatpush3.bf16.msra.mxu1 %v6386_v24  ;;  %v6412_v23 = vld [vmem:[#allocation48_spill] sm:$0xff]  ;;  %v6416_v0 = vld [vmem:[#allocation11_spill] sm:$0xff]  ;;  %v6417_v52 = vld [vmem:[#allocation42_spill] sm:$0xff] }
 0x1f2   :  { %3856 = vmatprep.subr.bf16.mxu1 %v6387_v11  ;;  %v6414_v8 = vld [vmem:[#allocation68_spill] sm:$0xff] }
 0x1f3   :  { %v6415_v40 = vld [vmem:[#allocation44_spill] sm:$0xff] }
 0x1f5   :  { %3858 = vmatpush3.bf16.msra.mxu1 %v6388_v27 }
 0x1f6   :  { %3860 = vmatprep.subr.bf16.mxu1 %v6389_v25 }
 0x1f9   :  { %3862 = vmatpush3.bf16.msra.mxu1 %v6390_v18 }
 0x1fa   :  { %3864 = vmatprep.subr.bf16.mxu1 %v6391_v33 }
 0x1fd   :  { %3866 = vmatpush3.bf16.msra.mxu1 %v6392_v38 }
 0x1fe   :  { %3868 = vmatprep.subr.bf16.mxu1 %v6393_v15  ;;  %v1464_v15 = vpop.permute.xlu0 %1463 }
 0x201   :  { %3870 = vmatpush3.bf16.msra.mxu1 %v6394_v30 }
 0x202   :  { %3904 = vmatprep.subr.bf16.mxu1 %v6395_v20 }
 0x204   :  { %1148 = vmatmul.mubr.f32.vlgmr.msra.gmra.mrb[6].mxu1 %v5123_v37 }
 0x205   :  { %3906 = vmatpush3.bf16.msra.mxu1 %v6396_v16  ;;  %1747 = vmatprep.mubr.f32.mxu1 %v5170_v5 }
 0x206   :  { %3908 = vmatprep.subr.bf16.mxu1 %v5332_v46  ;;  %v6406_v46 = vld [vmem:[#allocation17_spill] sm:$0xff] }
 0x209   :  { %3910 = vmatpush3.bf16.msra.mxu1 %v6397_v13 }
 0x20a   :  { %3912 = vmatprep.subr.bf16.mxu1 %v5334_v19  ;;  %v6408_v19 = vld [vmem:[#allocation85_spill] sm:$0xff] }
 0x20d   :  { %3914 = vmatpush3.bf16.msra.mxu1 %v6398_v60 }
 0x20e   :  { %3916 = vmatprep.subr.bf16.mxu1 %v6399_v21 }
 0x211   :  { %3918 = vmatpush3.bf16.msra.mxu1 %v6400_v14 }
 0x212   :  { %3920 = vmatprep.subr.bf16.mxu1 %v6401_v45 }
 0x215   :  { %3922 = vmatpush3.bf16.msra.mxu1 %v6402_v49 }
 0x216   :  { %3924 = vmatprep.subr.bf16.mxu1 %v6403_v1 }
 0x219   :  { %3926 = vmatpush3.bf16.msra.mxu1 %v6404_v7  ;;  %v2064_v7 = vpop.permute.xlu0 %2063 }
 0x21a   :  { %3928 = vmatprep.subr.bf16.mxu1 %v6405_v51 }
 0x21d   :  { %3930 = vmatpush3.bf16.msra.mxu1 %v6406_v46 }
 0x21e   :  { %3932 = vmatprep.subr.bf16.mxu1 %v6407_v55 }
 0x221   :  { %3934 = vmatpush3.bf16.msra.mxu1 %v6408_v19 }
 0x222   :  { %3968 = vmatprep.subr.bf16.mxu1 %v6409_v6 }
 0x224   :  { %1748 = vmatmul.mubr.f32.vlgmr.msra.gmra.mrb[8].mxu1 %v5123_v37 }
 0x225   :  { %3970 = vmatpush3.bf16.msra.mxu1 %v6410_v63  ;;  %2347 = vmatprep.mubr.f32.mxu1 %v5170_v5 }
 0x226   :  { %3972 = vmatprep.subr.bf16.mxu1 %v6411_v61 }
 0x229   :  { %3974 = vmatpush3.bf16.msra.mxu1 %v6412_v23 }
 0x22a   :  { %3976 = vmatprep.subr.bf16.mxu1 %v6413_v2 }
 0x22d   :  { %3978 = vmatpush3.bf16.msra.mxu1 %v6414_v8 }
 0x22e   :  { %3980 = vmatprep.subr.bf16.mxu1 %v6415_v40 }
 0x231   :  { %3982 = vmatpush3.bf16.msra.mxu1 %v6416_v0 }
 0x232   :  { %3984 = vmatprep.subr.bf16.mxu1 %v6417_v52 }
 0x235   :  { %3986 = vmatpush3.bf16.msra.mxu1 %v5483_v39 }
 0x236   :  { %3988 = vmatprep.subr.bf16.mxu1 %v5488_v17 }
 0x239   :  { %3990 = vmatpush3.bf16.msra.mxu1 %v5493_v12 }
 0x23a   :  { %3992 = vmatprep.subr.bf16.mxu1 %v5500_v34 }
 0x23d   :  { %3994 = vmatpush3.bf16.msra.mxu1 %v5512_v4 }
 0x23e   :  { %3996 = vmatprep.subr.bf16.mxu1 %v5517_v31 }
 0x241   :  { %3998 = vmatpush3.bf16.msra.mxu1 %v5522_v59 }
 0x242   :  { %4032 = vmatprep.subr.bf16.mxu1 %v5529_v44 }
 0x244   :  { %2348 = vmatmul.mubr.f32.vlgmr.msra.gmra.mrb[10].mxu1 %v5123_v37 }
 0x245   :  { %4034 = vmatpush3.bf16.msra.mxu1 %v5541_v57  ;;  %2947 = vmatprep.mubr.f32.mxu1 %v5170_v5  ;;  %v854_v5 = vlaneseq }
 0x246   :  { %4036 = vmatprep.subr.bf16.mxu1 %v5546_v56 }
 0x247   :  { %v5695_v12 = vshrl.u32 %v854_v5, 7 }
 0x249   :  { %4038 = vmatpush3.bf16.msra.mxu1 %v5551_v3  ;;  %v1155_v34 = vsub.s32 1, %v5695_v12  ;;  %v1755_v4 = vsub.s32 3, %v5695_v12  ;;  %v2355_v31 = vsub.s32 5, %v5695_v12  ;;  %v2955_v59 = vsub.s32 7, %v5695_v12 }
 0x24a   :  { %4040 = vmatprep.subr.bf16.mxu1 %v5558_v32 }
 0x24d   :  { %4042 = vmatpush3.bf16.msra.mxu1 %v5570_v50 }
 0x24e   :  { %4044 = vmatprep.subr.bf16.mxu1 %v5575_v35 }
 0x251   :  { %4046 = vmatpush3.bf16.msra.mxu1 %v5581_v28  ;;  %v1455_v28 = vsub.s32 2, %v5695_v12 }
 0x252   :  { %4048 = vmatprep.subr.bf16.mxu1 %v5589_v54  ;;  %v5703_v54 = vsub.s32 0, %v5695_v12 }
 0x255   :  { %4050 = vmatpush3.bf16.msra.mxu1 %v5601_v42  ;;  %v2055_v42 = vsub.s32 4, %v5695_v12 }
 0x256   :  { %4052 = vmatprep.subr.bf16.mxu1 %v5606_v9  ;;  %v2655_v9 = vsub.s32 6, %v5695_v12 }
 0x259   :  { %4054 = vmatpush3.bf16.msra.mxu1 %v5611_v41 }
 0x25a   :  { %4056 = vmatprep.subr.bf16.mxu1 %v5618_v48 }
 0x25d   :  { %4058 = vmatpush3.bf16.msra.mxu1 %v5625_v43 }
 0x25e   :  { %4060 = vmatprep.subr.bf16.mxu1 %v5628_v58 }
 0x261   :  { %4062 = vmatpush3.bf16.msra.mxu1 %v4061_v29 }
 0x264   :  { %2948 = vmatmul.mubr.f32.vlgmr.msra.gmra.mrb[12].mxu1 %v5123_v37 }
 0x270   :  { %v3265_v39 = vpop.f32.mrb[0].mxu1 }
 0x271   :  { %v3266_v17 = vpop.f32.mrb[1].mxu1 }
 0x272   :  { %v3267_v44 = vadd.f32 %v3266_v17, %v3265_v39 }
 0x274   :  { %v1156_v57 = vrot.slane %v3267_v44, %v1155_v34  ;;  %v1756_v56 = vrot.slane %v3267_v44, %v1755_v4  ;;  %v2356_v3 = vrot.slane %v3267_v44, %v2355_v31  ;;  %v2956_v32 = vrot.slane %v3267_v44, %v2955_v59 }
 0x275   :  { %v1456_v10 = vrot.slane %v3267_v44, %v1455_v28  ;;  %v2056_v26 = vrot.slane %v3267_v44, %v2055_v42  ;;  %v857_v43 = vrot.slane %v3267_v44, %v5703_v54  ;;  %v2656_v47 = vrot.slane %v3267_v44, %v2655_v9 }
 0x27a   :  { %v3405_v50 = vpop.f32.mrb[64].mxu0 }
 0x27b   :  { %v3406_v37 = vpop.f32.mrb[65].mxu0 }
 0x27c   :  { %v3407_v35 = vadd.f32 %v3406_v37, %v3405_v50 }
 0x27e   :  { %v1459_v62 = vmul.f32 0.4, %v3407_v35 }
 0x297   :  { %v3300_v41 = vpop.f32.mrb[2].mxu1 }
 0x298   :  { %v3301_v48 = vpop.f32.mrb[3].mxu1 }
 0x299   :  { %v3302_v36 = vadd.f32 %v3301_v48, %v3300_v41 }
 0x29b   :  { %v1457_v58 = vadd.f32 %v3302_v36, %v1456_v10  ;;  %v2057_v22 = vadd.f32 %v3302_v36, %v2056_v26  ;;  %v858_v29 = vadd.f32 %v3302_v36, %v857_v43  ;;  %v2657_v24 = vadd.f32 %v3302_v36, %v2656_v47 }
 0x29c   :  { %v5708_v11 = vadd.f32 %v3302_v36, %v1156_v57  ;;  %v5710_v27 = vadd.f32 %v3302_v36, %v1756_v56  ;;  %v5712_v25 = vadd.f32 %v3302_v36, %v2356_v3  ;;  %v5714_v18 = vadd.f32 %v3302_v36, %v2956_v32 }
 0x29d   :  { %v1458_v33 = vmul.f32 0.6, %v1457_v58  ;;  %v2058_v14 = vmul.f32 0.6, %v2057_v22  ;;  %v859_v4 = vmul.f32 0.6, %v858_v29  ;;  %v2664_v58 = vpop.permute.xlu0 %2663 }
 0x29e   :  { %v2658_v10 = vmul.f32 0.6, %v2657_v24 }
 0x29f   :  { %v1460_v38 = vadd.f32 %v1459_v62, %v1458_v33 }
 0x2a1   :  { %v1466_v30 = vadd.f32 %v1464_v15, %v1460_v38  ;;  %v3475_v20 = vpop.f32.mrb[66].mxu0  ;;  %v4278_v15 = vmov 1966171168  }
 0x2a2   :  { %v3476_v16 = vpop.f32.mrb[67].mxu0 }
 0x2a3   :  { %v1467_v13 = vrot.slane %v1466_v30, 4  ;;  %v3477_v60 = vadd.f32 %v3476_v16, %v3475_v20 }
 0x2a5   :  { %v1468_v21 = vmax.f32 %v1466_v30, %v1467_v13  ;;  %v2059_v45 = vmul.f32 0.4, %v3477_v60 }
 0x2a7   :  { %v1469_v49 = vrot.slane %v1468_v21, 2  ;;  %v2060_v1 = vadd.f32 %v2059_v45, %v2058_v14 }
 0x2a9   :  { %v1470_v51 = vmax.f32 %v1468_v21, %v1469_v49  ;;  %v2066_v46 = vadd.f32 %v2064_v7, %v2060_v1 }
 0x2ab   :  { %v1471_v55 = vrot.slane %v1470_v51, 1  ;;  %v2067_v19 = vrot.slane %v2066_v46, 4 }
 0x2ad   :  { %v1472_v6 = vmax.f32 %v1470_v51, %v1471_v55  ;;  %v2068_v63 = vmax.f32 %v2066_v46, %v2067_v19 }
 0x2af   :  { %v1473_v61 = vsub.f32 %v1466_v30, %v1472_v6  ;;  %v2069_v23 = vrot.slane %v2068_v63, 2  ;;  %v888_v30 = vunpack.c.l.s4 %v4278_v15 }
 0x2b1   :  { %v1474_v2 = vmul.f32 1.442695, %v1473_v61  ;;  %v2070_v8 = vmax.f32 %v2068_v63, %v2069_v23  ;;  %v889_v21 = vunpack.c.0.s8 %v888_v30 }
 0x2b3   :  { %4072 = vpow2.f32 %v1474_v2  ;;  %v2071_v40 = vrot.slane %v2070_v8, 1  ;;  %v5721_v7 = vsub.s32 %v889_v21, %v5695_v12 }
 0x2b5   :  { %v2072_v0 = vmax.f32 %v2070_v8, %v2071_v40 }
 0x2b7   :  { %v2073_v52 = vsub.f32 %v2066_v46, %v2072_v0  ;;  %v3335_v5 = vpop.f32.mrb[4].mxu1 }
 0x2b8   :  { %v3336_v39 = vpop.f32.mrb[5].mxu1 }
 0x2b9   :  { %v2074_v17 = vmul.f32 1.442695, %v2073_v52  ;;  %v3337_v34 = vadd.f32 %v3336_v39, %v3335_v5 }
 0x2bb   :  { %4074 = vpow2.f32 %v2074_v17  ;;  %v860_v31 = vmul.f32 0.4, %v3337_v34 }
 0x2bd   :  { %v4073_v59 = vpop.eup %4072  ;;  %v861_v44 = vadd.f32 %v860_v31, %v859_v4 }
 0x2be   :  { %v1476_v57 = vrot.slane %v4073_v59, 4 }
 0x2bf   :  { %v867_v56 = vadd.f32 %v865_v53, %v861_v44 }
 0x2c0   :  { %v1477_v3 = vadd.f32 %v4073_v59, %v1476_v57 }
 0x2c1   :  { %v868_v32 = vrot.slane %v867_v56, 4  ;;  %v3545_v50 = vpop.f32.mrb[68].mxu0 }
 0x2c2   :  { %v1478_v37 = vrot.slane %v1477_v3, 2  ;;  %v3546_v35 = vpop.f32.mrb[69].mxu0 }
 0x2c3   :  { %v869_v28 = vmax.f32 %v867_v56, %v868_v32  ;;  %v3547_v42 = vadd.f32 %v3546_v35, %v3545_v50  ;;  %v5734_v32 = vld [vmem:[#allocation2 + $0x10] sm:$0xff] }
 0x2c4   :  { %v1479_v9 = vadd.f32 %v1478_v37, %v1477_v3  ;;  %v5737_v37 = vld [vmem:[#allocation2 + $0x18] sm:$0xff] }
 0x2c5   :  { %v5716_v41 = vpop.eup %4074  ;;  %v870_v48 = vrot.slane %v869_v28, 2  ;;  %v2659_v36 = vmul.f32 0.4, %v3547_v42 }
 0x2c6   :  { %v1480_v26 = vrot.slane %v1479_v9, 1  ;;  %v2076_v43 = vrot.slane %v5716_v41, 4 }
 0x2c7   :  { %v871_v47 = vmax.f32 %v869_v28, %v870_v48  ;;  %v2660_v62 = vadd.f32 %v2659_v36, %v2658_v10  ;;  %v5741_v48 = vld [vmem:[#allocation2] sm:$0xff] }
 0x2c8   :  { %v1481_v53 = vadd.f32 %v1480_v26, %v1479_v9  ;;  %v2077_v22 = vadd.f32 %v5716_v41, %v2076_v43  ;;  %v5745_v43 = vld [vmem:[#allocation2 + $0x8] sm:$0xff] }
 0x2c9   :  { %v872_v29 = vrot.slane %v871_v47, 1  ;;  %v2666_v33 = vadd.f32 %v2664_v58, %v2660_v62  ;;  %v1158_v62 = vmul.f32 0.6, %v5708_v11 }
 0x2ca   :  { %4076 = vrcp.f32 %v1481_v53  ;;  %v2078_v38 = vrot.slane %v2077_v22, 2 }
 0x2cb   :  { %v873_v20 = vmax.f32 %v871_v47, %v872_v29  ;;  %v2667_v16 = vrot.slane %v2666_v33, 4 }
 0x2cc   :  { %v2079_v13 = vadd.f32 %v2078_v38, %v2077_v22  ;;  %v5750_v22 = vld [vmem:[#allocation2 + $0x20] sm:$0xff]  ;;  %v5753_v38 = vld [vmem:[#allocation2 + $0x28] sm:$0xff] }
 0x2cd   :  { %v874_v24 = vsub.f32 %v867_v56, %v873_v20  ;;  %v2668_v60 = vmax.f32 %v2666_v33, %v2667_v16 }
 0x2ce   :  { %v2080_v14 = vrot.slane %v2079_v13, 1 }
 0x2cf   :  { %v2669_v45 = vrot.slane %v2668_v60, 2  ;;  %v875_v49 = vmul.f32 1.442695, %v874_v24  ;;  %v5758_v24 = vld [vmem:[#allocation2 + $0x30] sm:$0xff] }
 0x2d0   :  { %v2081_v51 = vadd.f32 %v2080_v14, %v2079_v13  ;;  %v5762_v14 = vld [vmem:[#allocation2 + $0x38] sm:$0xff] }
 0x2d1   :  { %v2670_v1 = vmax.f32 %v2668_v60, %v2669_v45  ;;  %4078 = vpow2.f32 %v875_v49 }
 0x2d2   :  { %4080 = vrcp.f32 %v2081_v51 }
 0x2d3   :  { %v2671_v46 = vrot.slane %v2670_v1, 1 }
 0x2d4   :  { %v4077_v55 = vpop.eup %4076 }
 0x2d5   :  { %v1483_v19 = vmul.f32 %v4077_v55, %v4073_v59  ;;  %v2672_v6 = vmax.f32 %v2670_v1, %v2671_v46  ;;  %v5767_v46 = vld [vmem:[#allocation2 + $0x40] sm:$0xff] }
 0x2d7   :  { %v1485_v63 = vcombine.high %v1483_v19, %v1483_v19  ;;  %v1492_v61 = vrot.slane %v1483_v19, %v5721_v7  ;;  %v2673_v23 = vsub.f32 %v2666_v33, %v2672_v6  ;;  %v3370_v2 = vpop.f32.mrb[6].mxu1  ;;  %v5770_v19 = vld [vmem:[#allocation2 + $0x48] sm:$0xff] }
 0x2d8   :  { %v3371_v8 = vpop.f32.mrb[7].mxu1 }
 0x2d9   :  { %v1499_v40 = vrot.slane %v1485_v63, %v5721_v7  ;;  %v1500_v0 = vcombine.high %v1492_v61, %v1492_v61  ;;  %v1508_v52 = vrot.slane %v1492_v61, %v5721_v7  ;;  %v3372_v12 = vadd.f32 %v3371_v8, %v3370_v2 }
 0x2da   :  { %v2674_v34 = vmul.f32 1.442695, %v2673_v23 }
 0x2db   :  { %v1501_v5 = vcombine.high %v1499_v40, %v1499_v40  ;;  %v1522_v39 = vrot.slane %v1500_v0, %v5721_v7  ;;  %v1530_v17 = vcombine.high %v1508_v52, %v1508_v52  ;;  %v1537_v31 = vrot.slane %v1508_v52, %v5703_v54  ;;  %v5729_v44 = vpop.eup %4078  ;;  %v5778_v52 = vld [vmem:[#allocation2 + $0x50] sm:$0xff] }
 0x2dc   :  { %v1515_v57 = vrot.slane %v1499_v40, %v5721_v7  ;;  %4082 = vpow2.f32 %v2674_v34  ;;  %v1159_v28 = vmul.f32 0.4, %v3372_v12  ;;  %v4081_v42 = vpop.eup %4080  ;;  %v877_v36 = vrot.slane %v5729_v44, 4 }
 0x2dd   :  { %v1532_v4 = vcombine.high %v1522_v39, %v1522_v39  ;;  %v1541_v59 = vrot.slane %v1522_v39, %v5703_v54  ;;  %v1529_v56 = vrot.slane %v1501_v5, %v5721_v7  ;;  %v1545_v3 = vrot.slane %v1530_v17, %v5703_v54  ;;  %v5781_v17 = vld [vmem:[#allocation2 + $0x58] sm:$0xff] }
 0x2de   :  { %v1574_v10 = vmul.f32 %v5741_v48, %v1537_v31  ;;  %v1531_v26 = vcombine.high %v1515_v57, %v1515_v57  ;;  %v1575_v47 = vmul.f32 %v5745_v43, %v1537_v31  ;;  %v1553_v53 = vrot.slane %v1515_v57, %v5703_v54  ;;  %v5785_v57 = vld [vmem:[#allocation2 + $0x60] sm:$0xff] }
 0x2df   :  { %v1576_v50 = vmul.f32 %v5734_v32, %v1541_v59  ;;  %v1577_v35 = vmul.f32 %v5737_v37, %v1541_v59  ;;  %v1549_v9 = vrot.slane %v1532_v4, %v5703_v54  ;;  %v1533_v58 = vcombine.high %v1529_v56, %v1529_v56  ;;  %v1164_v59 = vpop.permute.xlu1 %1163 }
 0x2e0   :  { %v1578_v29 = vmul.f32 %v5750_v22, %v1545_v3  ;;  %v1579_v15 = vmul.f32 %v5753_v38, %v1545_v3  ;;  %v2083_v20 = vmul.f32 %v4081_v42, %v5716_v41  ;;  %v1160_v16 = vadd.f32 %v1159_v28, %v1158_v62  ;;  %v5788_v3 = vld [vmem:[#allocation2 + $0x68] sm:$0xff] }
 0x2e1   :  { %v1590_v33 = vadd.f32 %v1576_v50, %v1574_v10  ;;  %v1597_v30 = vadd.f32 %v1577_v35, %v1575_v47  ;;  %v1557_v13 = vrot.slane %v1529_v56, %v5703_v54  ;;  %v1580_v11 = vmul.f32 %v5758_v24, %v1549_v9 }
 0x2e2   :  { %v878_v21 = vadd.f32 %v5729_v44, %v877_v36  ;;  %v1581_v45 = vmul.f32 %v5762_v14, %v1549_v9  ;;  %v2085_v1 = vcombine.high %v2083_v20, %v2083_v20  ;;  %v2092_v51 = vrot.slane %v2083_v20, %v5721_v7 }
 0x2e3   :  { %v1591_v60 = vadd.f32 %v1590_v33, %v1578_v29  ;;  %v1598_v49 = vadd.f32 %v1597_v30, %v1579_v15  ;;  %v1561_v41 = vrot.slane %v1531_v26, %v5703_v54  ;;  %v1582_v55 = vmul.f32 %v5767_v46, %v1553_v53  ;;  %v5794_v26 = vld [vmem:[#allocation2 + $0x70] sm:$0xff]  ;;  %v5798_v29 = vld [vmem:[#allocation2 + $0x78] sm:$0xff] }
 0x2e4   :  { %v1583_v6 = vmul.f32 %v5770_v19, %v1553_v53  ;;  %v2099_v23 = vrot.slane %v2085_v1, %v5721_v7  ;;  %v2100_v2 = vcombine.high %v2092_v51, %v2092_v51  ;;  %v2108_v8 = vrot.slane %v2092_v51, %v5721_v7 }
 0x2e5   :  { %v1592_v63 = vadd.f32 %v1591_v60, %v1580_v11  ;;  %v1599_v61 = vadd.f32 %v1598_v49, %v1581_v45  ;;  %v1565_v0 = vrot.slane %v1533_v58, %v5703_v54  ;;  %v1584_v12 = vmul.f32 %v5778_v52, %v1557_v13 }
 0x2e6   :  { %v5775_v40 = vpop.eup %4082  ;;  %v879_v39 = vrot.slane %v878_v21, 2  ;;  %v1585_v34 = vmul.f32 %v5781_v17, %v1557_v13  ;;  %v2122_v31 = vrot.slane %v2100_v2, %v5721_v7  ;;  %v1586_v56 = vmul.f32 %v5785_v57, %v1561_v41 }
 0x2e7   :  { %v1593_v5 = vadd.f32 %v1592_v63, %v1582_v55  ;;  %v1600_v4 = vadd.f32 %v1599_v61, %v1583_v6  ;;  %v1587_v50 = vmul.f32 %v5788_v3, %v1561_v41  ;;  %v2101_v28 = vcombine.high %v2099_v23, %v2099_v23 }
 0x2e8   :  { %v2130_v9 = vcombine.high %v2108_v8, %v2108_v8  ;;  %v2676_v10 = vrot.slane %v5775_v40, 4  ;;  %v5792_v36 = vadd.f32 %v1164_v59, %v1160_v16  ;;  %v1588_v47 = vmul.f32 %v5794_v26, %v1565_v0 }
 0x2e9   :  { %v1594_v35 = vadd.f32 %v1593_v5, %v1584_v12  ;;  %v1601_v42 = vadd.f32 %v1600_v4, %v1585_v34  ;;  %v2141_v58 = vrot.slane %v2122_v31, %v5703_v54  ;;  %v880_v53 = vadd.f32 %v879_v39, %v878_v21 }
 0x2ea   :  { %v1589_v33 = vmul.f32 %v5798_v29, %v1565_v0  ;;  %v2115_v30 = vrot.slane %v2099_v23, %v5721_v7  ;;  %v2132_v20 = vcombine.high %v2122_v31, %v2122_v31  ;;  %v2129_v16 = vrot.slane %v2101_v28, %v5721_v7 }
 0x2eb   :  { %v1595_v62 = vadd.f32 %v1594_v35, %v1586_v56  ;;  %v1602_v15 = vadd.f32 %v1601_v42, %v1587_v50  ;;  %v2137_v11 = vrot.slane %v2108_v8, %v5703_v54  ;;  %v2145_v45 = vrot.slane %v2130_v9, %v5703_v54 }
 0x2ec   :  { %v2677_v49 = vadd.f32 %v5775_v40, %v2676_v10  ;;  %v1167_v21 = vrot.slane %v5792_v36, 4  ;;  %v2176_v51 = vmul.f32 %v5734_v32, %v2141_v58  ;;  %v2177_v41 = vmul.f32 %v5737_v37, %v2141_v58 }
 0x2ed   :  { %v1596_v13 = vadd.f32 %v1595_v62, %v1588_v47  ;;  %v1603_v60 = vadd.f32 %v1602_v15, %v1589_v33  ;;  %v881_v55 = vrot.slane %v880_v53, 1  ;;  %v2131_v63 = vcombine.high %v2115_v30, %v2115_v30 }
 0x2ee   :  { %v2149_v61 = vrot.slane %v2132_v20, %v5703_v54  ;;  %v2153_v23 = vrot.slane %v2115_v30, %v5703_v54  ;;  %v2133_v2 = vcombine.high %v2129_v16, %v2129_v16  ;;  %v2174_v8 = vmul.f32 %v5741_v48, %v2137_v11 }
 0x2ef   :  { %v3141_v1 = vmul.f32 -1.442695, %v1596_v13  ;;  %v3142_v6 = vmul.f32 -1.442695, %v1603_v60  ;;  %v2175_v0 = vmul.f32 %v5745_v43, %v2137_v11  ;;  %v2157_v12 = vrot.slane %v2129_v16, %v5703_v54 }
 0x2f0   :  { %v2178_v5 = vmul.f32 %v5750_v22, %v2145_v45  ;;  %v2179_v39 = vmul.f32 %v5753_v38, %v2145_v45  ;;  %v2190_v34 = vadd.f32 %v2176_v51, %v2174_v8  ;;  %v882_v31 = vadd.f32 %v881_v55, %v880_v53 }
 0x2f1   :  { %4084 = vpow2.f32 %v3141_v1  ;;  %v2197_v4 = vadd.f32 %v2177_v41, %v2175_v0  ;;  %v2678_v59 = vrot.slane %v2677_v49, 2  ;;  %v2161_v56 = vrot.slane %v2131_v63, %v5703_v54 }
 0x2f2   :  { %4086 = vpow2.f32 %v3142_v6  ;;  %v2180_v50 = vmul.f32 %v5758_v24, %v2149_v61  ;;  %v2181_v35 = vmul.f32 %v5762_v14, %v2149_v61  ;;  %v1168_v28 = vmax.f32 %v5792_v36, %v1167_v21 }
 0x2f3   :  { %v2191_v42 = vadd.f32 %v2190_v34, %v2178_v5  ;;  %v2198_v9 = vadd.f32 %v2197_v4, %v2179_v39  ;;  %4088 = vrcp.f32 %v882_v31  ;;  %v2679_v10 = vadd.f32 %v2678_v59, %v2677_v49 }
 0x2f4   :  { %v2165_v62 = vrot.slane %v2133_v2, %v5703_v54  ;;  %v2182_v58 = vmul.f32 %v5767_v46, %v2153_v23  ;;  %v2183_v53 = vmul.f32 %v5770_v19, %v2153_v23  ;;  %v1169_v33 = vrot.slane %v1168_v28, 2 }
 0x2f5   :  { %v2192_v30 = vadd.f32 %v2191_v42, %v2180_v50  ;;  %v2199_v20 = vadd.f32 %v2198_v9, %v2181_v35  ;;  %v2680_v13 = vrot.slane %v2679_v10, 1  ;;  %v2184_v11 = vmul.f32 %v5778_v52, %v2157_v12 }
 0x2f6   :  { %v2185_v60 = vmul.f32 %v5781_v17, %v2157_v12  ;;  %v1170_v45 = vmax.f32 %v1168_v28, %v1169_v33  ;;  %v1758_v49 = vmul.f32 0.6, %v5710_v27  ;;  %v2186_v55 = vmul.f32 %v5785_v57, %v2161_v56  ;;  %v1764_v12 = vpop.permute.xlu1 %1763 }
 0x2f7   :  { %v3440_v47 = vpop.f32.mrb[8].mxu1  ;;  %v2193_v21 = vadd.f32 %v2192_v30, %v2182_v58  ;;  %v2200_v1 = vadd.f32 %v2199_v20, %v2183_v53  ;;  %v2681_v51 = vadd.f32 %v2680_v13, %v2679_v10  ;;  %v2187_v6 = vmul.f32 %v5788_v3, %v2161_v56 }
 0x2f8   :  { %v3441_v15 = vpop.f32.mrb[9].mxu1  ;;  %v1171_v63 = vrot.slane %v1170_v45, 1  ;;  %v2188_v23 = vmul.f32 %v5794_v26, %v2165_v62  ;;  %v2189_v27 = vmul.f32 %v5798_v29, %v2165_v62 }
 0x2f9   :  { %v3442_v16 = vadd.f32 %v3441_v15, %v3440_v47  ;;  %v2194_v2 = vadd.f32 %v2193_v21, %v2184_v11  ;;  %v2201_v8 = vadd.f32 %v2200_v1, %v2185_v60  ;;  %4090 = vrcp.f32 %v2681_v51 }
 0x2fa   :  { %v1172_v34 = vmax.f32 %v1170_v45, %v1171_v63 }
 0x2fb   :  { %v1759_v41 = vmul.f32 0.4, %v3442_v16  ;;  %v4085_v61 = vpop.eup %4084  ;;  %v2195_v31 = vadd.f32 %v2194_v2, %v2186_v55  ;;  %v2202_v59 = vadd.f32 %v2201_v8, %v2187_v6 }
 0x2fc   :  { %v4087_v5 = vpop.eup %4086  ;;  %v1610_v39 = vadd.f32 1.0, %v4085_v61  ;;  %v1173_v56 = vsub.f32 %v5792_v36, %v1172_v34 }
 0x2fd   :  { %v1760_v0 = vadd.f32 %v1759_v41, %v1758_v49  ;;  %v1611_v4 = vadd.f32 1.0, %v4087_v5  ;;  %v4089_v35 = vpop.eup %4088  ;;  %v2196_v28 = vadd.f32 %v2195_v31, %v2188_v23  ;;  %v2203_v42 = vadd.f32 %v2202_v59, %v2189_v27 }
 0x2fe   :  { %4092 = vrcp.f32 %v1610_v39  ;;  %v884_v10 = vmul.f32 %v4089_v35, %v5729_v44  ;;  %v1174_v58 = vmul.f32 1.442695, %v1173_v56  ;;  %v5851_v39 = vmul.f32 0.6, %v5712_v25 }
 0x2ff   :  { %v5830_v50 = vadd.f32 %v1764_v12, %v1760_v0  ;;  %4094 = vrcp.f32 %v1611_v4  ;;  %v3145_v47 = vmul.f32 -1.442695, %v2196_v28  ;;  %v3146_v62 = vmul.f32 -1.442695, %v2203_v42 }
 0x300   :  { %v886_v33 = vcombine.high %v884_v10, %v884_v10  ;;  %v893_v15 = vrot.slane %v884_v10, %v5721_v7 }
 0x301   :  { %v1767_v9 = vrot.slane %v5830_v50, 4  ;;  %4096 = vpow2.f32 %v3145_v47 }
 0x302   :  { %4098 = vpow2.f32 %v3146_v62  ;;  %v900_v36 = vrot.slane %v886_v33, %v5721_v7  ;;  %v901_v20 = vcombine.high %v893_v15, %v893_v15  ;;  %v909_v13 = vrot.slane %v893_v15, %v5721_v7 }
 0x303   :  { %v1768_v53 = vmax.f32 %v5830_v50, %v1767_v9  ;;  %4100 = vpow2.f32 %v1174_v58  ;;  %v4091_v16 = vpop.eup %4090 }
 0x304   :  { %v902_v11 = vcombine.high %v900_v36, %v900_v36  ;;  %v916_v44 = vrot.slane %v900_v36, %v5721_v7  ;;  %v923_v60 = vrot.slane %v901_v20, %v5721_v7  ;;  %v931_v45 = vcombine.high %v909_v13, %v909_v13 }
 0x305   :  { %v1769_v30 = vrot.slane %v1768_v53, 2  ;;  %v938_v6 = vrot.slane %v909_v13, %v5703_v54  ;;  %v2683_v8 = vmul.f32 %v4091_v16, %v5775_v40 }
 0x306   :  { %v933_v21 = vcombine.high %v923_v60, %v923_v60  ;;  %v942_v1 = vrot.slane %v923_v60, %v5703_v54  ;;  %v930_v55 = vrot.slane %v902_v11, %v5721_v7  ;;  %v932_v63 = vcombine.high %v916_v44, %v916_v44 }
 0x307   :  { %v1770_v51 = vmax.f32 %v1768_v53, %v1769_v30  ;;  %v946_v61 = vrot.slane %v931_v45, %v5703_v54  ;;  %v954_v5 = vrot.slane %v916_v44, %v5703_v54  ;;  %v975_v31 = vmul.f32 %v5741_v48, %v938_v6 }
 0x308   :  { %v4093_v49 = vpop.eup %4092  ;;  %v977_v23 = vmul.f32 %v5734_v32, %v942_v1  ;;  %v978_v2 = vmul.f32 %v5737_v37, %v942_v1  ;;  %v950_v0 = vrot.slane %v933_v21, %v5703_v54  ;;  %v934_v34 = vcombine.high %v930_v55, %v930_v55 }
 0x309   :  { %v4095_v41 = vpop.eup %4094  ;;  %1617 = vst [vmem:[#allocation7 + $0x20] sm:$0xff] %v4093_v49  ;;  %v1771_v12 = vrot.slane %v1770_v51, 1  ;;  %v958_v4 = vrot.slane %v930_v55, %v5703_v54  ;;  %v976_v59 = vmul.f32 %v5745_v43, %v938_v6  ;;  %v962_v40 = vrot.slane %v932_v63, %v5703_v54 }
 0x30a   :  { %1618 = vst [vmem:[#allocation7 + $0x28] sm:$0xff] %v4095_v41  ;;  %v979_v28 = vmul.f32 %v5750_v22, %v946_v61  ;;  %v980_v42 = vmul.f32 %v5753_v38, %v946_v61  ;;  %v991_v10 = vadd.f32 %v977_v23, %v975_v31  ;;  %v2685_v62 = vcombine.high %v2683_v8, %v2683_v8 }
 0x30b   :  { %v4097_v27 = vpop.eup %4096  ;;  %v998_v47 = vadd.f32 %v978_v2, %v976_v59  ;;  %v981_v58 = vmul.f32 %v5758_v24, %v950_v0  ;;  %v982_v53 = vmul.f32 %v5762_v14, %v950_v0  ;;  %v2692_v33 = vrot.slane %v2683_v8, %v5721_v7 }
 0x30c   :  { %v4099_v56 = vpop.eup %4098  ;;  %v2210_v35 = vadd.f32 1.0, %v4097_v27  ;;  %v992_v15 = vadd.f32 %v991_v10, %v979_v28  ;;  %v2699_v36 = vrot.slane %v2685_v62, %v5721_v7  ;;  %v966_v20 = vrot.slane %v934_v34, %v5703_v54 }
 0x30d   :  { %v5859_v9 = vpop.eup %4100  ;;  %v2211_v25 = vadd.f32 1.0, %v4099_v56  ;;  %v999_v30 = vadd.f32 %v998_v47, %v980_v42  ;;  %v2700_v13 = vcombine.high %v2692_v33, %v2692_v33  ;;  %v2708_v16 = vrot.slane %v2692_v33, %v5721_v7 }
 0x30e   :  { %4102 = vrcp.f32 %v2210_v35  ;;  %v1176_v11 = vrot.slane %v5859_v9, 4  ;;  %v983_v44 = vmul.f32 %v5767_v46, %v954_v5  ;;  %v984_v60 = vmul.f32 %v5770_v19, %v954_v5 }
 0x30f   :  { %4104 = vrcp.f32 %v2211_v25  ;;  %v993_v45 = vadd.f32 %v992_v15, %v981_v58  ;;  %v1000_v49 = vadd.f32 %v999_v30, %v982_v53  ;;  %v985_v21 = vmul.f32 %v5778_v52, %v958_v4 }
 0x310   :  { %v986_v1 = vmul.f32 %v5781_v17, %v958_v4  ;;  %v2701_v41 = vcombine.high %v2699_v36, %v2699_v36  ;;  %v2722_v55 = vrot.slane %v2700_v13, %v5721_v7  ;;  %v2730_v61 = vcombine.high %v2708_v16, %v2708_v16 }
 0x311   :  { %v994_v6 = vadd.f32 %v993_v45, %v983_v44  ;;  %v1001_v63 = vadd.f32 %v1000_v49, %v984_v60  ;;  %v1772_v23 = vmax.f32 %v1770_v51, %v1771_v12  ;;  %v987_v8 = vmul.f32 %v5785_v57, %v962_v40 }
 0x312   :  { %v2732_v0 = vcombine.high %v2722_v55, %v2722_v55  ;;  %v2741_v27 = vrot.slane %v2722_v55, %v5703_v54  ;;  %v1177_v5 = vadd.f32 %v5859_v9, %v1176_v11  ;;  %v988_v31 = vmul.f32 %v5788_v3, %v962_v40 }
 0x313   :  { %v995_v59 = vadd.f32 %v994_v6, %v985_v21  ;;  %v1002_v4 = vadd.f32 %v1001_v63, %v986_v1  ;;  %v2715_v56 = vrot.slane %v2699_v36, %v5721_v7  ;;  %v989_v35 = vmul.f32 %v5794_v26, %v966_v20 }
 0x314   :  { %v990_v28 = vmul.f32 %v5798_v29, %v966_v20  ;;  %v2729_v51 = vrot.slane %v2701_v41, %v5721_v7  ;;  %v2737_v12 = vrot.slane %v2708_v16, %v5703_v54  ;;  %v2745_v10 = vrot.slane %v2730_v61, %v5703_v54 }
 0x315   :  { %v996_v42 = vadd.f32 %v995_v59, %v987_v8  ;;  %v1003_v25 = vadd.f32 %v1002_v4, %v988_v31  ;;  %v1773_v47 = vsub.f32 %v5830_v50, %v1772_v23  ;;  %v2749_v40 = vrot.slane %v2732_v0, %v5703_v54 }
 0x316   :  { %v2776_v58 = vmul.f32 %v5734_v32, %v2741_v27  ;;  %v2777_v53 = vmul.f32 %v5737_v37, %v2741_v27  ;;  %v1178_v33 = vrot.slane %v1177_v5, 2  ;;  %v2731_v20 = vcombine.high %v2715_v56, %v2715_v56 }
 0x317   :  { %v3510_v2 = vpop.f32.mrb[10].mxu1  ;;  %v997_v30 = vadd.f32 %v996_v42, %v989_v35  ;;  %v1004_v36 = vadd.f32 %v1003_v25, %v990_v28  ;;  %v2753_v13 = vrot.slane %v2715_v56, %v5703_v54  ;;  %v2733_v16 = vcombine.high %v2729_v51, %v2729_v51 }
 0x318   :  { %v3511_v34 = vpop.f32.mrb[11].mxu1  ;;  %v4103_v62 = vpop.eup %4102  ;;  %v2757_v11 = vrot.slane %v2729_v51, %v5703_v54  ;;  %v2774_v50 = vmul.f32 %v5741_v48, %v2737_v12  ;;  %v2775_v44 = vmul.f32 %v5745_v43, %v2737_v12  ;;  %v2778_v49 = vmul.f32 %v5750_v22, %v2745_v10 }
 0x319   :  { %v4105_v15 = vpop.eup %4104  ;;  %2217 = vst [vmem:[#allocation7 + $0x40] sm:$0xff] %v4103_v62  ;;  %v3137_v60 = vmul.f32 -1.442695, %v997_v30  ;;  %v3138_v45 = vmul.f32 -1.442695, %v1004_v36  ;;  %v2779_v21 = vmul.f32 %v5753_v38, %v2745_v10  ;;  %v2780_v1 = vmul.f32 %v5758_v24, %v2749_v40 }
 0x31a   :  { %2218 = vst [vmem:[#allocation7 + $0x48] sm:$0xff] %v4105_v15  ;;  %v2790_v41 = vadd.f32 %v2776_v58, %v2774_v50  ;;  %v2797_v55 = vadd.f32 %v2777_v53, %v2775_v44  ;;  %v1179_v6 = vadd.f32 %v1178_v33, %v1177_v5  ;;  %v2781_v63 = vmul.f32 %v5762_v14, %v2749_v40 }
 0x31b   :  { %4106 = vpow2.f32 %v3137_v60  ;;  %v1774_v61 = vmul.f32 1.442695, %v1773_v47  ;;  %v3512_v23 = vadd.f32 %v3511_v34, %v3510_v2  ;;  %v2761_v31 = vrot.slane %v2731_v20, %v5703_v54  ;;  %v2364_v34 = vpop.permute.xlu1 %2363 }
 0x31c   :  { %4108 = vpow2.f32 %v3138_v45  ;;  %v2791_v8 = vadd.f32 %v2790_v41, %v2778_v49  ;;  %v2798_v0 = vadd.f32 %v2797_v55, %v2779_v21  ;;  %v1180_v27 = vrot.slane %v1179_v6, 1 }
 0x31d   :  { %v2782_v59 = vmul.f32 %v5767_v46, %v2753_v13  ;;  %4110 = vpow2.f32 %v1774_v61  ;;  %v2359_v4 = vmul.f32 0.4, %v3512_v23  ;;  %v2783_v56 = vmul.f32 %v5770_v19, %v2753_v13 }
 0x31e   :  { %v2792_v35 = vadd.f32 %v2791_v8, %v2780_v1  ;;  %v2799_v28 = vadd.f32 %v2798_v0, %v2781_v63  ;;  %v1181_v5 = vadd.f32 %v1180_v27, %v1179_v6  ;;  %v2765_v51 = vrot.slane %v2733_v16, %v5703_v54 }
 0x31f   :  { %v2784_v12 = vmul.f32 %v5778_v52, %v2757_v11  ;;  %v2360_v2 = vadd.f32 %v2359_v4, %v5851_v39  ;;  %v2785_v42 = vmul.f32 %v5781_v17, %v2757_v11  ;;  %v2786_v62 = vmul.f32 %v5785_v57, %v2761_v31 }
 0x320   :  { %v2793_v25 = vadd.f32 %v2792_v35, %v2782_v59  ;;  %v2800_v10 = vadd.f32 %v2799_v28, %v2783_v56  ;;  %4112 = vrcp.f32 %v1181_v5  ;;  %v2787_v40 = vmul.f32 %v5788_v3, %v2761_v31 }
 0x321   :  { %v5902_v47 = vadd.f32 %v2364_v34, %v2360_v2  ;;  %v2788_v15 = vmul.f32 %v5794_v26, %v2765_v51  ;;  %v2789_v39 = vmul.f32 %v5798_v29, %v2765_v51 }
 0x322   :  { %v2794_v58 = vadd.f32 %v2793_v25, %v2784_v12  ;;  %v2801_v53 = vadd.f32 %v2800_v10, %v2785_v42 }
 0x323   :  { %v2367_v33 = vrot.slane %v5902_v47, 4 }
 0x324   :  { %v2795_v30 = vadd.f32 %v2794_v58, %v2786_v62  ;;  %v2802_v36 = vadd.f32 %v2801_v53, %v2787_v40 }
 0x325   :  { %v4107_v20 = vpop.eup %4106  ;;  %v2368_v13 = vmax.f32 %v5902_v47, %v2367_v33 }
 0x326   :  { %v4109_v16 = vpop.eup %4108  ;;  %v1011_v11 = vadd.f32 1.0, %v4107_v20  ;;  %v2796_v50 = vadd.f32 %v2795_v30, %v2788_v15  ;;  %v2803_v44 = vadd.f32 %v2802_v36, %v2789_v39 }
 0x327   :  { %v5910_v60 = vpop.eup %4110  ;;  %v1012_v45 = vadd.f32 1.0, %v4109_v16  ;;  %v2369_v49 = vrot.slane %v2368_v13, 2 }
 0x328   :  { %4114 = vrcp.f32 %v1011_v11  ;;  %v3149_v21 = vmul.f32 -1.442695, %v2796_v50  ;;  %v3150_v1 = vmul.f32 -1.442695, %v2803_v44  ;;  %v1776_v41 = vrot.slane %v5910_v60, 4 }
 0x329   :  { %4116 = vrcp.f32 %v1012_v45  ;;  %v2370_v55 = vmax.f32 %v2368_v13, %v2369_v49 }
 0x32a   :  { %v4113_v6 = vpop.eup %4112  ;;  %4118 = vpow2.f32 %v3149_v21  ;;  %v1777_v63 = vadd.f32 %v5910_v60, %v1776_v41 }
 0x32b   :  { %4120 = vpow2.f32 %v3150_v1  ;;  %v1183_v61 = vmul.f32 %v4113_v6, %v5859_v9  ;;  %v2371_v8 = vrot.slane %v2370_v55, 1 }
 0x32c   :  { %v1778_v23 = vrot.slane %v1777_v63, 2 }
 0x32d   :  { %v1185_v0 = vcombine.high %v1183_v61, %v1183_v61  ;;  %v1192_v27 = vrot.slane %v1183_v61, %v5721_v7  ;;  %v2372_v35 = vmax.f32 %v2370_v55, %v2371_v8 }
 0x32e   :  { %v1779_v56 = vadd.f32 %v1778_v23, %v1777_v63 }
 0x32f   :  { %v1199_v31 = vrot.slane %v1185_v0, %v5721_v7  ;;  %v1200_v59 = vcombine.high %v1192_v27, %v1192_v27  ;;  %v1208_v4 = vrot.slane %v1192_v27, %v5721_v7  ;;  %v2373_v58 = vsub.f32 %v5902_v47, %v2372_v35 }
 0x330   :  { %v1780_v25 = vrot.slane %v1779_v56, 1 }
 0x331   :  { %v1222_v28 = vrot.slane %v1200_v59, %v5721_v7  ;;  %v1201_v12 = vcombine.high %v1199_v31, %v1199_v31  ;;  %v1230_v2 = vcombine.high %v1208_v4, %v1208_v4  ;;  %v1237_v40 = vrot.slane %v1208_v4, %v5703_v54 }
 0x332   :  { %v4115_v51 = vpop.eup %4114  ;;  %v1215_v15 = vrot.slane %v1199_v31, %v5721_v7  ;;  %v1781_v16 = vadd.f32 %v1780_v25, %v1779_v56  ;;  %v2374_v50 = vmul.f32 1.442695, %v2373_v58  ;;  %v2958_v31 = vmul.f32 0.6, %v5714_v18 }
 0x333   :  { %v4117_v9 = vpop.eup %4116  ;;  %1017 = vst [vmem:[#allocation7] sm:$0xff] %v4115_v51  ;;  %v1241_v42 = vrot.slane %v1222_v28, %v5703_v54  ;;  %v1232_v62 = vcombine.high %v1222_v28, %v1222_v28  ;;  %v1229_v30 = vrot.slane %v1201_v12, %v5721_v7  ;;  %v1245_v36 = vrot.slane %v1230_v2, %v5703_v54  ;;  %v2964_v12 = vpop.permute.xlu1 %2963 }
 0x334   :  { %v4119_v10 = vpop.eup %4118  ;;  %1018 = vst [vmem:[#allocation7 + $0x8] sm:$0xff] %v4117_v9  ;;  %v1274_v47 = vmul.f32 %v5741_v48, %v1237_v40  ;;  %v1231_v44 = vcombine.high %v1215_v15, %v1215_v15  ;;  %v1275_v45 = vmul.f32 %v5745_v43, %v1237_v40  ;;  %v1253_v21 = vrot.slane %v1215_v15, %v5703_v54 }
 0x335   :  { %v4121_v53 = vpop.eup %4120  ;;  %v2810_v33 = vadd.f32 1.0, %v4119_v10  ;;  %v1276_v20 = vmul.f32 %v5734_v32, %v1241_v42  ;;  %v1277_v13 = vmul.f32 %v5737_v37, %v1241_v42  ;;  %v1249_v11 = vrot.slane %v1232_v62, %v5703_v54 }
 0x336   :  { %v2811_v39 = vadd.f32 1.0, %v4121_v53  ;;  %v1233_v49 = vcombine.high %v1229_v30, %v1229_v30  ;;  %v1278_v1 = vmul.f32 %v5750_v22, %v1245_v36  ;;  %v1279_v55 = vmul.f32 %v5753_v38, %v1245_v36 }
 0x337   :  { %v3580_v5 = vpop.f32.mrb[12].mxu1  ;;  %4122 = vrcp.f32 %v2810_v33  ;;  %v1290_v41 = vadd.f32 %v1276_v20, %v1274_v47  ;;  %v1297_v6 = vadd.f32 %v1277_v13, %v1275_v45  ;;  %v1257_v61 = vrot.slane %v1229_v30, %v5703_v54 }
 0x338   :  { %v3581_v34 = vpop.f32.mrb[13].mxu1  ;;  %4124 = vrcp.f32 %v2811_v39  ;;  %v1280_v23 = vmul.f32 %v5758_v24, %v1249_v11  ;;  %v1281_v0 = vmul.f32 %v5762_v14, %v1249_v11  ;;  %v1261_v4 = vrot.slane %v1231_v44, %v5703_v54 }
 0x339   :  { %4126 = vrcp.f32 %v1781_v16  ;;  %v3582_v63 = vadd.f32 %v3581_v34, %v3580_v5  ;;  %v1291_v8 = vadd.f32 %v1290_v41, %v1278_v1  ;;  %v1298_v27 = vadd.f32 %v1297_v6, %v1279_v55 }
 0x33a   :  { %4128 = vpow2.f32 %v2374_v50  ;;  %v1282_v56 = vmul.f32 %v5767_v46, %v1253_v21  ;;  %v1283_v28 = vmul.f32 %v5770_v19, %v1253_v21  ;;  %v1265_v2 = vrot.slane %v1233_v49, %v5703_v54 }
 0x33b   :  { %v2959_v59 = vmul.f32 0.4, %v3582_v63  ;;  %v1292_v35 = vadd.f32 %v1291_v8, %v1280_v23  ;;  %v1299_v5 = vadd.f32 %v1298_v27, %v1281_v0  ;;  %v1284_v34 = vmul.f32 %v5778_v52, %v1257_v61 }
 0x33c   :  { %v1285_v25 = vmul.f32 %v5781_v17, %v1257_v61  ;;  %v1286_v40 = vmul.f32 %v5785_v57, %v1261_v4  ;;  %v1287_v53 = vmul.f32 %v5788_v3, %v1261_v4  ;;  %v1288_v39 = vmul.f32 %v5794_v26, %v1265_v2 }
 0x33d   :  { %v2960_v51 = vadd.f32 %v2959_v59, %v2958_v31  ;;  %v1293_v9 = vadd.f32 %v1292_v35, %v1282_v56  ;;  %v1300_v18 = vadd.f32 %v1299_v5, %v1283_v28  ;;  %v1289_v20 = vmul.f32 %v5798_v29, %v1265_v2 }
 0x33f   :  { %v5943_v10 = vadd.f32 %v2964_v12, %v2960_v51  ;;  %v1294_v58 = vadd.f32 %v1293_v9, %v1284_v34  ;;  %v1301_v33 = vadd.f32 %v1300_v18, %v1285_v25 }
 0x341   :  { %v4123_v42 = vpop.eup %4122  ;;  %v2967_v15 = vrot.slane %v5943_v10, 4  ;;  %v1295_v30 = vadd.f32 %v1294_v58, %v1286_v40  ;;  %v1302_v13 = vadd.f32 %v1301_v33, %v1287_v53 }
 0x342   :  { %v4125_v62 = vpop.eup %4124  ;;  %2817 = vst [vmem:[#allocation7 + $0x60] sm:$0xff] %v4123_v42 }
 0x343   :  { %2818 = vst [vmem:[#allocation7 + $0x68] sm:$0xff] %v4125_v62  ;;  %v4127_v36 = vpop.eup %4126  ;;  %v2968_v16 = vmax.f32 %v5943_v10, %v2967_v15  ;;  %v1296_v47 = vadd.f32 %v1295_v30, %v1288_v39  ;;  %v1303_v44 = vadd.f32 %v1302_v13, %v1289_v20 }
 0x344   :  { %v5951_v11 = vpop.eup %4128  ;;  %v1783_v50 = vmul.f32 %v4127_v36, %v5910_v60 }
 0x345   :  { %v2376_v45 = vrot.slane %v5951_v11, 4  ;;  %v2969_v49 = vrot.slane %v2968_v16, 2  ;;  %v3139_v21 = vmul.f32 -1.442695, %v1296_v47  ;;  %v3140_v55 = vmul.f32 -1.442695, %v1303_v44 }
 0x346   :  { %v1785_v1 = vcombine.high %v1783_v50, %v1783_v50  ;;  %v1792_v41 = vrot.slane %v1783_v50, %v5721_v7 }
 0x347   :  { %v2377_v6 = vadd.f32 %v5951_v11, %v2376_v45  ;;  %v2970_v63 = vmax.f32 %v2968_v16, %v2969_v49  ;;  %4130 = vpow2.f32 %v3139_v21 }
 0x348   :  { %v1799_v61 = vrot.slane %v1785_v1, %v5721_v7  ;;  %v1800_v23 = vcombine.high %v1792_v41, %v1792_v41  ;;  %v1808_v8 = vrot.slane %v1792_v41, %v5721_v7  ;;  %4132 = vpow2.f32 %v3140_v55 }
 0x349   :  { %v2378_v31 = vrot.slane %v2377_v6, 2  ;;  %v2971_v59 = vrot.slane %v2970_v63, 1 }
 0x34a   :  { %v1801_v60 = vcombine.high %v1799_v61, %v1799_v61  ;;  %v1822_v0 = vrot.slane %v1800_v23, %v5721_v7  ;;  %v1830_v27 = vcombine.high %v1808_v8, %v1808_v8  ;;  %v1837_v56 = vrot.slane %v1808_v8, %v5703_v54 }
 0x34b   :  { %v1815_v28 = vrot.slane %v1799_v61, %v5721_v7  ;;  %v2379_v34 = vadd.f32 %v2378_v31, %v2377_v6  ;;  %v2972_v9 = vmax.f32 %v2970_v63, %v2971_v59 }
 0x34c   :  { %v1832_v4 = vcombine.high %v1822_v0, %v1822_v0  ;;  %v1841_v35 = vrot.slane %v1822_v0, %v5703_v54  ;;  %v1829_v5 = vrot.slane %v1801_v60, %v5721_v7  ;;  %v1845_v51 = vrot.slane %v1830_v27, %v5703_v54 }
 0x34d   :  { %v1874_v25 = vmul.f32 %v5741_v48, %v1837_v56  ;;  %v1831_v18 = vcombine.high %v1815_v28, %v1815_v28  ;;  %v1853_v40 = vrot.slane %v1815_v28, %v5703_v54  ;;  %v1875_v58 = vmul.f32 %v5745_v43, %v1837_v56 }
 0x34e   :  { %v1876_v12 = vmul.f32 %v5734_v32, %v1841_v35  ;;  %v1877_v2 = vmul.f32 %v5737_v37, %v1841_v35  ;;  %v1849_v42 = vrot.slane %v1832_v4, %v5703_v54  ;;  %v1833_v62 = vcombine.high %v1829_v5, %v1829_v5 }
 0x34f   :  { %v1857_v33 = vrot.slane %v1829_v5, %v5703_v54  ;;  %v1878_v15 = vmul.f32 %v5750_v22, %v1845_v51  ;;  %v1879_v39 = vmul.f32 %v5753_v38, %v1845_v51  ;;  %v2380_v16 = vrot.slane %v2379_v34, 1 }
 0x350   :  { %v1890_v30 = vadd.f32 %v1876_v12, %v1874_v25  ;;  %v1897_v13 = vadd.f32 %v1877_v2, %v1875_v58  ;;  %v2973_v47 = vsub.f32 %v5943_v10, %v2972_v9  ;;  %v1880_v44 = vmul.f32 %v5758_v24, %v1849_v42 }
 0x351   :  { %v4131_v53 = vpop.eup %4130  ;;  %v1881_v45 = vmul.f32 %v5762_v14, %v1849_v42  ;;  %v2381_v1 = vadd.f32 %v2380_v16, %v2379_v34  ;;  %v1861_v55 = vrot.slane %v1831_v18, %v5703_v54  ;;  %v1882_v6 = vmul.f32 %v5767_v46, %v1853_v40 }
 0x352   :  { %v4133_v36 = vpop.eup %4132  ;;  %v1310_v20 = vadd.f32 1.0, %v4131_v53  ;;  %v1891_v49 = vadd.f32 %v1890_v30, %v1878_v15  ;;  %v1898_v21 = vadd.f32 %v1897_v13, %v1879_v39  ;;  %v2974_v41 = vmul.f32 1.442695, %v2973_v47 }
 0x353   :  { %v1311_v50 = vadd.f32 1.0, %v4133_v36  ;;  %v1883_v61 = vmul.f32 %v5770_v19, %v1853_v40  ;;  %v1865_v10 = vrot.slane %v1833_v62, %v5703_v54  ;;  %v1884_v8 = vmul.f32 %v5778_v52, %v1857_v33 }
 0x354   :  { %4134 = vrcp.f32 %v1310_v20  ;;  %v1892_v63 = vadd.f32 %v1891_v49, %v1880_v44  ;;  %v1899_v23 = vadd.f32 %v1898_v21, %v1881_v45  ;;  %v1885_v0 = vmul.f32 %v5781_v17, %v1857_v33 }
 0x355   :  { %4136 = vrcp.f32 %v1311_v50  ;;  %v1886_v31 = vmul.f32 %v5785_v57, %v1861_v55  ;;  %v1887_v4 = vmul.f32 %v5788_v3, %v1861_v55  ;;  %v1888_v35 = vmul.f32 %v5794_v26, %v1865_v10 }
 0x356   :  { %4138 = vrcp.f32 %v2381_v1  ;;  %v1893_v60 = vadd.f32 %v1892_v63, %v1882_v6  ;;  %v1900_v27 = vadd.f32 %v1899_v23, %v1883_v61  ;;  %v1889_v5 = vmul.f32 %v5798_v29, %v1865_v10 }
 0x357   :  { %4140 = vpow2.f32 %v2974_v41 }
 0x358   :  { %v1894_v59 = vadd.f32 %v1893_v60, %v1884_v8  ;;  %v1901_v56 = vadd.f32 %v1900_v27, %v1885_v0 }
 0x35a   :  { %v1895_v28 = vadd.f32 %v1894_v59, %v1886_v31  ;;  %v1902_v51 = vadd.f32 %v1901_v56, %v1887_v4 }
 0x35c   :  { %v1896_v12 = vadd.f32 %v1895_v28, %v1888_v35  ;;  %v1903_v34 = vadd.f32 %v1902_v51, %v1889_v5 }
 0x35e   :  { %v4135_v2 = vpop.eup %4134  ;;  %v3143_v42 = vmul.f32 -1.442695, %v1896_v12  ;;  %v3144_v18 = vmul.f32 -1.442695, %v1903_v34 }
 0x35f   :  { %v4137_v9 = vpop.eup %4136  ;;  %1317 = vst [vmem:[#allocation7 + $0x10] sm:$0xff] %v4135_v2 }
 0x360   :  { %v4139_v25 = vpop.eup %4138  ;;  %1318 = vst [vmem:[#allocation7 + $0x18] sm:$0xff] %v4137_v9  ;;  %4142 = vpow2.f32 %v3143_v42 }
 0x361   :  { %v5987_v62 = vpop.eup %4140  ;;  %v2383_v40 = vmul.f32 %v4139_v25, %v5951_v11  ;;  %4144 = vpow2.f32 %v3144_v18 }
 0x362   :  { %v2976_v58 = vrot.slane %v5987_v62, 4 }
 0x363   :  { %v2385_v53 = vcombine.high %v2383_v40, %v2383_v40  ;;  %v2392_v33 = vrot.slane %v2383_v40, %v5721_v7 }
 0x364   :  { %v2977_v30 = vadd.f32 %v5987_v62, %v2976_v58 }
 0x365   :  { %v2400_v15 = vcombine.high %v2392_v33, %v2392_v33  ;;  %v2408_v39 = vrot.slane %v2392_v33, %v5721_v7  ;;  %v2399_v36 = vrot.slane %v2385_v53, %v5721_v7 }
 0x366   :  { %v2978_v47 = vrot.slane %v2977_v30, 2 }
 0x367   :  { %v2422_v20 = vrot.slane %v2400_v15, %v5721_v7  ;;  %v2430_v13 = vcombine.high %v2408_v39, %v2408_v39  ;;  %v2401_v11 = vcombine.high %v2399_v36, %v2399_v36  ;;  %v2437_v44 = vrot.slane %v2408_v39, %v5703_v54 }
 0x368   :  { %v2415_v1 = vrot.slane %v2399_v36, %v5721_v7  ;;  %v2979_v61 = vadd.f32 %v2978_v47, %v2977_v30 }
 0x369   :  { %v2441_v16 = vrot.slane %v2422_v20, %v5703_v54  ;;  %v2432_v50 = vcombine.high %v2422_v20, %v2422_v20  ;;  %v2445_v41 = vrot.slane %v2430_v13, %v5703_v54  ;;  %v2429_v23 = vrot.slane %v2401_v11, %v5721_v7 }
 0x36a   :  { %v4143_v45 = vpop.eup %4142  ;;  %v2474_v8 = vmul.f32 %v5741_v48, %v2437_v44  ;;  %v2475_v60 = vmul.f32 %v5745_v43, %v2437_v44  ;;  %v2431_v0 = vcombine.high %v2415_v1, %v2415_v1  ;;  %v2453_v27 = vrot.slane %v2415_v1, %v5703_v54 }
 0x36b   :  { %v4145_v49 = vpop.eup %4144  ;;  %v1910_v21 = vadd.f32 1.0, %v4143_v45  ;;  %v2476_v55 = vmul.f32 %v5734_v32, %v2441_v16  ;;  %v2477_v63 = vmul.f32 %v5737_v37, %v2441_v16  ;;  %v2449_v10 = vrot.slane %v2432_v50, %v5703_v54 }
 0x36c   :  { %v1911_v6 = vadd.f32 1.0, %v4145_v49  ;;  %v2478_v31 = vmul.f32 %v5750_v22, %v2445_v41  ;;  %v2479_v59 = vmul.f32 %v5753_v38, %v2445_v41  ;;  %v2980_v4 = vrot.slane %v2979_v61, 1 }
 0x36d   :  { %4146 = vrcp.f32 %v1910_v21  ;;  %v2490_v32 = vadd.f32 %v2476_v55, %v2474_v8  ;;  %v2497_v37 = vadd.f32 %v2477_v63, %v2475_v60  ;;  %v2433_v56 = vcombine.high %v2429_v23, %v2429_v23  ;;  %v4185_v63 = vld [vmem:[#allocation2 + $0x10] sm:$0xff] }
 0x36e   :  { %4148 = vrcp.f32 %v1911_v6  ;;  %v2457_v35 = vrot.slane %v2429_v23, %v5703_v54  ;;  %v2480_v28 = vmul.f32 %v5758_v24, %v2449_v10  ;;  %v2481_v48 = vmul.f32 %v5762_v14, %v2449_v10  ;;  %v4186_v10 = vld [vmem:[#allocation2 + $0x18] sm:$0xff] }
 0x36f   :  { %v2491_v5 = vadd.f32 %v2490_v32, %v2478_v31  ;;  %v2498_v51 = vadd.f32 %v2497_v37, %v2479_v59  ;;  %v2981_v43 = vadd.f32 %v2980_v4, %v2979_v61  ;;  %v2461_v12 = vrot.slane %v2431_v0, %v5703_v54  ;;  %v4188_v32 = vld [vmem:[#allocation2 + $0x8] sm:$0xff] }
 0x370   :  { %v2482_v2 = vmul.f32 %v5767_v46, %v2453_v27  ;;  %v2483_v34 = vmul.f32 %v5770_v19, %v2453_v27  ;;  %v2465_v9 = vrot.slane %v2433_v56, %v5703_v54  ;;  %v2484_v42 = vmul.f32 %v5778_v52, %v2457_v35  ;;  %v4187_v27 = vld [vmem:[#allocation2] sm:$0xff] }
 0x371   :  { %v2492_v22 = vadd.f32 %v2491_v5, %v2480_v28  ;;  %v2499_v38 = vadd.f32 %v2498_v51, %v2481_v48  ;;  %4150 = vrcp.f32 %v2981_v43  ;;  %v2485_v24 = vmul.f32 %v5781_v17, %v2457_v35  ;;  %v4189_v56 = vld [vmem:[#allocation2 + $0x20] sm:$0xff]  ;;  %v4190_v5 = vld [vmem:[#allocation2 + $0x28] sm:$0xff] }
 0x372   :  { %v2486_v40 = vmul.f32 %v5785_v57, %v2461_v12  ;;  %v2487_v46 = vmul.f32 %v5788_v3, %v2461_v12  ;;  %v2488_v19 = vmul.f32 %v5794_v26, %v2465_v9  ;;  %v2489_v39 = vmul.f32 %v5798_v29, %v2465_v9 }
 0x373   :  { %v2493_v25 = vadd.f32 %v2492_v22, %v2482_v2  ;;  %v2500_v18 = vadd.f32 %v2499_v38, %v2483_v34  ;;  %v4192_v34 = vld [vmem:[#allocation2 + $0x38] sm:$0xff] }
 0x375   :  { %v2494_v58 = vadd.f32 %v2493_v25, %v2484_v42  ;;  %v2501_v33 = vadd.f32 %v2500_v18, %v2485_v24  ;;  %v4193_v25 = vld [vmem:[#allocation2 + $0x40] sm:$0xff] }
 0x377   :  { %v4147_v14 = vpop.eup %4146  ;;  %v2495_v15 = vadd.f32 %v2494_v58, %v2486_v40  ;;  %v2502_v52 = vadd.f32 %v2501_v33, %v2487_v46  ;;  %v4195_v46 = vld [vmem:[#allocation2 + $0x50] sm:$0xff] }
 0x378   :  { %v4149_v53 = vpop.eup %4148  ;;  %1917 = vst [vmem:[#allocation7 + $0x30] sm:$0xff] %v4147_v14  ;;  %v4194_v14 = vld [vmem:[#allocation2 + $0x48] sm:$0xff] }
 0x379   :  { %1918 = vst [vmem:[#allocation7 + $0x38] sm:$0xff] %v4149_v53  ;;  %v2496_v30 = vadd.f32 %v2495_v15, %v2488_v19  ;;  %v2503_v36 = vadd.f32 %v2502_v52, %v2489_v39  ;;  %v4196_v15 = vld [vmem:[#allocation2 + $0x58] sm:$0xff] }
 0x37b   :  { %v3147_v17 = vmul.f32 -1.442695, %v2496_v30  ;;  %v4151_v20 = vpop.eup %4150  ;;  %v3148_v13 = vmul.f32 -1.442695, %v2503_v36  ;;  %v4197_v36 = vld [vmem:[#allocation2 + $0x60] sm:$0xff] }
 0x37c   :  { %v2983_v57 = vmul.f32 %v4151_v20, %v5987_v62 }
 0x37d   :  { %4152 = vpow2.f32 %v3147_v17 }
 0x37e   :  { %4154 = vpow2.f32 %v3148_v13  ;;  %v2985_v16 = vcombine.high %v2983_v57, %v2983_v57  ;;  %v2992_v3 = vrot.slane %v2983_v57, %v5721_v7  ;;  %v4198_v57 = vld [vmem:[#allocation2 + $0x68] sm:$0xff] }
 0x380   :  { %v3000_v47 = vcombine.high %v2992_v3, %v2992_v3  ;;  %v3008_v11 = vrot.slane %v2992_v3, %v5721_v7  ;;  %v2999_v26 = vrot.slane %v2985_v16, %v5721_v7 }
 0x382   :  { %v3022_v29 = vrot.slane %v3000_v47, %v5721_v7  ;;  %v3030_v50 = vcombine.high %v3008_v11, %v3008_v11  ;;  %v3001_v45 = vcombine.high %v2999_v26, %v2999_v26  ;;  %v3037_v21 = vrot.slane %v3008_v11, %v5703_v54  ;;  %v4199_v47 = vld [vmem:[#allocation2 + $0x70] sm:$0xff] }
 0x383   :  { %v3015_v55 = vrot.slane %v2999_v26, %v5721_v7 }
 0x384   :  { %v3041_v44 = vrot.slane %v3022_v29, %v5703_v54  ;;  %v3032_v49 = vcombine.high %v3022_v29, %v3022_v29  ;;  %v3045_v6 = vrot.slane %v3030_v50, %v5703_v54  ;;  %v3029_v60 = vrot.slane %v3001_v45, %v5721_v7  ;;  %v4191_v7 = vld [vmem:[#allocation2 + $0x30] sm:$0xff] }
 0x385   :  { %v3074_v31 = vmul.f32 %v4187_v27, %v3037_v21  ;;  %v3075_v59 = vmul.f32 %v4188_v32, %v3037_v21  ;;  %v3031_v37 = vcombine.high %v3015_v55, %v3015_v55  ;;  %v3053_v4 = vrot.slane %v3015_v55, %v5703_v54 }
 0x386   :  { %v3076_v61 = vmul.f32 %v4185_v63, %v3041_v44  ;;  %v3077_v8 = vmul.f32 %v4186_v10, %v3041_v44  ;;  %v3049_v0 = vrot.slane %v3032_v49, %v5703_v54  ;;  %v3078_v35 = vmul.f32 %v4189_v56, %v3045_v6 }
 0x387   :  { %v4153_v1 = vpop.eup %4152  ;;  %v3079_v48 = vmul.f32 %v4190_v5, %v3045_v6  ;;  %v3033_v43 = vcombine.high %v3029_v60, %v3029_v60  ;;  %v3057_v12 = vrot.slane %v3029_v60, %v5703_v54  ;;  %v3061_v42 = vrot.slane %v3031_v37, %v5703_v54 }
 0x388   :  { %v4155_v62 = vpop.eup %4154  ;;  %v2510_v41 = vadd.f32 1.0, %v4153_v1  ;;  %v3090_v28 = vadd.f32 %v3076_v61, %v3074_v31  ;;  %v3097_v51 = vadd.f32 %v3077_v8, %v3075_v59  ;;  %v3080_v2 = vmul.f32 %v4191_v7, %v3049_v0 }
 0x389   :  { %v2511_v23 = vadd.f32 1.0, %v4155_v62  ;;  %v3081_v38 = vmul.f32 %v4192_v34, %v3049_v0  ;;  %v3082_v24 = vmul.f32 %v4193_v25, %v3053_v4  ;;  %v3083_v40 = vmul.f32 %v4194_v14, %v3053_v4 }
 0x38a   :  { %4156 = vrcp.f32 %v2510_v41  ;;  %v3091_v22 = vadd.f32 %v3090_v28, %v3078_v35  ;;  %v3098_v9 = vadd.f32 %v3097_v51, %v3079_v48  ;;  %v3065_v53 = vrot.slane %v3033_v43, %v5703_v54  ;;  %v4200_v54 = vld [vmem:[#allocation2 + $0x78] sm:$0xff] }
 0x38b   :  { %4158 = vrcp.f32 %v2511_v23  ;;  %v3084_v33 = vmul.f32 %v4195_v46, %v3057_v12  ;;  %v3085_v39 = vmul.f32 %v4196_v15, %v3057_v12  ;;  %v3086_v17 = vmul.f32 %v4197_v36, %v3061_v42 }
 0x38c   :  { %v3092_v18 = vadd.f32 %v3091_v22, %v3080_v2  ;;  %v3099_v58 = vadd.f32 %v3098_v9, %v3081_v38  ;;  %v3087_v16 = vmul.f32 %v4198_v57, %v3061_v42  ;;  %v3088_v11 = vmul.f32 %v4199_v47, %v3065_v53 }
 0x38d   :  { %v3089_v29 = vmul.f32 %v4200_v54, %v3065_v53 }
 0x38e   :  { %v3093_v19 = vadd.f32 %v3092_v18, %v3082_v24  ;;  %v3100_v52 = vadd.f32 %v3099_v58, %v3083_v40 }
 0x390   :  { %v3094_v20 = vadd.f32 %v3093_v19, %v3084_v33  ;;  %v3101_v3 = vadd.f32 %v3100_v52, %v3085_v39 }
 0x392   :  { %v3095_v26 = vadd.f32 %v3094_v20, %v3086_v17  ;;  %v3102_v50 = vadd.f32 %v3101_v3, %v3087_v16 }
 0x394   :  { %v4157_v30 = vpop.eup %4156  ;;  %v3096_v44 = vadd.f32 %v3095_v26, %v3088_v11  ;;  %v3103_v45 = vadd.f32 %v3102_v50, %v3089_v29 }
 0x395   :  { %v4159_v13 = vpop.eup %4158  ;;  %2517 = vst [vmem:[#allocation7 + $0x50] sm:$0xff] %v4157_v30 }
 0x396   :  { %2518 = vst [vmem:[#allocation7 + $0x58] sm:$0xff] %v4159_v13  ;;  %v3151_v49 = vmul.f32 -1.442695, %v3096_v44  ;;  %v3152_v21 = vmul.f32 -1.442695, %v3103_v45 }
 0x398   :  { %4160 = vpow2.f32 %v3151_v49 }
 0x399   :  { %4162 = vpow2.f32 %v3152_v21 }
 0x3a2   :  { %v4161_v1 = vpop.eup %4160 }
 0x3a3   :  { %v4163_v62 = vpop.eup %4162  ;;  %v3110_v41 = vadd.f32 1.0, %v4161_v1 }
 0x3a4   :  { %v3111_v55 = vadd.f32 1.0, %v4163_v62 }
 0x3a5   :  { %4164 = vrcp.f32 %v3110_v41 }
 0x3a6   :  { %4166 = vrcp.f32 %v3111_v55 }
 0x3af   :  { %v4165_v6 = vpop.eup %4164 }
 0x3b0   :  { %v4167_v63 = vpop.eup %4166  ;;  %3117 = vst [vmem:[#allocation7 + $0x70] sm:$0xff] %v4165_v6 }
 0x3b1   :  { %3118 = vst [vmem:[#allocation7 + $0x78] sm:$0xff] %v4167_v63 }
 0x3b2   :  { %4256 = shalt.err (!%p4253_p6)
}
 0x3b3   :  { %s4257_s24 = scalar_lea.hbm %s6057_s5, 2048 }
 0x3b4   :  { %p4258_p7 = scmp.ne.s32.totalorder %s6057_s5, %s4257_s24  ;;  %p4261_p8 = scmp.lt.u32.totalorder %s4257_s24, %s6057_s5 }
 0x3b6   :  { %p4263_p9 = pnand %p4261_p8, %p4258_p7 }
 0x3b8   :  { %4266 = shalt.err (!%p4263_p9)
}
 0x3b9   :  { %3130 = dma.vmem_to_hbm [thread:$0]  %s3125_s20, 2048, %s6057_s5, [#allocation4], %s4274_s28, %s4274_s28, %s4275_s29  }
 0x3ba   :  { %4271 = dma.done.wait [#allocation4], 2048  }
 0x3bb   :  { %4272 = vsyncadd [#allocation4], 4294965248 }
 0x3bc   :  { %3134 = vsyncpa [#allocation3], 1 }
 0x3bd   :  { %3135 = vsyncpa [#allocation6], 1 }
 0x3be   :  { %3136 = vsyncpa [#allocation4], 1 }

</bundles_post_ra>
